<compile_context>
chip_gen: v6e
topology: v6e:2x2x1
jax: 0.10.0
libtpu: 0.0.40
codegen_flags: <defaults>
</compile_context>

<pallas_src>
import jax
import jax.numpy as jnp
from jax.experimental import pallas as pl
from jax.experimental.pallas import tpu as pltpu

# ----------------------------- configuration --------------------------------
IMG = 16
PATCH = 8
C_IN = 3
WIDTH = 32
HEADS = 4
LAYERS = 2
OUT_DIM = 16

GRID = IMG // PATCH             # 2
NUM_PATCHES = GRID * GRID       # 4
SEQ = NUM_PATCHES + 1           # 5 (CLS + patches)
SEQ_PAD = 8                     # padded to a sublane multiple
HEAD_DIM = WIDTH // HEADS       # 8
MLP_DIM = 4 * WIDTH             # 128
PATCH_K = C_IN * PATCH * PATCH  # 192
EPS = 1e-5


# ------------------------------ fused kernel ---------------------------------
def _layer_norm(x, w, b):
    # single-pass mean / E[x^2]: the two cross-lane reductions are independent
    mu = jnp.mean(x, axis=-1, keepdims=True)
    m2 = jnp.mean(x * x, axis=-1, keepdims=True)
    var = m2 - mu * mu
    return (x - mu) * jax.lax.rsqrt(var + EPS) * w + b


def vit_kernel(patches_ref, conv_w_ref, cls_pos_ref,
               ln_pre_w_ref, ln_pre_b_ref,
               ln1_w_ref, ln1_b_ref,
               wqkv_ref, bqkv_ref, wo_ref, bo_ref,
               ln2_w_ref, ln2_b_ref,
               w1_ref, b1_ref, w2_ref, b2_ref,
               ln_post_w_ref, ln_post_b_ref, proj_ref,
               out_ref):
    bsz = out_ref.shape[0]
    m = bsz * SEQ_PAD

    # additive key mask for the padded token positions (SEQ..SEQ_PAD-1)
    kidx = jax.lax.broadcasted_iota(jnp.int32, (1, 1, SEQ_PAD), 2)
    key_mask = jnp.where(kidx < SEQ, 0.0, -1e9).astype(jnp.float32)

    def split_heads(t):   # [M, W] -> [B*H, S, D]
        return (t.reshape(bsz, SEQ_PAD, HEADS, HEAD_DIM)
                 .transpose(0, 2, 1, 3)
                 .reshape(bsz * HEADS, SEQ_PAD, HEAD_DIM))

    def merge_heads(t):   # [B*H, S, D] -> [M, W]
        return (t.reshape(bsz, HEADS, SEQ_PAD, HEAD_DIM)
                 .transpose(0, 2, 1, 3)
                 .reshape(m, WIDTH))

    # ---- patch embedding (bf16 MXU, f32 accumulate) + CLS/pos add ----
    # CLS and pad rows of `patches` are zero, so one [M, K] @ [K, W] matmul
    # covers the whole (padded) sequence; cls_pos row 0 carries cls + pos[0].
    patches = patches_ref[...].reshape(m, PATCH_K)
    x = jnp.dot(patches.astype(jnp.bfloat16), conv_w_ref[...],
                preferred_element_type=jnp.float32)                  # [M, W]
    x = (x.reshape(bsz, SEQ_PAD, WIDTH) + cls_pos_ref[...][None]
         ).reshape(m, WIDTH)

    # ---- ln_pre ----
    x = _layer_norm(x, ln_pre_w_ref[...], ln_pre_b_ref[...])

    # ---- transformer resblocks (static loop; weights stay in VMEM) ----
    # TODO(synk): at real CLIP ViT-B/L sizes, stream per-layer weights via an
    # "arbitrary" grid axis over LAYERS instead of keeping all layers resident.
    for l in range(LAYERS):
        # pre-LN multi-head self-attention + residual
        xn = _layer_norm(x, ln1_w_ref[l], ln1_b_ref[l])
        qkv = jnp.dot(xn.astype(jnp.bfloat16), wqkv_ref[l],
                      preferred_element_type=jnp.float32) + bqkv_ref[l]
        q = split_heads(qkv[:, 0 * WIDTH:1 * WIDTH])   # scale pre-folded in wqkv
        k = split_heads(qkv[:, 1 * WIDTH:2 * WIDTH])
        v = split_heads(qkv[:, 2 * WIDTH:3 * WIDTH])

        s = jnp.einsum('nqd,nkd->nqk',
                       q.astype(jnp.bfloat16), k.astype(jnp.bfloat16),
                       preferred_element_type=jnp.float32)           # [B*H,S,S]
        s = s + key_mask
        s = s - jnp.max(s, axis=-1, keepdims=True)
        p = jnp.exp(s)
        p = p * pl.reciprocal(jnp.sum(p, axis=-1, keepdims=True), approx=True)

        o = jnp.einsum('nqk,nkd->nqd',
                       p.astype(jnp.bfloat16), v.astype(jnp.bfloat16),
                       preferred_element_type=jnp.float32)           # [B*H,S,D]
        attn = jnp.dot(merge_heads(o).astype(jnp.bfloat16), wo_ref[l],
                       preferred_element_type=jnp.float32) + bo_ref[l]
        x = x + attn

        # pre-LN MLP (QuickGELU, as in CLIP) + residual
        xn = _layer_norm(x, ln2_w_ref[l], ln2_b_ref[l])
        h = jnp.dot(xn.astype(jnp.bfloat16), w1_ref[l],
                    preferred_element_type=jnp.float32) + b1_ref[l]
        h = h * jax.nn.sigmoid(1.702 * h)                            # QuickGELU
        x = x + jnp.dot(h.astype(jnp.bfloat16), w2_ref[l],
                        preferred_element_type=jnp.float32) + b2_ref[l]

    # ---- ln_post on the CLS token + output projection ----
    cls_tok = x.reshape(bsz, SEQ_PAD, WIDTH)[:, 0, :]                # [B, W]
    cls_tok = _layer_norm(cls_tok, ln_post_w_ref[...], ln_post_b_ref[...])
    out_ref[...] = jnp.dot(cls_tok.astype(jnp.bfloat16), proj_ref[...],
                           preferred_element_type=jnp.float32)


# ------------------------------ pallas wrapper --------------------------------
_WEIGHT_NAMES = ["conv_w", "cls_pos", "ln_pre_w", "ln_pre_b",
                 "ln1_w", "ln1_b", "wqkv", "bqkv", "wo", "bo",
                 "ln2_w", "ln2_b", "w1", "b1", "w2", "b2",
                 "ln_post_w", "ln_post_b", "proj"]


def image_clip_forward(image, p, *, b_tile=None):
    """image: [B, C, H, W] (NCHW, float32) -> [B, OUT_DIM], one pallas_call."""
    B = image.shape[0]
    if b_tile is None:
        b_tile = B if B <= 32 else 32        # keep M = b_tile*SEQ_PAD large
    assert B % b_tile == 0

    # Unfold NCHW into per-patch rows (cheap XLA glue). Zero rows are added
    # for the CLS position and the SEQ->SEQ_PAD padding so the patch-embed
    # matmul in the kernel covers all SEQ_PAD rows (zero row -> zero embed).
    patches = image.reshape(B, C_IN, GRID, PATCH, GRID, PATCH)
    patches = patches.transpose(0, 2, 4, 1, 3, 5).reshape(B, NUM_PATCHES, PATCH_K)
    patches = jnp.concatenate(
        [jnp.zeros((B, 1, PATCH_K), jnp.float32),
         patches,
         jnp.zeros((B, SEQ_PAD - SEQ, PATCH_K), jnp.float32)], axis=1)

    weights = [p[name] for name in _WEIGHT_NAMES]

    def full_spec(arr):
        nd = arr.ndim
        return pl.BlockSpec(arr.shape, lambda b, _nd=nd: (0,) * _nd)

    grid = (B // b_tile,)
    in_specs = ([pl.BlockSpec((b_tile, SEQ_PAD, PATCH_K), lambda b: (b, 0, 0))]
                + [full_spec(w) for w in weights])
    out_specs = pl.BlockSpec((b_tile, OUT_DIM), lambda b: (b, 0))

    return pl.pallas_call(
        vit_kernel,
        out_shape=jax.ShapeDtypeStruct((B, OUT_DIM), jnp.float32),
        grid=grid,
        in_specs=in_specs,
        out_specs=out_specs,
        compiler_params=pltpu.CompilerParams(
            dimension_semantics=("parallel",)),
    )(patches, *weights)


# ------------------------------ parameter init --------------------------------
def init_params(key):
    """Synthetic CLIP-visual weights, pre-laid-out for the fused kernel."""
    def nrm(k, shape, scale=0.02):
        return (scale * jax.random.normal(k, shape)).astype(jnp.float32)

    keys = iter(jax.random.split(key, 8 + LAYERS * 8))
    scale = HEAD_DIM ** -0.5

    conv_w = nrm(next(keys), (WIDTH, C_IN, PATCH, PATCH), scale=0.05)
    cls = nrm(next(keys), (WIDTH,), scale=WIDTH ** -0.5)      # class_embedding
    pos = nrm(next(keys), (SEQ, WIDTH), scale=WIDTH ** -0.5)  # positional_embedding

    # row 0 = cls + pos[0]; rows 1..SEQ-1 = pos[1..]; pad rows = 0
    cls_pos = jnp.concatenate([(cls + pos[0])[None, :], pos[1:]], axis=0)
    cls_pos = jnp.concatenate(
        [cls_pos, jnp.zeros((SEQ_PAD - SEQ, WIDTH), jnp.float32)], axis=0)

    p = {
        "conv_w": conv_w.reshape(WIDTH, PATCH_K).T.astype(jnp.bfloat16),  # [K, W]
        "cls_pos": cls_pos,                                               # [S_pad, W]
        "ln_pre_w": jnp.ones((1, WIDTH), jnp.float32),
        "ln_pre_b": jnp.zeros((1, WIDTH), jnp.float32),
        "ln_post_w": jnp.ones((1, WIDTH), jnp.float32),
        "ln_post_b": jnp.zeros((1, WIDTH), jnp.float32),
        "proj": nrm(next(keys), (WIDTH, OUT_DIM),
                    scale=WIDTH ** -0.5).astype(jnp.bfloat16),
    }

    names = ["ln1_w", "ln1_b", "wqkv", "bqkv", "wo", "bo",
             "ln2_w", "ln2_b", "w1", "b1", "w2", "b2"]
    per_layer = {name: [] for name in names}

    # 1/sqrt(HEAD_DIM) folded into the q columns of the fused qkv weight/bias
    qscale = jnp.concatenate(
        [jnp.full((WIDTH,), scale, jnp.float32),
         jnp.ones((2 * WIDTH,), jnp.float32)], axis=0)

    for _ in range(LAYERS):
        in_proj_w = nrm(next(keys), (3 * WIDTH, WIDTH))   # [3W, W] (rows: q,k,v)
        in_proj_b = nrm(next(keys), (3 * WIDTH,))
        out_proj_w = nrm(next(keys), (WIDTH, WIDTH))      # attn = cat @ out_proj_w.T
        c_fc_w = nrm(next(keys), (MLP_DIM, WIDTH))        # [4W, W]
        c_fc_b = nrm(next(keys), (MLP_DIM,))
        c_proj_w = nrm(next(keys), (WIDTH, MLP_DIM))      # [W, 4W]

        wqkv = in_proj_w.T * qscale[None, :]              # [W, 3W], q,k,v columns
        bqkv = in_proj_b * qscale

        per_layer["ln1_w"].append(jnp.ones((1, WIDTH), jnp.float32))
        per_layer["ln1_b"].append(jnp.zeros((1, WIDTH), jnp.float32))
        per_layer["wqkv"].append(wqkv.astype(jnp.bfloat16))
        per_layer["bqkv"].append(bqkv.reshape(1, 3 * WIDTH))
        per_layer["wo"].append(out_proj_w.T.astype(jnp.bfloat16))   # [W, W]
        per_layer["bo"].append(jnp.zeros((1, WIDTH), jnp.float32))  # out_proj bias
        per_layer["ln2_w"].append(jnp.ones((1, WIDTH), jnp.float32))
        per_layer["ln2_b"].append(jnp.zeros((1, WIDTH), jnp.float32))
        per_layer["w1"].append(c_fc_w.T.astype(jnp.bfloat16))       # [W, 4W]
        per_layer["b1"].append(c_fc_b.reshape(1, MLP_DIM))
        per_layer["w2"].append(c_proj_w.T.astype(jnp.bfloat16))     # [4W, W]
        per_layer["b2"].append(jnp.zeros((1, WIDTH), jnp.float32))  # c_proj bias

    for name in names:
        p[name] = jnp.stack(per_layer[name], axis=0)      # leading LAYERS dim
    return p


# ------------------------------------ main -------------------------------------
if __name__ == "__main__":
    key = jax.random.PRNGKey(0)
    k_img, k_par = jax.random.split(key)

    image = jax.random.normal(k_img, (2, C_IN, IMG, IMG), dtype=jnp.float32)
    params = init_params(k_par)

    out = image_clip_forward(image, params)
    out = jax.block_until_ready(out)

    assert out.shape == (2, OUT_DIM), out.shape
    assert bool(jnp.all(jnp.isfinite(out)))
    print("KERNEL_OK")
</pallas_src>

<mosaic_0001>
module attributes {stable_mosaic.version = 11 : i64} {
  func.func @vit_kernel(%arg0: i32, %arg1: memref<2x8x192xf32, #tpu.memory_space<vmem>>, %arg2: memref<192x32xbf16, #tpu.memory_space<vmem>>, %arg3: memref<8x32xf32, #tpu.memory_space<vmem>>, %arg4: memref<1x32xf32, #tpu.memory_space<vmem>>, %arg5: memref<1x32xf32, #tpu.memory_space<vmem>>, %arg6: memref<2x1x32xf32, #tpu.memory_space<vmem>>, %arg7: memref<2x1x32xf32, #tpu.memory_space<vmem>>, %arg8: memref<2x32x96xbf16, #tpu.memory_space<vmem>>, %arg9: memref<2x1x96xf32, #tpu.memory_space<vmem>>, %arg10: memref<2x32x32xbf16, #tpu.memory_space<vmem>>, %arg11: memref<2x1x32xf32, #tpu.memory_space<vmem>>, %arg12: memref<2x1x32xf32, #tpu.memory_space<vmem>>, %arg13: memref<2x1x32xf32, #tpu.memory_space<vmem>>, %arg14: memref<2x32x128xbf16, #tpu.memory_space<vmem>>, %arg15: memref<2x1x128xf32, #tpu.memory_space<vmem>>, %arg16: memref<2x128x32xbf16, #tpu.memory_space<vmem>>, %arg17: memref<2x1x32xf32, #tpu.memory_space<vmem>>, %arg18: memref<1x32xf32, #tpu.memory_space<vmem>>, %arg19: memref<1x32xf32, #tpu.memory_space<vmem>>, %arg20: memref<32x16xbf16, #tpu.memory_space<vmem>>, %arg21: memref<2x16xf32, #tpu.memory_space<vmem>>) attributes {dimension_semantics = [#tpu.dimension_semantics<parallel>], iteration_bounds = array<i64: 1>, scalar_prefetch = 0 : i64, scratch_operands = 0 : i64, tpu.core_type = #tpu.core_type<tc>, window_params = [{transform_indices = @transform_0, window_bounds = array<i64: 2, 8, 192>}, {pipeline_mode = #tpu.pipeline_mode<synchronous>, transform_indices = @transform_1, window_bounds = array<i64: 192, 32>}, {pipeline_mode = #tpu.pipeline_mode<synchronous>, transform_indices = @transform_2, window_bounds = array<i64: 8, 32>}, {pipeline_mode = #tpu.pipeline_mode<synchronous>, transform_indices = @transform_3, window_bounds = array<i64: 1, 32>}, {pipeline_mode = #tpu.pipeline_mode<synchronous>, transform_indices = @transform_4, window_bounds = array<i64: 1, 32>}, {pipeline_mode = #tpu.pipeline_mode<synchronous>, transform_indices = @transform_5, window_bounds = array<i64: 2, 1, 32>}, {pipeline_mode = #tpu.pipeline_mode<synchronous>, transform_indices = @transform_6, window_bounds = array<i64: 2, 1, 32>}, {pipeline_mode = #tpu.pipeline_mode<synchronous>, transform_indices = @transform_7, window_bounds = array<i64: 2, 32, 96>}, {pipeline_mode = #tpu.pipeline_mode<synchronous>, transform_indices = @transform_8, window_bounds = array<i64: 2, 1, 96>}, {pipeline_mode = #tpu.pipeline_mode<synchronous>, transform_indices = @transform_9, window_bounds = array<i64: 2, 32, 32>}, {pipeline_mode = #tpu.pipeline_mode<synchronous>, transform_indices = @transform_10, window_bounds = array<i64: 2, 1, 32>}, {pipeline_mode = #tpu.pipeline_mode<synchronous>, transform_indices = @transform_11, window_bounds = array<i64: 2, 1, 32>}, {pipeline_mode = #tpu.pipeline_mode<synchronous>, transform_indices = @transform_12, window_bounds = array<i64: 2, 1, 32>}, {pipeline_mode = #tpu.pipeline_mode<synchronous>, transform_indices = @transform_13, window_bounds = array<i64: 2, 32, 128>}, {pipeline_mode = #tpu.pipeline_mode<synchronous>, transform_indices = @transform_14, window_bounds = array<i64: 2, 1, 128>}, {pipeline_mode = #tpu.pipeline_mode<synchronous>, transform_indices = @transform_15, window_bounds = array<i64: 2, 128, 32>}, {pipeline_mode = #tpu.pipeline_mode<synchronous>, transform_indices = @transform_16, window_bounds = array<i64: 2, 1, 32>}, {pipeline_mode = #tpu.pipeline_mode<synchronous>, transform_indices = @transform_17, window_bounds = array<i64: 1, 32>}, {pipeline_mode = #tpu.pipeline_mode<synchronous>, transform_indices = @transform_18, window_bounds = array<i64: 1, 32>}, {pipeline_mode = #tpu.pipeline_mode<synchronous>, transform_indices = @transform_19, window_bounds = array<i64: 32, 16>}, {transform_indices = @transform_20, window_bounds = array<i64: 2, 16>}]} {
    %0 = tpu.iota {dimensions = array<i32: 2>} : vector<1x1x8xi32>
    %c5_i32 = arith.constant 5 : i32
    %1 = vector.broadcast %c5_i32 : i32 to vector<1x1x8xi32>
    %2 = arith.cmpi slt, %0, %1 : vector<1x1x8xi32>
    %cst = arith.constant 0.000000e+00 : f32
    %cst_0 = arith.constant -1.000000e+09 : f32
    %3 = vector.broadcast %cst : f32 to vector<1x1x8xf32>
    %4 = vector.broadcast %cst_0 : f32 to vector<1x1x8xf32>
    %5 = arith.select %2, %3, %4 : vector<1x1x8xi1>, vector<1x1x8xf32>
    %c0 = arith.constant 0 : index
    %c0_1 = arith.constant 0 : index
    %c0_2 = arith.constant 0 : index
    %6 = vector.load %arg1[%c0, %c0_1, %c0_2] : memref<2x8x192xf32, #tpu.memory_space<vmem>>, vector<2x8x192xf32>
    %7 = vector.shape_cast %6 : vector<2x8x192xf32> to vector<16x192xf32>
    %8 = arith.truncf %7 : vector<16x192xf32> to vector<16x192xbf16>
    %c0_3 = arith.constant 0 : index
    %c0_4 = arith.constant 0 : index
    %9 = vector.load %arg2[%c0_3, %c0_4] : memref<192x32xbf16, #tpu.memory_space<vmem>>, vector<192x32xbf16>
    %cst_5 = arith.constant dense<0.000000e+00> : vector<16x32xf32>
    %10 = tpu.matmul %8, %9, %cst_5 {dimension_numbers = #tpu.dot_dimension_numbers<[1], [0], [0], [1], [0, 0, 1, 1], [], []>} : vector<16x192xbf16>, vector<192x32xbf16>, vector<16x32xf32> -> vector<16x32xf32>
    %11 = vector.shape_cast %10 : vector<16x32xf32> to vector<2x8x32xf32>
    %c0_6 = arith.constant 0 : index
    %c0_7 = arith.constant 0 : index
    %12 = vector.load %arg3[%c0_6, %c0_7] : memref<8x32xf32, #tpu.memory_space<vmem>>, vector<8x32xf32>
    %13 = vector.shape_cast %12 : vector<8x32xf32> to vector<1x8x32xf32>
    %14 = vector.broadcast %13 : vector<1x8x32xf32> to vector<2x8x32xf32>
    %15 = arith.addf %11, %14 : vector<2x8x32xf32>
    %16 = vector.shape_cast %15 : vector<2x8x32xf32> to vector<16x32xf32>
    %c0_8 = arith.constant 0 : index
    %c0_9 = arith.constant 0 : index
    %17 = vector.load %arg4[%c0_8, %c0_9] : memref<1x32xf32, #tpu.memory_space<vmem>>, vector<1x32xf32>
    %c0_10 = arith.constant 0 : index
    %c0_11 = arith.constant 0 : index
    %18 = vector.load %arg5[%c0_10, %c0_11] : memref<1x32xf32, #tpu.memory_space<vmem>>, vector<1x32xf32>
    %cst_12 = arith.constant dense<0.000000e+00> : vector<16xf32>
    %19 = vector.multi_reduction <add>, %16, %cst_12 [1] : vector<16x32xf32> to vector<16xf32>
    %20 = vector.shape_cast %19 : vector<16xf32> to vector<16x1xf32>
    %cst_13 = arith.constant 3.200000e+01 : f32
    %21 = vector.broadcast %cst_13 : f32 to vector<16x1xf32>
    %22 = arith.divf %20, %21 : vector<16x1xf32>
    %23 = arith.mulf %16, %16 : vector<16x32xf32>
    %cst_14 = arith.constant dense<0.000000e+00> : vector<16xf32>
    %24 = vector.multi_reduction <add>, %23, %cst_14 [1] : vector<16x32xf32> to vector<16xf32>
    %25 = vector.shape_cast %24 : vector<16xf32> to vector<16x1xf32>
    %cst_15 = arith.constant 3.200000e+01 : f32
    %26 = vector.broadcast %cst_15 : f32 to vector<16x1xf32>
    %27 = arith.divf %25, %26 : vector<16x1xf32>
    %28 = arith.mulf %22, %22 : vector<16x1xf32>
    %29 = arith.subf %27, %28 : vector<16x1xf32>
    %30 = vector.broadcast %22 : vector<16x1xf32> to vector<16x32xf32>
    %31 = arith.subf %16, %30 : vector<16x32xf32>
    %cst_16 = arith.constant 9.99999974E-6 : f32
    %32 = vector.broadcast %cst_16 : f32 to vector<16x1xf32>
    %33 = arith.addf %29, %32 : vector<16x1xf32>
    %34 = math.rsqrt %33 : vector<16x1xf32>
    %35 = vector.broadcast %34 : vector<16x1xf32> to vector<16x32xf32>
    %36 = arith.mulf %31, %35 : vector<16x32xf32>
    %37 = vector.broadcast %17 : vector<1x32xf32> to vector<16x32xf32>
    %38 = arith.mulf %36, %37 : vector<16x32xf32>
    %39 = vector.broadcast %18 : vector<1x32xf32> to vector<16x32xf32>
    %40 = arith.addf %38, %39 : vector<16x32xf32>
    %c0_17 = arith.constant 0 : index
    %c0_18 = arith.constant 0 : index
    %c0_19 = arith.constant 0 : index
    %41 = vector.load %arg6[%c0_17, %c0_18, %c0_19] : memref<2x1x32xf32, #tpu.memory_space<vmem>>, vector<1x1x32xf32>
    %42 = vector.shape_cast %41 : vector<1x1x32xf32> to vector<1x32xf32>
    %c0_20 = arith.constant 0 : index
    %c0_21 = arith.constant 0 : index
    %c0_22 = arith.constant 0 : index
    %43 = vector.load %arg7[%c0_20, %c0_21, %c0_22] : memref<2x1x32xf32, #tpu.memory_space<vmem>>, vector<1x1x32xf32>
    %44 = vector.shape_cast %43 : vector<1x1x32xf32> to vector<1x32xf32>
    %cst_23 = arith.constant dense<0.000000e+00> : vector<16xf32>
    %45 = vector.multi_reduction <add>, %40, %cst_23 [1] : vector<16x32xf32> to vector<16xf32>
    %46 = vector.shape_cast %45 : vector<16xf32> to vector<16x1xf32>
    %cst_24 = arith.constant 3.200000e+01 : f32
    %47 = vector.broadcast %cst_24 : f32 to vector<16x1xf32>
    %48 = arith.divf %46, %47 : vector<16x1xf32>
    %49 = arith.mulf %40, %40 : vector<16x32xf32>
    %cst_25 = arith.constant dense<0.000000e+00> : vector<16xf32>
    %50 = vector.multi_reduction <add>, %49, %cst_25 [1] : vector<16x32xf32> to vector<16xf32>
    %51 = vector.shape_cast %50 : vector<16xf32> to vector<16x1xf32>
    %cst_26 = arith.constant 3.200000e+01 : f32
    %52 = vector.broadcast %cst_26 : f32 to vector<16x1xf32>
    %53 = arith.divf %51, %52 : vector<16x1xf32>
    %54 = arith.mulf %48, %48 : vector<16x1xf32>
    %55 = arith.subf %53, %54 : vector<16x1xf32>
    %56 = vector.broadcast %48 : vector<16x1xf32> to vector<16x32xf32>
    %57 = arith.subf %40, %56 : vector<16x32xf32>
    %cst_27 = arith.constant 9.99999974E-6 : f32
    %58 = vector.broadcast %cst_27 : f32 to vector<16x1xf32>
    %59 = arith.addf %55, %58 : vector<16x1xf32>
    %60 = math.rsqrt %59 : vector<16x1xf32>
    %61 = vector.broadcast %60 : vector<16x1xf32> to vector<16x32xf32>
    %62 = arith.mulf %57, %61 : vector<16x32xf32>
    %63 = vector.broadcast %42 : vector<1x32xf32> to vector<16x32xf32>
    %64 = arith.mulf %62, %63 : vector<16x32xf32>
    %65 = vector.broadcast %44 : vector<1x32xf32> to vector<16x32xf32>
    %66 = arith.addf %64, %65 : vector<16x32xf32>
    %67 = arith.truncf %66 : vector<16x32xf32> to vector<16x32xbf16>
    %c0_28 = arith.constant 0 : index
    %c0_29 = arith.constant 0 : index
    %c0_30 = arith.constant 0 : index
    %68 = vector.load %arg8[%c0_28, %c0_29, %c0_30] : memref<2x32x96xbf16, #tpu.memory_space<vmem>>, vector<1x32x96xbf16>
    %69 = vector.shape_cast %68 : vector<1x32x96xbf16> to vector<32x96xbf16>
    %cst_31 = arith.constant dense<0.000000e+00> : vector<16x96xf32>
    %70 = tpu.matmul %67, %69, %cst_31 {dimension_numbers = #tpu.dot_dimension_numbers<[1], [0], [0], [1], [0, 0, 1, 1], [], []>} : vector<16x32xbf16>, vector<32x96xbf16>, vector<16x96xf32> -> vector<16x96xf32>
    %c0_32 = arith.constant 0 : index
    %c0_33 = arith.constant 0 : index
    %c0_34 = arith.constant 0 : index
    %71 = vector.load %arg9[%c0_32, %c0_33, %c0_34] : memref<2x1x96xf32, #tpu.memory_space<vmem>>, vector<1x1x96xf32>
    %72 = vector.shape_cast %71 : vector<1x1x96xf32> to vector<1x96xf32>
    %73 = vector.broadcast %72 : vector<1x96xf32> to vector<16x96xf32>
    %74 = arith.addf %70, %73 : vector<16x96xf32>
    %75 = vector.extract_strided_slice %74 {offsets = [0, 0], sizes = [16, 32], strides = [1, 1]} : vector<16x96xf32> to vector<16x32xf32>
    %76 = vector.shape_cast %75 : vector<16x32xf32> to vector<2x8x4x8xf32>
    %77 = tpu.transpose %76, [0, 2, 1, 3] : vector<2x8x4x8xf32> -> vector<2x4x8x8xf32>
    %78 = vector.shape_cast %77 : vector<2x4x8x8xf32> to vector<8x8x8xf32>
    %79 = vector.extract_strided_slice %74 {offsets = [0, 32], sizes = [16, 32], strides = [1, 1]} : vector<16x96xf32> to vector<16x32xf32>
    %80 = vector.shape_cast %79 : vector<16x32xf32> to vector<2x8x4x8xf32>
    %81 = tpu.transpose %80, [0, 2, 1, 3] : vector<2x8x4x8xf32> -> vector<2x4x8x8xf32>
    %82 = vector.shape_cast %81 : vector<2x4x8x8xf32> to vector<8x8x8xf32>
    %83 = vector.extract_strided_slice %74 {offsets = [0, 64], sizes = [16, 32], strides = [1, 1]} : vector<16x96xf32> to vector<16x32xf32>
    %84 = vector.shape_cast %83 : vector<16x32xf32> to vector<2x8x4x8xf32>
    %85 = tpu.transpose %84, [0, 2, 1, 3] : vector<2x8x4x8xf32> -> vector<2x4x8x8xf32>
    %86 = vector.shape_cast %85 : vector<2x4x8x8xf32> to vector<8x8x8xf32>
    %87 = arith.truncf %78 : vector<8x8x8xf32> to vector<8x8x8xbf16>
    %88 = arith.truncf %82 : vector<8x8x8xf32> to vector<8x8x8xbf16>
    "tpu.trace_start"() <{level = 10 : i32, message = "nqd,nkd->nqk"}> : () -> ()
    %cst_35 = arith.constant dense<0.000000e+00> : vector<8x8x8xf32>
    %89 = tpu.matmul %87, %88, %cst_35 {dimension_numbers = #tpu.dot_dimension_numbers<[2], [2], [1], [1], [0, 0, 0, 1, 1, 1], [0], [0]>} : vector<8x8x8xbf16>, vector<8x8x8xbf16>, vector<8x8x8xf32> -> vector<8x8x8xf32>
    "tpu.trace_stop"() : () -> ()
    %90 = vector.broadcast %5 : vector<1x1x8xf32> to vector<8x8x8xf32>
    %91 = arith.addf %89, %90 : vector<8x8x8xf32>
    %cst_36 = arith.constant dense<0xFF800000> : vector<8x8xf32>
    %92 = vector.multi_reduction <maximumf>, %91, %cst_36 [2] : vector<8x8x8xf32> to vector<8x8xf32>
    %93 = vector.shape_cast %92 : vector<8x8xf32> to vector<8x8x1xf32>
    %94 = vector.broadcast %93 : vector<8x8x1xf32> to vector<8x8x8xf32>
    %95 = arith.subf %91, %94 : vector<8x8x8xf32>
    %96 = math.exp %95 : vector<8x8x8xf32>
    %cst_37 = arith.constant dense<0.000000e+00> : vector<8x8xf32>
    %97 = vector.multi_reduction <add>, %96, %cst_37 [2] : vector<8x8x8xf32> to vector<8x8xf32>
    %98 = vector.shape_cast %97 : vector<8x8xf32> to vector<8x8x1xf32>
    %99 = tpu.reciprocal %98 {approx = true} : vector<8x8x1xf32> -> vector<8x8x1xf32>
    %100 = vector.broadcast %99 : vector<8x8x1xf32> to vector<8x8x8xf32>
    %101 = arith.mulf %96, %100 : vector<8x8x8xf32>
    %102 = arith.truncf %101 : vector<8x8x8xf32> to vector<8x8x8xbf16>
    %103 = arith.truncf %86 : vector<8x8x8xf32> to vector<8x8x8xbf16>
    "tpu.trace_start"() <{level = 10 : i32, message = "nqk,nkd->nqd"}> : () -> ()
    %cst_38 = arith.constant dense<0.000000e+00> : vector<8x8x8xf32>
    %104 = tpu.matmul %102, %103, %cst_38 {dimension_numbers = #tpu.dot_dimension_numbers<[2], [1], [1], [2], [0, 0, 0, 1, 1, 2], [0], [0]>} : vector<8x8x8xbf16>, vector<8x8x8xbf16>, vector<8x8x8xf32> -> vector<8x8x8xf32>
    "tpu.trace_stop"() : () -> ()
    %105 = vector.shape_cast %104 : vector<8x8x8xf32> to vector<2x4x8x8xf32>
    %106 = tpu.transpose %105, [0, 2, 1, 3] : vector<2x4x8x8xf32> -> vector<2x8x4x8xf32>
    %107 = vector.shape_cast %106 : vector<2x8x4x8xf32> to vector<16x32xf32>
    %108 = arith.truncf %107 : vector<16x32xf32> to vector<16x32xbf16>
    %c0_39 = arith.constant 0 : index
    %c0_40 = arith.constant 0 : index
    %c0_41 = arith.constant 0 : index
    %109 = vector.load %arg10[%c0_39, %c0_40, %c0_41] : memref<2x32x32xbf16, #tpu.memory_space<vmem>>, vector<1x32x32xbf16>
    %110 = vector.shape_cast %109 : vector<1x32x32xbf16> to vector<32x32xbf16>
    %cst_42 = arith.constant dense<0.000000e+00> : vector<16x32xf32>
    %111 = tpu.matmul %108, %110, %cst_42 {dimension_numbers = #tpu.dot_dimension_numbers<[1], [0], [0], [1], [0, 0, 1, 1], [], []>} : vector<16x32xbf16>, vector<32x32xbf16>, vector<16x32xf32> -> vector<16x32xf32>
    %c0_43 = arith.constant 0 : index
    %c0_44 = arith.constant 0 : index
    %c0_45 = arith.constant 0 : index
    %112 = vector.load %arg11[%c0_43, %c0_44, %c0_45] : memref<2x1x32xf32, #tpu.memory_space<vmem>>, vector<1x1x32xf32>
    %113 = vector.shape_cast %112 : vector<1x1x32xf32> to vector<1x32xf32>
    %114 = vector.broadcast %113 : vector<1x32xf32> to vector<16x32xf32>
    %115 = arith.addf %111, %114 : vector<16x32xf32>
    %116 = arith.addf %40, %115 : vector<16x32xf32>
    %c0_46 = arith.constant 0 : index
    %c0_47 = arith.constant 0 : index
    %c0_48 = arith.constant 0 : index
    %117 = vector.load %arg12[%c0_46, %c0_47, %c0_48] : memref<2x1x32xf32, #tpu.memory_space<vmem>>, vector<1x1x32xf32>
    %118 = vector.shape_cast %117 : vector<1x1x32xf32> to vector<1x32xf32>
    %c0_49 = arith.constant 0 : index
    %c0_50 = arith.constant 0 : index
    %c0_51 = arith.constant 0 : index
    %119 = vector.load %arg13[%c0_49, %c0_50, %c0_51] : memref<2x1x32xf32, #tpu.memory_space<vmem>>, vector<1x1x32xf32>
    %120 = vector.shape_cast %119 : vector<1x1x32xf32> to vector<1x32xf32>
    %cst_52 = arith.constant dense<0.000000e+00> : vector<16xf32>
    %121 = vector.multi_reduction <add>, %116, %cst_52 [1] : vector<16x32xf32> to vector<16xf32>
    %122 = vector.shape_cast %121 : vector<16xf32> to vector<16x1xf32>
    %cst_53 = arith.constant 3.200000e+01 : f32
    %123 = vector.broadcast %cst_53 : f32 to vector<16x1xf32>
    %124 = arith.divf %122, %123 : vector<16x1xf32>
    %125 = arith.mulf %116, %116 : vector<16x32xf32>
    %cst_54 = arith.constant dense<0.000000e+00> : vector<16xf32>
    %126 = vector.multi_reduction <add>, %125, %cst_54 [1] : vector<16x32xf32> to vector<16xf32>
    %127 = vector.shape_cast %126 : vector<16xf32> to vector<16x1xf32>
    %cst_55 = arith.constant 3.200000e+01 : f32
    %128 = vector.broadcast %cst_55 : f32 to vector<16x1xf32>
    %129 = arith.divf %127, %128 : vector<16x1xf32>
    %130 = arith.mulf %124, %124 : vector<16x1xf32>
    %131 = arith.subf %129, %130 : vector<16x1xf32>
    %132 = vector.broadcast %124 : vector<16x1xf32> to vector<16x32xf32>
    %133 = arith.subf %116, %132 : vector<16x32xf32>
    %cst_56 = arith.constant 9.99999974E-6 : f32
    %134 = vector.broadcast %cst_56 : f32 to vector<16x1xf32>
    %135 = arith.addf %131, %134 : vector<16x1xf32>
    %136 = math.rsqrt %135 : vector<16x1xf32>
    %137 = vector.broadcast %136 : vector<16x1xf32> to vector<16x32xf32>
    %138 = arith.mulf %133, %137 : vector<16x32xf32>
    %139 = vector.broadcast %118 : vector<1x32xf32> to vector<16x32xf32>
    %140 = arith.mulf %138, %139 : vector<16x32xf32>
    %141 = vector.broadcast %120 : vector<1x32xf32> to vector<16x32xf32>
    %142 = arith.addf %140, %141 : vector<16x32xf32>
    %143 = arith.truncf %142 : vector<16x32xf32> to vector<16x32xbf16>
    %c0_57 = arith.constant 0 : index
    %c0_58 = arith.constant 0 : index
    %c0_59 = arith.constant 0 : index
    %144 = vector.load %arg14[%c0_57, %c0_58, %c0_59] : memref<2x32x128xbf16, #tpu.memory_space<vmem>>, vector<1x32x128xbf16>
    %145 = vector.shape_cast %144 : vector<1x32x128xbf16> to vector<32x128xbf16>
    %cst_60 = arith.constant dense<0.000000e+00> : vector<16x128xf32>
    %146 = tpu.matmul %143, %145, %cst_60 {dimension_numbers = #tpu.dot_dimension_numbers<[1], [0], [0], [1], [0, 0, 1, 1], [], []>} : vector<16x32xbf16>, vector<32x128xbf16>, vector<16x128xf32> -> vector<16x128xf32>
    %c0_61 = arith.constant 0 : index
    %c0_62 = arith.constant 0 : index
    %c0_63 = arith.constant 0 : index
    %147 = vector.load %arg15[%c0_61, %c0_62, %c0_63] : memref<2x1x128xf32, #tpu.memory_space<vmem>>, vector<1x1x128xf32>
    %148 = vector.shape_cast %147 : vector<1x1x128xf32> to vector<1x128xf32>
    %149 = vector.broadcast %148 : vector<1x128xf32> to vector<16x128xf32>
    %150 = arith.addf %146, %149 : vector<16x128xf32>
    %cst_64 = arith.constant 1.702000e+00 : f32
    %151 = vector.broadcast %cst_64 : f32 to vector<16x128xf32>
    %152 = arith.mulf %151, %150 : vector<16x128xf32>
    %153 = arith.negf %152 : vector<16x128xf32>
    %154 = math.exp %153 : vector<16x128xf32>
    %cst_65 = arith.constant 1.000000e+00 : f32
    %155 = vector.broadcast %cst_65 : f32 to vector<16x128xf32>
    %156 = arith.addf %155, %154 : vector<16x128xf32>
    %157 = arith.divf %155, %156 : vector<16x128xf32>
    %158 = arith.mulf %150, %157 : vector<16x128xf32>
    %159 = arith.truncf %158 : vector<16x128xf32> to vector<16x128xbf16>
    %c0_66 = arith.constant 0 : index
    %c0_67 = arith.constant 0 : index
    %c0_68 = arith.constant 0 : index
    %160 = vector.load %arg16[%c0_66, %c0_67, %c0_68] : memref<2x128x32xbf16, #tpu.memory_space<vmem>>, vector<1x128x32xbf16>
    %161 = vector.shape_cast %160 : vector<1x128x32xbf16> to vector<128x32xbf16>
    %cst_69 = arith.constant dense<0.000000e+00> : vector<16x32xf32>
    %162 = tpu.matmul %159, %161, %cst_69 {dimension_numbers = #tpu.dot_dimension_numbers<[1], [0], [0], [1], [0, 0, 1, 1], [], []>} : vector<16x128xbf16>, vector<128x32xbf16>, vector<16x32xf32> -> vector<16x32xf32>
    %163 = arith.addf %116, %162 : vector<16x32xf32>
    %c0_70 = arith.constant 0 : index
    %c0_71 = arith.constant 0 : index
    %c0_72 = arith.constant 0 : index
    %164 = vector.load %arg17[%c0_70, %c0_71, %c0_72] : memref<2x1x32xf32, #tpu.memory_space<vmem>>, vector<1x1x32xf32>
    %165 = vector.shape_cast %164 : vector<1x1x32xf32> to vector<1x32xf32>
    %166 = vector.broadcast %165 : vector<1x32xf32> to vector<16x32xf32>
    %167 = arith.addf %163, %166 : vector<16x32xf32>
    %c1 = arith.constant 1 : index
    %c0_73 = arith.constant 0 : index
    %c0_74 = arith.constant 0 : index
    %168 = vector.load %arg6[%c1, %c0_73, %c0_74] : memref<2x1x32xf32, #tpu.memory_space<vmem>>, vector<1x1x32xf32>
    %169 = vector.shape_cast %168 : vector<1x1x32xf32> to vector<1x32xf32>
    %c1_75 = arith.constant 1 : index
    %c0_76 = arith.constant 0 : index
    %c0_77 = arith.constant 0 : index
    %170 = vector.load %arg7[%c1_75, %c0_76, %c0_77] : memref<2x1x32xf32, #tpu.memory_space<vmem>>, vector<1x1x32xf32>
    %171 = vector.shape_cast %170 : vector<1x1x32xf32> to vector<1x32xf32>
    %cst_78 = arith.constant dense<0.000000e+00> : vector<16xf32>
    %172 = vector.multi_reduction <add>, %167, %cst_78 [1] : vector<16x32xf32> to vector<16xf32>
    %173 = vector.shape_cast %172 : vector<16xf32> to vector<16x1xf32>
    %cst_79 = arith.constant 3.200000e+01 : f32
    %174 = vector.broadcast %cst_79 : f32 to vector<16x1xf32>
    %175 = arith.divf %173, %174 : vector<16x1xf32>
    %176 = arith.mulf %167, %167 : vector<16x32xf32>
    %cst_80 = arith.constant dense<0.000000e+00> : vector<16xf32>
    %177 = vector.multi_reduction <add>, %176, %cst_80 [1] : vector<16x32xf32> to vector<16xf32>
    %178 = vector.shape_cast %177 : vector<16xf32> to vector<16x1xf32>
    %cst_81 = arith.constant 3.200000e+01 : f32
    %179 = vector.broadcast %cst_81 : f32 to vector<16x1xf32>
    %180 = arith.divf %178, %179 : vector<16x1xf32>
    %181 = arith.mulf %175, %175 : vector<16x1xf32>
    %182 = arith.subf %180, %181 : vector<16x1xf32>
    %183 = vector.broadcast %175 : vector<16x1xf32> to vector<16x32xf32>
    %184 = arith.subf %167, %183 : vector<16x32xf32>
    %cst_82 = arith.constant 9.99999974E-6 : f32
    %185 = vector.broadcast %cst_82 : f32 to vector<16x1xf32>
    %186 = arith.addf %182, %185 : vector<16x1xf32>
    %187 = math.rsqrt %186 : vector<16x1xf32>
    %188 = vector.broadcast %187 : vector<16x1xf32> to vector<16x32xf32>
    %189 = arith.mulf %184, %188 : vector<16x32xf32>
    %190 = vector.broadcast %169 : vector<1x32xf32> to vector<16x32xf32>
    %191 = arith.mulf %189, %190 : vector<16x32xf32>
    %192 = vector.broadcast %171 : vector<1x32xf32> to vector<16x32xf32>
    %193 = arith.addf %191, %192 : vector<16x32xf32>
    %194 = arith.truncf %193 : vector<16x32xf32> to vector<16x32xbf16>
    %c1_83 = arith.constant 1 : index
    %c0_84 = arith.constant 0 : index
    %c0_85 = arith.constant 0 : index
    %195 = vector.load %arg8[%c1_83, %c0_84, %c0_85] : memref<2x32x96xbf16, #tpu.memory_space<vmem>>, vector<1x32x96xbf16>
    %196 = vector.shape_cast %195 : vector<1x32x96xbf16> to vector<32x96xbf16>
    %cst_86 = arith.constant dense<0.000000e+00> : vector<16x96xf32>
    %197 = tpu.matmul %194, %196, %cst_86 {dimension_numbers = #tpu.dot_dimension_numbers<[1], [0], [0], [1], [0, 0, 1, 1], [], []>} : vector<16x32xbf16>, vector<32x96xbf16>, vector<16x96xf32> -> vector<16x96xf32>
    %c1_87 = arith.constant 1 : index
    %c0_88 = arith.constant 0 : index
    %c0_89 = arith.constant 0 : index
    %198 = vector.load %arg9[%c1_87, %c0_88, %c0_89] : memref<2x1x96xf32, #tpu.memory_space<vmem>>, vector<1x1x96xf32>
    %199 = vector.shape_cast %198 : vector<1x1x96xf32> to vector<1x96xf32>
    %200 = vector.broadcast %199 : vector<1x96xf32> to vector<16x96xf32>
    %201 = arith.addf %197, %200 : vector<16x96xf32>
    %202 = vector.extract_strided_slice %201 {offsets = [0, 0], sizes = [16, 32], strides = [1, 1]} : vector<16x96xf32> to vector<16x32xf32>
    %203 = vector.shape_cast %202 : vector<16x32xf32> to vector<2x8x4x8xf32>
    %204 = tpu.transpose %203, [0, 2, 1, 3] : vector<2x8x4x8xf32> -> vector<2x4x8x8xf32>
    %205 = vector.shape_cast %204 : vector<2x4x8x8xf32> to vector<8x8x8xf32>
    %206 = vector.extract_strided_slice %201 {offsets = [0, 32], sizes = [16, 32], strides = [1, 1]} : vector<16x96xf32> to vector<16x32xf32>
    %207 = vector.shape_cast %206 : vector<16x32xf32> to vector<2x8x4x8xf32>
    %208 = tpu.transpose %207, [0, 2, 1, 3] : vector<2x8x4x8xf32> -> vector<2x4x8x8xf32>
    %209 = vector.shape_cast %208 : vector<2x4x8x8xf32> to vector<8x8x8xf32>
    %210 = vector.extract_strided_slice %201 {offsets = [0, 64], sizes = [16, 32], strides = [1, 1]} : vector<16x96xf32> to vector<16x32xf32>
    %211 = vector.shape_cast %210 : vector<16x32xf32> to vector<2x8x4x8xf32>
    %212 = tpu.transpose %211, [0, 2, 1, 3] : vector<2x8x4x8xf32> -> vector<2x4x8x8xf32>
    %213 = vector.shape_cast %212 : vector<2x4x8x8xf32> to vector<8x8x8xf32>
    %214 = arith.truncf %205 : vector<8x8x8xf32> to vector<8x8x8xbf16>
    %215 = arith.truncf %209 : vector<8x8x8xf32> to vector<8x8x8xbf16>
    "tpu.trace_start"() <{level = 10 : i32, message = "nqd,nkd->nqk"}> : () -> ()
    %cst_90 = arith.constant dense<0.000000e+00> : vector<8x8x8xf32>
    %216 = tpu.matmul %214, %215, %cst_90 {dimension_numbers = #tpu.dot_dimension_numbers<[2], [2], [1], [1], [0, 0, 0, 1, 1, 1], [0], [0]>} : vector<8x8x8xbf16>, vector<8x8x8xbf16>, vector<8x8x8xf32> -> vector<8x8x8xf32>
    "tpu.trace_stop"() : () -> ()
    %217 = vector.broadcast %5 : vector<1x1x8xf32> to vector<8x8x8xf32>
    %218 = arith.addf %216, %217 : vector<8x8x8xf32>
    %cst_91 = arith.constant dense<0xFF800000> : vector<8x8xf32>
    %219 = vector.multi_reduction <maximumf>, %218, %cst_91 [2] : vector<8x8x8xf32> to vector<8x8xf32>
    %220 = vector.shape_cast %219 : vector<8x8xf32> to vector<8x8x1xf32>
    %221 = vector.broadcast %220 : vector<8x8x1xf32> to vector<8x8x8xf32>
    %222 = arith.subf %218, %221 : vector<8x8x8xf32>
    %223 = math.exp %222 : vector<8x8x8xf32>
    %cst_92 = arith.constant dense<0.000000e+00> : vector<8x8xf32>
    %224 = vector.multi_reduction <add>, %223, %cst_92 [2] : vector<8x8x8xf32> to vector<8x8xf32>
    %225 = vector.shape_cast %224 : vector<8x8xf32> to vector<8x8x1xf32>
    %226 = tpu.reciprocal %225 {approx = true} : vector<8x8x1xf32> -> vector<8x8x1xf32>
    %227 = vector.broadcast %226 : vector<8x8x1xf32> to vector<8x8x8xf32>
    %228 = arith.mulf %223, %227 : vector<8x8x8xf32>
    %229 = arith.truncf %228 : vector<8x8x8xf32> to vector<8x8x8xbf16>
    %230 = arith.truncf %213 : vector<8x8x8xf32> to vector<8x8x8xbf16>
    "tpu.trace_start"() <{level = 10 : i32, message = "nqk,nkd->nqd"}> : () -> ()
    %cst_93 = arith.constant dense<0.000000e+00> : vector<8x8x8xf32>
    %231 = tpu.matmul %229, %230, %cst_93 {dimension_numbers = #tpu.dot_dimension_numbers<[2], [1], [1], [2], [0, 0, 0, 1, 1, 2], [0], [0]>} : vector<8x8x8xbf16>, vector<8x8x8xbf16>, vector<8x8x8xf32> -> vector<8x8x8xf32>
    "tpu.trace_stop"() : () -> ()
    %232 = vector.shape_cast %231 : vector<8x8x8xf32> to vector<2x4x8x8xf32>
    %233 = tpu.transpose %232, [0, 2, 1, 3] : vector<2x4x8x8xf32> -> vector<2x8x4x8xf32>
    %234 = vector.shape_cast %233 : vector<2x8x4x8xf32> to vector<16x32xf32>
    %235 = arith.truncf %234 : vector<16x32xf32> to vector<16x32xbf16>
    %c1_94 = arith.constant 1 : index
    %c0_95 = arith.constant 0 : index
    %c0_96 = arith.constant 0 : index
    %236 = vector.load %arg10[%c1_94, %c0_95, %c0_96] : memref<2x32x32xbf16, #tpu.memory_space<vmem>>, vector<1x32x32xbf16>
    %237 = vector.shape_cast %236 : vector<1x32x32xbf16> to vector<32x32xbf16>
    %cst_97 = arith.constant dense<0.000000e+00> : vector<16x32xf32>
    %238 = tpu.matmul %235, %237, %cst_97 {dimension_numbers = #tpu.dot_dimension_numbers<[1], [0], [0], [1], [0, 0, 1, 1], [], []>} : vector<16x32xbf16>, vector<32x32xbf16>, vector<16x32xf32> -> vector<16x32xf32>
    %c1_98 = arith.constant 1 : index
    %c0_99 = arith.constant 0 : index
    %c0_100 = arith.constant 0 : index
    %239 = vector.load %arg11[%c1_98, %c0_99, %c0_100] : memref<2x1x32xf32, #tpu.memory_space<vmem>>, vector<1x1x32xf32>
    %240 = vector.shape_cast %239 : vector<1x1x32xf32> to vector<1x32xf32>
    %241 = vector.broadcast %240 : vector<1x32xf32> to vector<16x32xf32>
    %242 = arith.addf %238, %241 : vector<16x32xf32>
    %243 = arith.addf %167, %242 : vector<16x32xf32>
    %c1_101 = arith.constant 1 : index
    %c0_102 = arith.constant 0 : index
    %c0_103 = arith.constant 0 : index
    %244 = vector.load %arg12[%c1_101, %c0_102, %c0_103] : memref<2x1x32xf32, #tpu.memory_space<vmem>>, vector<1x1x32xf32>
    %245 = vector.shape_cast %244 : vector<1x1x32xf32> to vector<1x32xf32>
    %c1_104 = arith.constant 1 : index
    %c0_105 = arith.constant 0 : index
    %c0_106 = arith.constant 0 : index
    %246 = vector.load %arg13[%c1_104, %c0_105, %c0_106] : memref<2x1x32xf32, #tpu.memory_space<vmem>>, vector<1x1x32xf32>
    %247 = vector.shape_cast %246 : vector<1x1x32xf32> to vector<1x32xf32>
    %cst_107 = arith.constant dense<0.000000e+00> : vector<16xf32>
    %248 = vector.multi_reduction <add>, %243, %cst_107 [1] : vector<16x32xf32> to vector<16xf32>
    %249 = vector.shape_cast %248 : vector<16xf32> to vector<16x1xf32>
    %cst_108 = arith.constant 3.200000e+01 : f32
    %250 = vector.broadcast %cst_108 : f32 to vector<16x1xf32>
    %251 = arith.divf %249, %250 : vector<16x1xf32>
    %252 = arith.mulf %243, %243 : vector<16x32xf32>
    %cst_109 = arith.constant dense<0.000000e+00> : vector<16xf32>
    %253 = vector.multi_reduction <add>, %252, %cst_109 [1] : vector<16x32xf32> to vector<16xf32>
    %254 = vector.shape_cast %253 : vector<16xf32> to vector<16x1xf32>
    %cst_110 = arith.constant 3.200000e+01 : f32
    %255 = vector.broadcast %cst_110 : f32 to vector<16x1xf32>
    %256 = arith.divf %254, %255 : vector<16x1xf32>
    %257 = arith.mulf %251, %251 : vector<16x1xf32>
    %258 = arith.subf %256, %257 : vector<16x1xf32>
    %259 = vector.broadcast %251 : vector<16x1xf32> to vector<16x32xf32>
    %260 = arith.subf %243, %259 : vector<16x32xf32>
    %cst_111 = arith.constant 9.99999974E-6 : f32
    %261 = vector.broadcast %cst_111 : f32 to vector<16x1xf32>
    %262 = arith.addf %258, %261 : vector<16x1xf32>
    %263 = math.rsqrt %262 : vector<16x1xf32>
    %264 = vector.broadcast %263 : vector<16x1xf32> to vector<16x32xf32>
    %265 = arith.mulf %260, %264 : vector<16x32xf32>
    %266 = vector.broadcast %245 : vector<1x32xf32> to vector<16x32xf32>
    %267 = arith.mulf %265, %266 : vector<16x32xf32>
    %268 = vector.broadcast %247 : vector<1x32xf32> to vector<16x32xf32>
    %269 = arith.addf %267, %268 : vector<16x32xf32>
    %270 = arith.truncf %269 : vector<16x32xf32> to vector<16x32xbf16>
    %c1_112 = arith.constant 1 : index
    %c0_113 = arith.constant 0 : index
    %c0_114 = arith.constant 0 : index
    %271 = vector.load %arg14[%c1_112, %c0_113, %c0_114] : memref<2x32x128xbf16, #tpu.memory_space<vmem>>, vector<1x32x128xbf16>
    %272 = vector.shape_cast %271 : vector<1x32x128xbf16> to vector<32x128xbf16>
    %cst_115 = arith.constant dense<0.000000e+00> : vector<16x128xf32>
    %273 = tpu.matmul %270, %272, %cst_115 {dimension_numbers = #tpu.dot_dimension_numbers<[1], [0], [0], [1], [0, 0, 1, 1], [], []>} : vector<16x32xbf16>, vector<32x128xbf16>, vector<16x128xf32> -> vector<16x128xf32>
    %c1_116 = arith.constant 1 : index
    %c0_117 = arith.constant 0 : index
    %c0_118 = arith.constant 0 : index
    %274 = vector.load %arg15[%c1_116, %c0_117, %c0_118] : memref<2x1x128xf32, #tpu.memory_space<vmem>>, vector<1x1x128xf32>
    %275 = vector.shape_cast %274 : vector<1x1x128xf32> to vector<1x128xf32>
    %276 = vector.broadcast %275 : vector<1x128xf32> to vector<16x128xf32>
    %277 = arith.addf %273, %276 : vector<16x128xf32>
    %cst_119 = arith.constant 1.702000e+00 : f32
    %278 = vector.broadcast %cst_119 : f32 to vector<16x128xf32>
    %279 = arith.mulf %278, %277 : vector<16x128xf32>
    %280 = arith.negf %279 : vector<16x128xf32>
    %281 = math.exp %280 : vector<16x128xf32>
    %cst_120 = arith.constant 1.000000e+00 : f32
    %282 = vector.broadcast %cst_120 : f32 to vector<16x128xf32>
    %283 = arith.addf %282, %281 : vector<16x128xf32>
    %284 = arith.divf %282, %283 : vector<16x128xf32>
    %285 = arith.mulf %277, %284 : vector<16x128xf32>
    %286 = arith.truncf %285 : vector<16x128xf32> to vector<16x128xbf16>
    %c1_121 = arith.constant 1 : index
    %c0_122 = arith.constant 0 : index
    %c0_123 = arith.constant 0 : index
    %287 = vector.load %arg16[%c1_121, %c0_122, %c0_123] : memref<2x128x32xbf16, #tpu.memory_space<vmem>>, vector<1x128x32xbf16>
    %288 = vector.shape_cast %287 : vector<1x128x32xbf16> to vector<128x32xbf16>
    %cst_124 = arith.constant dense<0.000000e+00> : vector<16x32xf32>
    %289 = tpu.matmul %286, %288, %cst_124 {dimension_numbers = #tpu.dot_dimension_numbers<[1], [0], [0], [1], [0, 0, 1, 1], [], []>} : vector<16x128xbf16>, vector<128x32xbf16>, vector<16x32xf32> -> vector<16x32xf32>
    %290 = arith.addf %243, %289 : vector<16x32xf32>
    %c1_125 = arith.constant 1 : index
    %c0_126 = arith.constant 0 : index
    %c0_127 = arith.constant 0 : index
    %291 = vector.load %arg17[%c1_125, %c0_126, %c0_127] : memref<2x1x32xf32, #tpu.memory_space<vmem>>, vector<1x1x32xf32>
    %292 = vector.shape_cast %291 : vector<1x1x32xf32> to vector<1x32xf32>
    %293 = vector.broadcast %292 : vector<1x32xf32> to vector<16x32xf32>
    %294 = arith.addf %290, %293 : vector<16x32xf32>
    %295 = vector.shape_cast %294 : vector<16x32xf32> to vector<2x8x32xf32>
    %296 = vector.extract_strided_slice %295 {offsets = [0, 0, 0], sizes = [2, 1, 32], strides = [1, 1, 1]} : vector<2x8x32xf32> to vector<2x1x32xf32>
    %297 = vector.shape_cast %296 : vector<2x1x32xf32> to vector<2x32xf32>
    %c0_128 = arith.constant 0 : index
    %c0_129 = arith.constant 0 : index
    %298 = vector.load %arg18[%c0_128, %c0_129] : memref<1x32xf32, #tpu.memory_space<vmem>>, vector<1x32xf32>
    %c0_130 = arith.constant 0 : index
    %c0_131 = arith.constant 0 : index
    %299 = vector.load %arg19[%c0_130, %c0_131] : memref<1x32xf32, #tpu.memory_space<vmem>>, vector<1x32xf32>
    %cst_132 = arith.constant dense<0.000000e+00> : vector<2xf32>
    %300 = vector.multi_reduction <add>, %297, %cst_132 [1] : vector<2x32xf32> to vector<2xf32>
    %301 = vector.shape_cast %300 : vector<2xf32> to vector<2x1xf32>
    %cst_133 = arith.constant 3.200000e+01 : f32
    %302 = vector.broadcast %cst_133 : f32 to vector<2x1xf32>
    %303 = arith.divf %301, %302 : vector<2x1xf32>
    %304 = arith.mulf %297, %297 : vector<2x32xf32>
    %cst_134 = arith.constant dense<0.000000e+00> : vector<2xf32>
    %305 = vector.multi_reduction <add>, %304, %cst_134 [1] : vector<2x32xf32> to vector<2xf32>
    %306 = vector.shape_cast %305 : vector<2xf32> to vector<2x1xf32>
    %cst_135 = arith.constant 3.200000e+01 : f32
    %307 = vector.broadcast %cst_135 : f32 to vector<2x1xf32>
    %308 = arith.divf %306, %307 : vector<2x1xf32>
    %309 = arith.mulf %303, %303 : vector<2x1xf32>
    %310 = arith.subf %308, %309 : vector<2x1xf32>
    %311 = vector.broadcast %303 : vector<2x1xf32> to vector<2x32xf32>
    %312 = arith.subf %297, %311 : vector<2x32xf32>
    %cst_136 = arith.constant 9.99999974E-6 : f32
    %313 = vector.broadcast %cst_136 : f32 to vector<2x1xf32>
    %314 = arith.addf %310, %313 : vector<2x1xf32>
    %315 = math.rsqrt %314 : vector<2x1xf32>
    %316 = vector.broadcast %315 : vector<2x1xf32> to vector<2x32xf32>
    %317 = arith.mulf %312, %316 : vector<2x32xf32>
    %318 = vector.broadcast %298 : vector<1x32xf32> to vector<2x32xf32>
    %319 = arith.mulf %317, %318 : vector<2x32xf32>
    %320 = vector.broadcast %299 : vector<1x32xf32> to vector<2x32xf32>
    %321 = arith.addf %319, %320 : vector<2x32xf32>
    %322 = arith.truncf %321 : vector<2x32xf32> to vector<2x32xbf16>
    %c0_137 = arith.constant 0 : index
    %c0_138 = arith.constant 0 : index
    %323 = vector.load %arg20[%c0_137, %c0_138] : memref<32x16xbf16, #tpu.memory_space<vmem>>, vector<32x16xbf16>
    %cst_139 = arith.constant dense<0.000000e+00> : vector<2x16xf32>
    %324 = tpu.matmul %322, %323, %cst_139 {dimension_numbers = #tpu.dot_dimension_numbers<[1], [0], [0], [1], [0, 0, 1, 1], [], []>} : vector<2x32xbf16>, vector<32x16xbf16>, vector<2x16xf32> -> vector<2x16xf32>
    %c0_140 = arith.constant 0 : index
    %c0_141 = arith.constant 0 : index
    %325 = vector.load %arg21[%c0_140, %c0_141] : memref<2x16xf32, #tpu.memory_space<vmem>>, vector<2x16xf32>
    tpu.vector_store %arg21[%c0_140, %c0_141], %324 {strides = array<i32>} : memref<2x16xf32, #tpu.memory_space<vmem>>, vector<2x16xf32>,
    return
  }
  func.func @transform_0(%arg0: i32) -> (i32, i32, i32) {
    %c0_i32 = arith.constant 0 : i32
    %c0_i32_0 = arith.constant 0 : i32
    %c0_i32_1 = arith.constant 0 : i32
    return %arg0, %c0_i32, %c0_i32_0 : i32, i32, i32
  }
  func.func @transform_1(%arg0: i32) -> (i32, i32) {
    %c0_i32 = arith.constant 0 : i32
    %c0_i32_0 = arith.constant 0 : i32
    %c0_i32_1 = arith.constant 0 : i32
    return %c0_i32, %c0_i32_0 : i32, i32
  }
  func.func @transform_2(%arg0: i32) -> (i32, i32) {
    %c0_i32 = arith.constant 0 : i32
    %c0_i32_0 = arith.constant 0 : i32
    %c0_i32_1 = arith.constant 0 : i32
    return %c0_i32, %c0_i32_0 : i32, i32
  }
  func.func @transform_3(%arg0: i32) -> (i32, i32) {
    %c0_i32 = arith.constant 0 : i32
    %c0_i32_0 = arith.constant 0 : i32
    %c0_i32_1 = arith.constant 0 : i32
    return %c0_i32, %c0_i32_0 : i32, i32
  }
  func.func @transform_4(%arg0: i32) -> (i32, i32) {
    %c0_i32 = arith.constant 0 : i32
    %c0_i32_0 = arith.constant 0 : i32
    %c0_i32_1 = arith.constant 0 : i32
    return %c0_i32, %c0_i32_0 : i32, i32
  }
  func.func @transform_5(%arg0: i32) -> (i32, i32, i32) {
    %c0_i32 = arith.constant 0 : i32
    %c0_i32_0 = arith.constant 0 : i32
    %c0_i32_1 = arith.constant 0 : i32
    %c0_i32_2 = arith.constant 0 : i32
    return %c0_i32, %c0_i32_0, %c0_i32_1 : i32, i32, i32
  }
  func.func @transform_6(%arg0: i32) -> (i32, i32, i32) {
    %c0_i32 = arith.constant 0 : i32
    %c0_i32_0 = arith.constant 0 : i32
    %c0_i32_1 = arith.constant 0 : i32
    %c0_i32_2 = arith.constant 0 : i32
    return %c0_i32, %c0_i32_0, %c0_i32_1 : i32, i32, i32
  }
  func.func @transform_7(%arg0: i32) -> (i32, i32, i32) {
    %c0_i32 = arith.constant 0 : i32
    %c0_i32_0 = arith.constant 0 : i32
    %c0_i32_1 = arith.constant 0 : i32
    %c0_i32_2 = arith.constant 0 : i32
    return %c0_i32, %c0_i32_0, %c0_i32_1 : i32, i32, i32
  }
  func.func @transform_8(%arg0: i32) -> (i32, i32, i32) {
    %c0_i32 = arith.constant 0 : i32
    %c0_i32_0 = arith.constant 0 : i32
    %c0_i32_1 = arith.constant 0 : i32
    %c0_i32_2 = arith.constant 0 : i32
    return %c0_i32, %c0_i32_0, %c0_i32_1 : i32, i32, i32
  }
  func.func @transform_9(%arg0: i32) -> (i32, i32, i32) {
    %c0_i32 = arith.constant 0 : i32
    %c0_i32_0 = arith.constant 0 : i32
    %c0_i32_1 = arith.constant 0 : i32
    %c0_i32_2 = arith.constant 0 : i32
    return %c0_i32, %c0_i32_0, %c0_i32_1 : i32, i32, i32
  }
  func.func @transform_10(%arg0: i32) -> (i32, i32, i32) {
    %c0_i32 = arith.constant 0 : i32
    %c0_i32_0 = arith.constant 0 : i32
    %c0_i32_1 = arith.constant 0 : i32
    %c0_i32_2 = arith.constant 0 : i32
    return %c0_i32, %c0_i32_0, %c0_i32_1 : i32, i32, i32
  }
  func.func @transform_11(%arg0: i32) -> (i32, i32, i32) {
    %c0_i32 = arith.constant 0 : i32
    %c0_i32_0 = arith.constant 0 : i32
    %c0_i32_1 = arith.constant 0 : i32
    %c0_i32_2 = arith.constant 0 : i32
    return %c0_i32, %c0_i32_0, %c0_i32_1 : i32, i32, i32
  }
  func.func @transform_12(%arg0: i32) -> (i32, i32, i32) {
    %c0_i32 = arith.constant 0 : i32
    %c0_i32_0 = arith.constant 0 : i32
    %c0_i32_1 = arith.constant 0 : i32
    %c0_i32_2 = arith.constant 0 : i32
    return %c0_i32, %c0_i32_0, %c0_i32_1 : i32, i32, i32
  }
  func.func @transform_13(%arg0: i32) -> (i32, i32, i32) {
    %c0_i32 = arith.constant 0 : i32
    %c0_i32_0 = arith.constant 0 : i32
    %c0_i32_1 = arith.constant 0 : i32
    %c0_i32_2 = arith.constant 0 : i32
    return %c0_i32, %c0_i32_0, %c0_i32_1 : i32, i32, i32
  }
  func.func @transform_14(%arg0: i32) -> (i32, i32, i32) {
    %c0_i32 = arith.constant 0 : i32
    %c0_i32_0 = arith.constant 0 : i32
    %c0_i32_1 = arith.constant 0 : i32
    %c0_i32_2 = arith.constant 0 : i32
    return %c0_i32, %c0_i32_0, %c0_i32_1 : i32, i32, i32
  }
  func.func @transform_15(%arg0: i32) -> (i32, i32, i32) {
    %c0_i32 = arith.constant 0 : i32
    %c0_i32_0 = arith.constant 0 : i32
    %c0_i32_1 = arith.constant 0 : i32
    %c0_i32_2 = arith.constant 0 : i32
    return %c0_i32, %c0_i32_0, %c0_i32_1 : i32, i32, i32
  }
  func.func @transform_16(%arg0: i32) -> (i32, i32, i32) {
    %c0_i32 = arith.constant 0 : i32
    %c0_i32_0 = arith.constant 0 : i32
    %c0_i32_1 = arith.constant 0 : i32
    %c0_i32_2 = arith.constant 0 : i32
    return %c0_i32, %c0_i32_0, %c0_i32_1 : i32, i32, i32
  }
  func.func @transform_17(%arg0: i32) -> (i32, i32) {
    %c0_i32 = arith.constant 0 : i32
    %c0_i32_0 = arith.constant 0 : i32
    %c0_i32_1 = arith.constant 0 : i32
    return %c0_i32, %c0_i32_0 : i32, i32
  }
  func.func @transform_18(%arg0: i32) -> (i32, i32) {
    %c0_i32 = arith.constant 0 : i32
    %c0_i32_0 = arith.constant 0 : i32
    %c0_i32_1 = arith.constant 0 : i32
    return %c0_i32, %c0_i32_0 : i32, i32
  }
  func.func @transform_19(%arg0: i32) -> (i32, i32) {
    %c0_i32 = arith.constant 0 : i32
    %c0_i32_0 = arith.constant 0 : i32
    %c0_i32_1 = arith.constant 0 : i32
    return %c0_i32, %c0_i32_0 : i32, i32
  }
  func.func @transform_20(%arg0: i32) -> (i32, i32) {
    %c0_i32 = arith.constant 0 : i32
    %c0_i32_0 = arith.constant 0 : i32
    return %arg0, %c0_i32 : i32, i32
  }
}

</mosaic_0001>

<bundles_post_ra>
// kernel: tpu_custom_call.1
= control target key start
LH: loop header
LB: loop body
LE: loop exit
PB: predicated region body
PF: predicated region fallthrough
CT: control target
= control target key end

     0   :  { %s7466_s0 = inlined_call_operand.vmem [shape: f32[2,8,192], index: 0, kind: input, shape index: {}]   ;;  %s7467_s1 = inlined_call_operand.vmem [shape: bf16[192,32], index: 1, kind: input, shape index: {}]   ;;  %s7468_s2 = inlined_call_operand.vmem [shape: f32[8,32], index: 2, kind: input, shape index: {}]   ;;  %s7469_s3 = inlined_call_operand.vmem [shape: f32[1,32], index: 3, kind: input, shape index: {}]   ;;  %s7470_s4 = inlined_call_operand.vmem [shape: f32[1,32], index: 4, kind: input, shape index: {}]   ;;  %s7471_s5 = inlined_call_operand.vmem [shape: f32[2,1,32], index: 5, kind: input, shape index: {}]   ;;  %s7472_s6 = inlined_call_operand.vmem [shape: f32[2,1,32], index: 6, kind: input, shape index: {}]   ;;  %s7473_s7 = inlined_call_operand.vmem [shape: bf16[2,32,96], index: 7, kind: input, shape index: {}]   ;;  %s7474_s8 = inlined_call_operand.vmem [shape: f32[2,1,96], index: 8, kind: input, shape index: {}]   ;;  %s7475_s9 = inlined_call_operand.vmem [shape: bf16[2,32,32], index: 9, kind: input, shape index: {}]   ;;  %s7476_s10 = inlined_call_operand.vmem [shape: f32[2,1,32], index: 10, kind: input, shape index: {}]   ;;  %s7477_s11 = inlined_call_operand.vmem [shape: f32[2,1,32], index: 11, kind: input, shape index: {}]   ;;  %s7478_s12 = inlined_call_operand.vmem [shape: f32[2,1,32], index: 12, kind: input, shape index: {}]   ;;  %s7479_s13 = inlined_call_operand.vmem [shape: bf16[2,32,128], index: 13, kind: input, shape index: {}]   ;;  %s7480_s14 = inlined_call_operand.vmem [shape: f32[2,1,128], index: 14, kind: input, shape index: {}]   ;;  %s7481_s15 = inlined_call_operand.vmem [shape: bf16[2,128,32], index: 15, kind: input, shape index: {}]   ;;  %s7482_s16 = inlined_call_operand.vmem [shape: f32[2,1,32], index: 16, kind: input, shape index: {}]   ;;  %s7483_s17 = inlined_call_operand.vmem [shape: f32[1,32], index: 17, kind: input, shape index: {}]   ;;  %s7484_s18 = inlined_call_operand.vmem [shape: f32[1,32], index: 18, kind: input, shape index: {}]   ;;  %s7485_s19 = inlined_call_operand.vmem [shape: bf16[32,16], index: 19, kind: input, shape index: {}]   ;;  %s7486_s20 = inlined_call_operand.hbm [shape: f32[2,16], index: 20, kind: output, shape index: {}]  }
   0x1   :  { %7489 = sst [smem:[#allocation5_spill]] %s7466_s0 }
   0x2   :  { %7490 = sst [smem:[#allocation6_spill]] %s7467_s1 }
   0x3   :  { %7491 = sst [smem:[#allocation7_spill]] %s7468_s2 }
   0x4   :  { %7492 = sst [smem:[#allocation8_spill]] %s7469_s3 }
   0x5   :  { %7493 = sst [smem:[#allocation9_spill]] %s7470_s4 }
   0x6   :  { %s7494_s23 = sld [smem:[#allocation6_spill]]  ;;  %v6157_v1 = vmov 0   ;;  %vm173_vm0 = vcmask 523264  }
   0x7   :  { %177 = vmatprep.subr.bf16.mxu0 %v6157_v1  ;;  %s7495_s29 = sld [smem:[#allocation5_spill]] }
   0xc   :  { %v5991_v0 = vld [vmem:[%s7494_s23 + $0x38] sm:$0xff]   ;;  %v5992_v2 = vld [vmem:[%s7494_s23 + $0x30] sm:$0xff]   ;;  %v5993_v3 = vld [vmem:[%s7494_s23 + $0x28] sm:$0xff]  }
   0xd   :  { %178 = vmatpush1.bf16.msra.mxu0 %v5991_v0  ;;  %v5994_v4 = vld [vmem:[%s7494_s23 + $0x20] sm:$0xff]   ;;  %v72_v5 = vld [vmem:[%s7495_s29 + $0x8] sm:$0xff]  ;;  %v74_v6 = vld [vmem:[%s7495_s29 + $0x18] sm:$0xff] }
   0xe   :  { %179 = vmatprep.subr.bf16.mxu0 %v6157_v1  ;;  %v5995_v7 = vld [vmem:[%s7494_s23 + $0x18] sm:$0xff]   ;;  %v76_v8 = vpack.c.bf16 %v74_v6, %v72_v5  ;;  %v5996_v9 = vld [vmem:[%s7494_s23 + $0x10] sm:$0xff]   ;;  %v5997_v10 = vld [vmem:[%s7494_s23 + $0x8] sm:$0xff]  }
   0xf   :  { %v5998_v11 = vld [vmem:[%s7494_s23] sm:$0xff]   ;;  %v5999_v12 = vld [vmem:[%s7494_s23 + $0x58] sm:$0xff]  }
  0x10   :  { %5393 = vmatprep.mubr.msk.bf16.mxu0 %vm173_vm0, %v76_v8 }
  0x11   :  { %180 = vmatpush1.bf16.msra.mxu0 %v5992_v2 }
  0x12   :  { %181 = vmatprep.subr.bf16.mxu0 %v6157_v1 }
  0x15   :  { %182 = vmatpush1.bf16.msra.mxu0 %v5993_v3 }
  0x16   :  { %183 = vmatprep.subr.bf16.mxu0 %v6157_v1 }
  0x19   :  { %184 = vmatpush1.bf16.msra.mxu0 %v5994_v4 }
  0x1a   :  { %185 = vmatprep.subr.bf16.mxu0 %v6157_v1 }
  0x1d   :  { %186 = vmatpush1.bf16.msra.mxu0 %v5995_v7 }
  0x1e   :  { %187 = vmatprep.subr.bf16.mxu0 %v6157_v1 }
  0x21   :  { %188 = vmatpush1.bf16.msra.mxu0 %v5996_v9 }
  0x22   :  { %189 = vmatprep.subr.bf16.mxu0 %v6157_v1 }
  0x25   :  { %190 = vmatpush1.bf16.msra.mxu0 %v5997_v10 }
  0x26   :  { %191 = vmatprep.subr.bf16.mxu0 %v6157_v1 }
  0x29   :  { %192 = vmatpush1.bf16.msra.mxu0 %v5998_v11 }
  0x2a   :  { %201 = vmatprep.subr.bf16.mxu0 %v6157_v1 }
  0x2b   :  { %25 = vsyncpa [#allocation3], 0  ;;  %v6000_v13 = vld [vmem:[%s7494_s23 + $0x50] sm:$0xff]   ;;  %v6001_v14 = vld [vmem:[%s7494_s23 + $0x48] sm:$0xff]   ;;  %s7496_s28 = sld [smem:[#allocation7_spill]]  ;;  %vm223_vm1 = vcmask 261120  }
  0x2c   :  { %v6002_v15 = vld [vmem:[%s7494_s23 + $0x40] sm:$0xff]   ;;  %v73_v17 = vld [vmem:[%s7495_s29 + $0x10] sm:$0xff]  ;;  %s7497_s4 = sld [smem:[#allocation8_spill]]  ;;  %v6003_v0 = vld [vmem:[%s7473_s7 + $0x8] sm:$0xff]   ;;  %vm6159_vm2 = vmmov 0   ;;  %s6162_s30 = smov 104  }
  0x2d   :  { %202 = vmatpush2.bf16.msra.mxu0 %v5999_v12  ;;  %v71_v16 = vld [vmem:[%s7495_s29] sm:$0xff]  ;;  %s7498_s21 = sld [smem:[#allocation9_spill]]  ;;  %s6160_s29 = smov 112   ;;  %vm1287_vm3 = vcmask 64512   ;;  %vm1763_vm5 = vcmask 1043456   ;;  %vm2427_vm6 = vcmask 130048  }
  0x2e   :  { %203 = vmatprep.subr.bf16.mxu0 %v6157_v1  ;;  %v75_v18 = vpack.c.bf16 %v73_v17, %v71_v16  ;;  %v6004_v2 = vld [vmem:[%s7473_s7] sm:$0xff]   ;;  %s6163_s0 = smov 96   ;;  %s6168_s25 = smov 16   ;;  %vm2430_vm7 = vcmask 195584   ;;  %vm5246_vm8 = vcmask 1041409   ;;  %vm5249_vm9 = vcmask 254976  }
  0x2f   :  { %s6169_s3 = smov 8   ;;  %s6170_s26 = smov 24   ;;  %vm5365_vm10 = vcmask 123904  }
  0x31   :  { %204 = vmatpush2.bf16.msra.mxu0 %v6000_v13  ;;  %v218_v19 = vld [vmem:[%s7496_s28] sm:$0xff] }
  0x32   :  { %205 = vmatprep.subr.bf16.mxu0 %v6157_v1  ;;  %v5394_v48 = vld [vmem:[%s7497_s4] ss:$0 sm:$0xff]  ;;  %s6161_s4 = smov 120  }
  0x33   :  { %v5395_v50 = vld [vmem:[%s7498_s21] ss:$0 sm:$0xff]  ;;  %s6167_s21 = smov 64  }
  0x35   :  { %206 = vmatpush2.bf16.msra.mxu0 %v6001_v14 }
  0x36   :  { %207 = vmatprep.subr.bf16.mxu0 %v6157_v1  ;;  %v6158_v1 = vmov 0.0  }
  0x37   :  { %5658 = vmatprep.subr.bf16.mxu1 %v6158_v1  ;;  %5662 = vmatprep.mubr.msk.bf16.mxu1 %vm6159_vm2, %v6158_v1 }
  0x38   :  { %5659 = vmatpush3.bf16.msra.mxu1 %v6003_v0 }
  0x39   :  { %208 = vmatpush2.bf16.msra.mxu0 %v6002_v15  ;;  %5660 = vmatprep.subr.bf16.mxu1 %v6158_v1 }
  0x3a   :  { %5708 = vmatprep.subr.bf16.mxu0 %v6158_v1 }
  0x3c   :  { %210 = vmatmul.mubr.bf16.vlgmr.msra.gmra.mxu0 %v75_v18  ;;  %5661 = vmatpush3.bf16.msra.mxu1 %v6004_v2 }
  0x3d   :  { %5710 = vmatprep.mubr.msk.bf16.mxu0 %vm6159_vm2, %v6158_v1  ;;  %5666 = vmatprep.subr.bf16.mxu1 %v6158_v1 }
  0xfc   :  { %v211_v20 = vpop.f32.mrf.mxu0 }
  0xfd   :  { %v219_v21 = vadd.f32 %v218_v19, %v211_v20  ;;  %v5396_v20 = vld [vmem:[%s7471_s5] ss:$0 sm:$0xff] }
  0xfe   :  { %v213_v22 = vpop.f32.mrf.mxu0 }
  0xff   :  { %v224_v23 = vsel %vm223_vm1, %v219_v21, 0.0  ;;  %v233_v24 = vmul.f32 %v219_v21, %v219_v21 }
 0x100   :  { %225 = vadd.xlane.f32.xlu0 %v224_v23  ;;  %v214_v25 = vpop.f32.mrf.mxu0 }
 0x101   :  { %v220_v26 = vadd.f32 %v218_v19, %v214_v25  ;;  %v235_v27 = vsel %vm223_vm1, %v233_v24, 0.0  ;;  %v5397_v25 = vld [vmem:[%s7472_s6] ss:$0 sm:$0xff] }
 0x102   :  { %236 = vadd.xlane.f32.xlu1 %v235_v27  ;;  %v216_v28 = vpop.f32.mrf.mxu0 }
 0x103   :  { %v227_v29 = vsel %vm223_vm1, %v220_v26, 0.0  ;;  %v234_v30 = vmul.f32 %v220_v26, %v220_v26 }
 0x104   :  { %228 = vadd.xlane.f32.xlu0 %v227_v29 }
 0x105   :  { %v238_v31 = vsel %vm223_vm1, %v234_v30, 0.0  ;;  %v5398_v30 = vld [vmem:[%s7474_s8] ss:$0 sm:$0xff] }
 0x106   :  { %239 = vadd.xlane.f32.xlu1 %v238_v31 }
 0x189   :  { %v226_v32 = vpop.xlane.xlu0 %225 }
 0x18a   :  { %v231_v33 = vmul.f32 0.03125, %v226_v32 }
 0x18b   :  { %v237_v34 = vpop.xlane.xlu1 %236 }
 0x18c   :  { %v243_v35 = vmul.f32 %v231_v33, %v231_v33  ;;  %v241_v36 = vmul.f32 0.03125, %v237_v34  ;;  %v247_v46 = vsub.f32 %v219_v21, %v231_v33 }
 0x18d   :  { %v229_v37 = vpop.xlane.xlu0 %228 }
 0x18e   :  { %v245_v38 = vsub.f32 %v241_v36, %v243_v35  ;;  %v232_v39 = vmul.f32 0.03125, %v229_v37 }
 0x18f   :  { %v240_v40 = vpop.xlane.xlu1 %239 }
 0x190   :  { %v249_v41 = vadd.f32 1e-05, %v245_v38  ;;  %v244_v42 = vmul.f32 %v232_v39, %v232_v39  ;;  %v242_v43 = vmul.f32 0.03125, %v240_v40  ;;  %v248_v51 = vsub.f32 %v220_v26, %v232_v39 }
 0x192   :  { %6033 = vrsqrt.f32 %v249_v41  ;;  %v246_v44 = vsub.f32 %v242_v43, %v244_v42  ;;  %v6164_v43 = vmov 1983009808  }
 0x194   :  { %v250_v45 = vadd.f32 1e-05, %v246_v44  ;;  %v410_v44 = vunpack.c.l.s4 %v6164_v43 }
 0x196   :  { %6035 = vrsqrt.f32 %v250_v45  ;;  %v67_v45 = vlaneseq }
 0x19f   :  { %v6034_v47 = vpop.eup %6033 }
 0x1a0   :  { %v253_v49 = vmul.f32 %v6034_v47, %v247_v46  ;;  %v411_v46 = vunpack.c.0.s8 %v410_v44  ;;  %v413_v47 = vshrl.u32 %v67_v45, 7 }
 0x1a2   :  { %v261_v52 = vmul.f32 %v5394_v48, %v253_v49 }
 0x1a3   :  { %v6036_v53 = vpop.eup %6035 }
 0x1a4   :  { %v6338_v54 = vadd.f32 %v5395_v50, %v261_v52  ;;  %v254_v55 = vmul.f32 %v6036_v53, %v248_v51  ;;  %v6431_v53 = vsub.s32 %v411_v46, %v413_v47 }
 0x1a6   :  { %v273_v56 = vsel %vm223_vm1, %v6338_v54, 0.0  ;;  %v281_v57 = vmul.f32 %v6338_v54, %v6338_v54  ;;  %v262_v58 = vmul.f32 %v5394_v48, %v254_v55  ;;  %v6165_v48 = vmov 1934713408  }
 0x1a7   :  { %274 = vadd.xlane.f32.xlu0 %v273_v56  ;;  %v442_v49 = vunpack.c.l.s4 %v6165_v48 }
 0x1a8   :  { %v6344_v59 = vadd.f32 %v5395_v50, %v262_v58  ;;  %v283_v60 = vsel %vm223_vm1, %v281_v57, 0.0 }
 0x1a9   :  { %v443_v56 = vunpack.c.0.s8 %v442_v49 }
 0x1aa   :  { %v276_v61 = vsel %vm223_vm1, %v6344_v59, 0.0  ;;  %v282_v62 = vmul.f32 %v6344_v59, %v6344_v59 }
 0x1ab   :  { %284 = vadd.xlane.f32.xlu0 %v283_v60  ;;  %277 = vadd.xlane.f32.xlu1 %v276_v61  ;;  %v6439_v0 = vsub.s32 %v443_v56, %v413_v47 }
 0x1ac   :  { %v286_v63 = vsel %vm223_vm1, %v282_v62, 0.0 }
 0x1af   :  { %287 = vadd.xlane.f32.xlu1 %v286_v63 }
 0x230   :  { %v275_v3 = vpop.xlane.xlu0 %274 }
 0x231   :  { %v279_v4 = vmul.f32 0.03125, %v275_v3 }
 0x233   :  { %v291_v7 = vmul.f32 %v279_v4, %v279_v4  ;;  %v295_v17 = vsub.f32 %v6338_v54, %v279_v4 }
 0x234   :  { %v278_v5 = vpop.xlane.xlu1 %277  ;;  %v285_v6 = vpop.xlane.xlu0 %284 }
 0x235   :  { %v280_v8 = vmul.f32 0.03125, %v278_v5  ;;  %v289_v9 = vmul.f32 0.03125, %v285_v6 }
 0x237   :  { %v293_v10 = vsub.f32 %v289_v9, %v291_v7  ;;  %v292_v12 = vmul.f32 %v280_v8, %v280_v8  ;;  %v296_v21 = vsub.f32 %v6344_v59, %v280_v8 }
 0x238   :  { %v288_v11 = vpop.xlane.xlu1 %287 }
 0x239   :  { %v297_v13 = vadd.f32 1e-05, %v293_v10  ;;  %v290_v14 = vmul.f32 0.03125, %v288_v11 }
 0x23b   :  { %6037 = vrsqrt.f32 %v297_v13  ;;  %v294_v15 = vsub.f32 %v290_v14, %v292_v12 }
 0x23d   :  { %v298_v16 = vadd.f32 1e-05, %v294_v15 }
 0x23f   :  { %6039 = vrsqrt.f32 %v298_v16 }
 0x248   :  { %v6038_v18 = vpop.eup %6037 }
 0x249   :  { %v301_v19 = vmul.f32 %v6038_v18, %v295_v17 }
 0x24b   :  { %v309_v24 = vmul.f32 %v5396_v20, %v301_v19 }
 0x24c   :  { %v6040_v22 = vpop.eup %6039 }
 0x24d   :  { %v302_v23 = vmul.f32 %v6040_v22, %v296_v21  ;;  %v317_v27 = vadd.f32 %v5397_v25, %v309_v24 }
 0x24f   :  { %v310_v26 = vmul.f32 %v5396_v20, %v302_v23 }
 0x251   :  { %v318_v28 = vadd.f32 %v5397_v25, %v310_v26 }
 0x253   :  { %v319_v29 = vpack.c.bf16 %v318_v28, %v317_v27 }
 0x255   :  { %5663 = vmatmul.mubr.msk.bf16.vlgmr.msra.gmra.mxu1 %vm223_vm1, %v319_v29 }
 0x256   :  { %5668 = vmatprep.mubr.msk.bf16.mxu1 %vm6159_vm2, %v6158_v1 }
 0x315   :  { %v380_v31 = vpop.f32.mrf.mxu1 }
 0x316   :  { %v6380_v32 = vadd.f32 %v5398_v30, %v380_v31 }
 0x317   :  { %v5664_v33 = vpop.f32.mrf.mxu1 }
 0x318   :  { %395 = vrot.lane.b32.xlu1 %v6380_v32, %s6160_s29  ;;  %389 = vrot.lane.b32.xlu0 %v6380_v32, %s6161_s4 }
 0x319   :  { %v383_v34 = vpop.f32.mrf.mxu1 }
 0x31a   :  { %v6386_v35 = vadd.f32 %v5398_v30, %v383_v34 }
 0x31b   :  { %v5665_v36 = vpop.f32.mrf.mxu1 }
 0x31c   :  { %401 = vrot.lane.b32.xlu1 %v6380_v32, %s6162_s30  ;;  %397 = vrot.lane.b32.xlu0 %v6386_v35, %s6160_s29 }
 0x320   :  { %679 = vrot.lane.b32.xlu0 %v6380_v32, %s6163_s0  ;;  %391 = vrot.lane.b32.xlu1 %v6386_v35, %s6161_s4 }
 0x324   :  { %403 = vrot.lane.b32.xlu1 %v6386_v35, %s6162_s30 }
 0x38a   :  { %v6398_v37 = vpop.permute.xlu1 %395  ;;  %v6400_v38 = vpop.permute.xlu0 %389 }
 0x38b   :  { %687 = vrot.lane.b32.xlu0 %v6398_v37, %s6163_s0  ;;  %683 = vrot.lane.b32.xlu1 %v6400_v38, %s6163_s0  ;;  %v407_v52 = vcombine.low %v6380_v32, %v6398_v37  ;;  %v408_v55 = vcombine.high %v6380_v32, %v6398_v37 }
 0x38d   :  { %v415_v60 = vrot.slane %v407_v52, %v6431_v53  ;;  %v422_v61 = vrot.slane %v408_v55, %v6431_v53 }
 0x38e   :  { %v6406_v39 = vpop.permute.xlu1 %401  ;;  %v6412_v40 = vpop.permute.xlu0 %397 }
 0x38f   :  { %681 = vrot.lane.b32.xlu0 %v6386_v35, %s6163_s0  ;;  %691 = vrot.lane.b32.xlu1 %v6406_v39, %s6163_s0  ;;  %v423_v50 = vcombine.low %v6400_v38, %v6406_v39  ;;  %v424_v51 = vcombine.high %v6400_v38, %v6406_v39  ;;  %v475_v13 = vcombine.low %v6386_v35, %v6412_v40 }
 0x390   :  { %v476_v21 = vcombine.high %v6386_v35, %v6412_v40 }
 0x391   :  { %v431_v57 = vrot.slane %v423_v50, %v6431_v53  ;;  %v438_v58 = vrot.slane %v424_v51, %v6431_v53  ;;  %v483_v25 = vrot.slane %v475_v13, %v6431_v53 }
 0x392   :  { %v6414_v41 = vpop.permute.xlu1 %391  ;;  %v680_v4 = vpop.permute.xlu0 %679  ;;  %v490_v44 = vrot.slane %v476_v21, %v6431_v53 }
 0x393   :  { %689 = vrot.lane.b32.xlu0 %v6412_v40, %s6163_s0  ;;  %685 = vrot.lane.b32.xlu1 %v6414_v41, %s6163_s0  ;;  %v439_v62 = vcombine.low %v415_v60, %v431_v57  ;;  %v440_v63 = vcombine.high %v415_v60, %v431_v57  ;;  %v455_v2 = vcombine.low %v422_v61, %v438_v58 }
 0x394   :  { %v456_v3 = vcombine.high %v422_v61, %v438_v58 }
 0x395   :  { %v447_v5 = vrot.slane %v439_v62, %v6439_v0  ;;  %v454_v6 = vrot.slane %v440_v63, %v6439_v0  ;;  %v463_v7 = vrot.slane %v455_v2, %v6439_v0 }
 0x396   :  { %v6420_v42 = vpop.permute.xlu1 %403  ;;  %v470_v8 = vrot.slane %v456_v3, %v6439_v0 }
 0x397   :  { %693 = vrot.lane.b32.xlu1 %v6420_v42, %s6163_s0  ;;  %v491_v11 = vcombine.low %v6414_v41, %v6420_v42  ;;  %v543_v12 = vcombine.low %v447_v5, %v454_v6  ;;  %v5402_v14 = vcombine.high %v447_v5, %v454_v6  ;;  %v492_v17 = vcombine.high %v6414_v41, %v6420_v42 }
 0x398   :  { %v559_v15 = vcombine.low %v463_v7, %v470_v8  ;;  %v5403_v16 = vcombine.high %v463_v7, %v470_v8 }
 0x399   :  { %v499_v22 = vrot.slane %v491_v11, %v6431_v53  ;;  %v6455_v24 = vrot.slane %v543_v12, %v6431_v53  ;;  %v6459_v28 = vrot.slane %v5402_v14, %v6431_v53  ;;  %v506_v31 = vrot.slane %v492_v17, %v6431_v53 }
 0x39a   :  { %v6462_v29 = vrot.slane %v559_v15, %v6431_v53  ;;  %v6465_v30 = vrot.slane %v5403_v16, %v6431_v53 }
 0x39b   :  { %v507_v46 = vcombine.low %v483_v25, %v499_v22  ;;  %v508_v47 = vcombine.high %v483_v25, %v499_v22  ;;  %v523_v56 = vcombine.low %v490_v44, %v506_v31  ;;  %v524_v57 = vcombine.high %v490_v44, %v506_v31 }
 0x39c   :  { %v575_v58 = vcombine.low %v6455_v24, %v6459_v28  ;;  %v591_v60 = vcombine.low %v6462_v29, %v6465_v30 }
 0x39d   :  { %v515_v3 = vrot.slane %v507_v46, %v6439_v0  ;;  %v531_v12 = vrot.slane %v523_v56, %v6439_v0  ;;  %v538_v13 = vrot.slane %v524_v57, %v6439_v0 }
 0x39e   :  { %v583_v57 = vrot.slane %v575_v58, %v6439_v0 }
 0x39f   :  { %v627_v44 = vcombine.low %v531_v12, %v538_v13  ;;  %v5405_v46 = vcombine.high %v531_v12, %v538_v13 }
 0x3fd   :  { %v688_v9 = vpop.permute.xlu0 %687  ;;  %v684_v10 = vpop.permute.xlu1 %683 }
 0x3fe   :  { %v703_v18 = vcombine.low %v680_v4, %v688_v9  ;;  %v704_v19 = vcombine.high %v680_v4, %v688_v9  ;;  %v522_v4 = vrot.slane %v508_v47, %v6439_v0 }
 0x400   :  { %v711_v33 = vrot.slane %v703_v18, %v6431_v53  ;;  %v718_v34 = vrot.slane %v704_v19, %v6431_v53  ;;  %v611_v25 = vcombine.low %v515_v3, %v522_v4 }
 0x401   :  { %v682_v20 = vpop.permute.xlu0 %681  ;;  %v692_v23 = vpop.permute.xlu1 %691 }
 0x402   :  { %v719_v26 = vcombine.low %v684_v10, %v692_v23  ;;  %v720_v27 = vcombine.high %v684_v10, %v692_v23 }
 0x404   :  { %v727_v36 = vrot.slane %v719_v26, %v6431_v53  ;;  %v734_v43 = vrot.slane %v720_v27, %v6431_v53  ;;  %v5404_v26 = vcombine.high %v515_v3, %v522_v4 }
 0x405   :  { %v686_v48 = vpop.permute.xlu1 %685  ;;  %v690_v55 = vpop.permute.xlu0 %689 }
 0x406   :  { %v735_v49 = vcombine.low %v711_v33, %v727_v36  ;;  %v736_v50 = vcombine.high %v711_v33, %v727_v36  ;;  %v751_v51 = vcombine.low %v718_v34, %v734_v43  ;;  %v752_v52 = vcombine.high %v718_v34, %v734_v43 }
 0x407   :  { %v771_v5 = vcombine.low %v682_v20, %v690_v55  ;;  %v772_v6 = vcombine.high %v682_v20, %v690_v55  ;;  %v6500_v55 = vrot.slane %v611_v25, %v6431_v53  ;;  %v6505_v4 = vrot.slane %v5404_v26, %v6431_v53 }
 0x408   :  { %v743_v61 = vrot.slane %v735_v49, %v6439_v0  ;;  %v750_v62 = vrot.slane %v736_v50, %v6439_v0  ;;  %v759_v63 = vrot.slane %v751_v51, %v6439_v0  ;;  %v766_v2 = vrot.slane %v752_v52, %v6439_v0 }
 0x409   :  { %v694_v7 = vpop.permute.xlu1 %693  ;;  %v779_v20 = vrot.slane %v771_v5, %v6431_v53  ;;  %v786_v21 = vrot.slane %v772_v6, %v6431_v53  ;;  %v6508_v5 = vrot.slane %v627_v44, %v6431_v53  ;;  %v6511_v6 = vrot.slane %v5405_v46, %v6431_v53 }
 0x40a   :  { %v839_v8 = vcombine.low %v743_v61, %v750_v62  ;;  %v5406_v9 = vcombine.high %v743_v61, %v750_v62  ;;  %v855_v10 = vcombine.low %v759_v63, %v766_v2  ;;  %v5407_v11 = vcombine.high %v759_v63, %v766_v2 }
 0x40b   :  { %v787_v14 = vcombine.low %v686_v48, %v694_v7  ;;  %v788_v15 = vcombine.high %v686_v48, %v694_v7  ;;  %v599_v61 = vrot.slane %v591_v60, %v6439_v0  ;;  %v660_v25 = vcombine.high %v6508_v5, %v6511_v6 }
 0x40c   :  { %v846_v16 = vrot.slane %v839_v8, %v6431_v53  ;;  %v854_v17 = vrot.slane %v5406_v9, %v6431_v53  ;;  %v862_v18 = vrot.slane %v855_v10, %v6431_v53  ;;  %v870_v19 = vrot.slane %v5407_v11, %v6431_v53 }
 0x40d   :  { %v795_v22 = vrot.slane %v787_v14, %v6431_v53  ;;  %v802_v23 = vrot.slane %v788_v15, %v6431_v53  ;;  %v608_v44 = vcombine.high %v583_v57, %v599_v61  ;;  %v576_v46 = vcombine.high %v6455_v24, %v6459_v28 }
 0x40e   :  { %v871_v27 = vcombine.low %v846_v16, %v854_v17  ;;  %v887_v31 = vcombine.low %v862_v18, %v870_v19  ;;  %v872_v12 = vcombine.high %v846_v16, %v854_v17  ;;  %v888_v13 = vcombine.high %v862_v18, %v870_v19 }
 0x40f   :  { %v803_v33 = vcombine.low %v779_v20, %v795_v22  ;;  %v804_v34 = vcombine.high %v779_v20, %v795_v22  ;;  %v819_v36 = vcombine.low %v786_v21, %v802_v23  ;;  %v820_v43 = vcombine.high %v786_v21, %v802_v23 }
 0x410   :  { %v879_v47 = vrot.slane %v871_v27, %v6439_v0  ;;  %v895_v48 = vrot.slane %v887_v31, %v6439_v0  ;;  %v607_v20 = vcombine.low %v583_v57, %v599_v61  ;;  %v644_v23 = vcombine.high %v6500_v55, %v6505_v4 }
 0x411   :  { %v811_v49 = vrot.slane %v803_v33, %v6439_v0  ;;  %v818_v50 = vrot.slane %v804_v34, %v6439_v0  ;;  %v827_v51 = vrot.slane %v819_v36, %v6439_v0  ;;  %v834_v52 = vrot.slane %v820_v43, %v6439_v0 }
 0x412   :  { %v903_v56 = vcombine.low %v879_v47, %v895_v48  ;;  %v904_v11 = vcombine.high %v879_v47, %v895_v48  ;;  %v886_v17 = vrot.slane %v872_v12, %v6439_v0  ;;  %v902_v18 = vrot.slane %v888_v13, %v6439_v0 }
 0x413   :  { %v907_v62 = vcombine.low %v811_v49, %v818_v50  ;;  %v5408_v63 = vcombine.high %v811_v49, %v818_v50  ;;  %v923_v2 = vcombine.low %v827_v51, %v834_v52  ;;  %v5409_v3 = vcombine.high %v827_v51, %v834_v52 }
 0x414   :  { %v1279_v7 = vpack.c.bf16 %v903_v56, %v903_v56  ;;  %v1280_v16 = vpack.c.bf16 %v904_v11, %v904_v11  ;;  %v1271_v26 = vpack.c.bf16 %v607_v20, %v607_v20  ;;  %v6534_v31 = vrot.slane %v644_v23, %v6439_v0 }
 0x415   :  { %v914_v8 = vrot.slane %v907_v62, %v6431_v53  ;;  %v922_v58 = vrot.slane %v5408_v63, %v6431_v53  ;;  %v930_v60 = vrot.slane %v923_v2, %v6431_v53  ;;  %v938_v9 = vrot.slane %v5409_v3, %v6431_v53 }
 0x416   :  { %v1292_v10 = vsel %vm1287_vm3, %v1279_v7, 0  ;;  %v6537_v33 = vrot.slane %v660_v25, %v6439_v0  ;;  %v1338_v34 = vsel %vm1287_vm3, %v1280_v16, 0  ;;  %v905_v36 = vcombine.low %v886_v17, %v902_v18 }
 0x417   :  { %5667 = vmatpush3.bf16.xpose.msra.mxu1 %v1292_v10  ;;  %v940_v14 = vcombine.high %v914_v8, %v922_v58  ;;  %v956_v15 = vcombine.high %v930_v60, %v938_v9  ;;  %v592_v47 = vcombine.high %v6462_v29, %v6465_v30  ;;  %v1272_v50 = vpack.c.bf16 %v608_v44, %v608_v44 }
 0x418   :  { %5672 = vmatprep.subr.bf16.mxu1 %v6158_v1  ;;  %v678_v48 = vcombine.high %v6534_v31, %v6537_v33  ;;  %v1281_v49 = vpack.c.bf16 %v905_v36, %v905_v36  ;;  %v590_v51 = vrot.slane %v576_v46, %v6439_v0  ;;  %v906_v24 = vcombine.high %v886_v17, %v902_v18 }
 0x419   :  { %v6520_v21 = vrot.slane %v940_v14, %v6439_v0  ;;  %v6523_v22 = vrot.slane %v956_v15, %v6439_v0  ;;  %v606_v52 = vrot.slane %v592_v47, %v6439_v0  ;;  %v939_v28 = vcombine.low %v914_v8, %v922_v58 }
 0x41a   :  { %v1278_v56 = vpack.c.bf16 %v678_v48, %v678_v48  ;;  %v1384_v57 = vsel %vm1287_vm3, %v1281_v49, 0  ;;  %v955_v61 = vcombine.low %v930_v60, %v938_v9  ;;  %v1282_v30 = vpack.c.bf16 %v906_v24, %v906_v24 }
 0x41b   :  { %v974_v19 = vcombine.high %v6520_v21, %v6523_v22  ;;  %v609_v29 = vcombine.low %v590_v51, %v606_v52  ;;  %v947_v62 = vrot.slane %v939_v28, %v6439_v0  ;;  %v610_v8 = vcombine.high %v590_v51, %v606_v52 }
 0x41c   :  { %v963_v63 = vrot.slane %v955_v61, %v6439_v0  ;;  %v1430_v3 = vsel %vm1287_vm3, %v1282_v30, 0  ;;  %v643_v58 = vcombine.low %v6500_v55, %v6505_v4  ;;  %v659_v60 = vcombine.low %v6508_v5, %v6511_v6 }
 0x41d   :  { %v1286_v27 = vpack.c.bf16 %v974_v19, %v974_v19  ;;  %v1273_v2 = vpack.c.bf16 %v609_v29, %v609_v29  ;;  %v1274_v10 = vpack.c.bf16 %v610_v8, %v610_v8  ;;  %v973_v6 = vcombine.low %v6520_v21, %v6523_v22 }
 0x41e   :  { %5669 = vmatmul.mubr.msk.bf16.vlgmr.msra.gmra.mxu1 %vm1287_vm3, %v1271_v26  ;;  %v971_v7 = vcombine.low %v947_v62, %v963_v63  ;;  %v651_v11 = vrot.slane %v643_v58, %v6439_v0  ;;  %v667_v12 = vrot.slane %v659_v60, %v6439_v0  ;;  %v972_v14 = vcombine.high %v947_v62, %v963_v63 }
 0x41f   :  { %5673 = vmatpush3.bf16.xpose.msra.mxu1 %v1338_v34  ;;  %v1614_v43 = vsel %vm1287_vm3, %v1286_v27, 0  ;;  %5674 = vmatprep.mubr.msk.bf16.mxu1 %vm6159_vm2, %v6158_v1  ;;  %v1285_v23 = vpack.c.bf16 %v973_v6, %v973_v6  ;;  %v677_v21 = vcombine.low %v6534_v31, %v6537_v33  ;;  %v68_v17 = vand.u32 127, %v67_v45 }
 0x420   :  { %5709 = vmatpush3.bf16.xpose.msra.mxu0 %v1614_v43  ;;  %5678 = vmatprep.subr.bf16.mxu1 %v6158_v1  ;;  %v1283_v9 = vpack.c.bf16 %v971_v7, %v971_v7  ;;  %v675_v15 = vcombine.low %v651_v11, %v667_v12  ;;  %v1284_v55 = vpack.c.bf16 %v972_v14, %v972_v14  ;;  %v6166_v18 = vmov -1e+09  }
 0x421   :  { %5720 = vmatprep.subr.bf16.mxu0 %v6158_v1  ;;  %v676_v20 = vcombine.high %v651_v11, %v667_v12  ;;  %v1568_v16 = vsel %vm1287_vm3, %v1285_v23, 0  ;;  %v1277_v22 = vpack.c.bf16 %v677_v21, %v677_v21  ;;  %vm69_vm4 = vcmp.lt.s32.totalorder %v68_v17, 5 }
 0x422   :  { %v1476_v13 = vsel %vm1287_vm3, %v1283_v9, 0  ;;  %v1275_v4 = vpack.c.bf16 %v675_v15, %v675_v15  ;;  %v1522_v5 = vsel %vm1287_vm3, %v1284_v55, 0  ;;  %v6598_v19 = vsel %vm69_vm4, 0.0, %v6166_v18 }
 0x423   :  { %v1276_v25 = vpack.c.bf16 %v676_v20, %v676_v20 }
 0x426   :  { %5675 = vmatmul.mubr.msk.bf16.vlgmr.msra.gmra.mxu1 %vm1287_vm3, %v1272_v50 }
 0x427   :  { %5711 = vmatmul.mubr.msk.bf16.vlgmr.msra.gmra.mxu0 %vm1287_vm3, %v1278_v56  ;;  %5679 = vmatpush3.bf16.xpose.msra.mxu1 %v1384_v57 }
 0x428   :  { %5680 = vmatprep.mubr.msk.bf16.mxu1 %vm6159_vm2, %v6158_v1  ;;  %5684 = vmatprep.subr.bf16.mxu1 %v6158_v1 }
 0x429   :  { %5722 = vmatprep.mubr.msk.bf16.mxu0 %vm6159_vm2, %v6158_v1 }
 0x42e   :  { %5681 = vmatmul.mubr.msk.bf16.vlgmr.msra.gmra.mxu1 %vm1287_vm3, %v1273_v2 }
 0x42f   :  { %5685 = vmatpush3.bf16.xpose.msra.mxu1 %v1430_v3  ;;  %5686 = vmatprep.mubr.msk.bf16.mxu1 %vm6159_vm2, %v6158_v1 }
 0x430   :  { %5690 = vmatprep.subr.bf16.mxu1 %v6158_v1 }
 0x436   :  { %5687 = vmatmul.mubr.msk.bf16.vlgmr.msra.gmra.mxu1 %vm1287_vm3, %v1274_v10 }
 0x437   :  { %5691 = vmatpush3.bf16.xpose.msra.mxu1 %v1476_v13  ;;  %5692 = vmatprep.mubr.msk.bf16.mxu1 %vm6159_vm2, %v6158_v1 }
 0x438   :  { %5696 = vmatprep.subr.bf16.mxu1 %v6158_v1 }
 0x43e   :  { %5693 = vmatmul.mubr.msk.bf16.vlgmr.msra.gmra.mxu1 %vm1287_vm3, %v1275_v4 }
 0x43f   :  { %5697 = vmatpush3.bf16.xpose.msra.mxu1 %v1522_v5  ;;  %5698 = vmatprep.mubr.msk.bf16.mxu1 %vm6159_vm2, %v6158_v1 }
 0x440   :  { %5702 = vmatprep.subr.bf16.mxu1 %v6158_v1 }
 0x446   :  { %5699 = vmatmul.mubr.msk.bf16.vlgmr.msra.gmra.mxu1 %vm1287_vm3, %v1276_v25 }
 0x447   :  { %5703 = vmatpush3.bf16.xpose.msra.mxu1 %v1568_v16  ;;  %5704 = vmatprep.mubr.msk.bf16.mxu1 %vm6159_vm2, %v6158_v1 }
 0x448   :  { %5714 = vmatprep.subr.bf16.mxu1 %v6158_v1 }
 0x44e   :  { %5705 = vmatmul.mubr.msk.bf16.vlgmr.msra.gmra.mxu1 %vm1287_vm3, %v1277_v22 }
 0x44f   :  { %5716 = vmatprep.mubr.msk.bf16.mxu1 %vm6159_vm2, %v6158_v1 }
 0x4de   :  { %v1328_v26 = vpop.f32.mrf.mxu1 }
 0x4df   :  { %v1329_v27 = vadd.f32 %v1328_v26, %v6598_v19 }
 0x4e0   :  { %v5670_v34 = vpop.f32.mrf.mxu1 }
 0x4e1   :  { %v1656_v31 = vsel %vm1287_vm3, %v1329_v27, -inf }
 0x4e2   :  { %v1331_v33 = vpop.f32.mrf.mxu1  ;;  %1657 = vmax.xlane.f32.xlu0 %v1656_v31 }
 0x4e4   :  { %v5671_v36 = vpop.f32.mrf.mxu1 }
 0x4e6   :  { %v1374_v43 = vpop.f32.mrf.mxu1 }
 0x4e7   :  { %v1650_v44 = vpop.f32.mrf.mxu0  ;;  %v1375_v48 = vadd.f32 %v1374_v43, %v6598_v19 }
 0x4e8   :  { %v6603_v46 = vadd.f32 %v1650_v44, %v6598_v19  ;;  %v5676_v47 = vpop.f32.mrf.mxu1 }
 0x4e9   :  { %v5712_v45 = vpop.f32.mrf.mxu0  ;;  %v1659_v24 = vsel %vm1287_vm3, %v1375_v48, -inf }
 0x4ea   :  { %v1377_v49 = vpop.f32.mrf.mxu1  ;;  %v1677_v50 = vsel %vm1287_vm3, %v6603_v46, -inf }
 0x4eb   :  { %v1653_v51 = vpop.f32.mrf.mxu0  ;;  %1678 = vmax.xlane.f32.xlu1 %v1677_v50 }
 0x4ec   :  { %v5677_v52 = vpop.f32.mrf.mxu1 }
 0x4ed   :  { %v5713_v56 = vpop.f32.mrf.mxu0 }
 0x4ee   :  { %v1420_v57 = vpop.f32.mrf.mxu1 }
 0x4ef   :  { %v1421_v28 = vadd.f32 %v1420_v57, %v6598_v19  ;;  %1660 = vmax.xlane.f32.xlu1 %v1659_v24 }
 0x4f0   :  { %v5682_v61 = vpop.f32.mrf.mxu1 }
 0x4f1   :  { %v1662_v29 = vsel %vm1287_vm3, %v1421_v28, -inf }
 0x4f2   :  { %v1423_v30 = vpop.f32.mrf.mxu1  ;;  %1663 = vmax.xlane.f32.xlu0 %v1662_v29 }
 0x4f4   :  { %v5683_v62 = vpop.f32.mrf.mxu1 }
 0x4f6   :  { %v1466_v63 = vpop.f32.mrf.mxu1 }
 0x4f7   :  { %v1467_v2 = vadd.f32 %v1466_v63, %v6598_v19 }
 0x4f8   :  { %v5688_v3 = vpop.f32.mrf.mxu1 }
 0x4f9   :  { %v1665_v7 = vsel %vm1287_vm3, %v1467_v2, -inf }
 0x4fa   :  { %v1469_v8 = vpop.f32.mrf.mxu1  ;;  %1666 = vmax.xlane.f32.xlu0 %v1665_v7 }
 0x4fc   :  { %v5689_v58 = vpop.f32.mrf.mxu1 }
 0x4fe   :  { %v1512_v60 = vpop.f32.mrf.mxu1 }
 0x4ff   :  { %v1513_v9 = vadd.f32 %v1512_v60, %v6598_v19 }
 0x500   :  { %v5694_v10 = vpop.f32.mrf.mxu1 }
 0x501   :  { %v1668_v11 = vsel %vm1287_vm3, %v1513_v9, -inf }
 0x502   :  { %v1515_v12 = vpop.f32.mrf.mxu1  ;;  %1669 = vmax.xlane.f32.xlu0 %v1668_v11 }
 0x504   :  { %v5695_v13 = vpop.f32.mrf.mxu1 }
 0x506   :  { %v1558_v14 = vpop.f32.mrf.mxu1 }
 0x507   :  { %v1559_v15 = vadd.f32 %v1558_v14, %v6598_v19 }
 0x508   :  { %v5700_v55 = vpop.f32.mrf.mxu1 }
 0x509   :  { %v1671_v4 = vsel %vm1287_vm3, %v1559_v15, -inf }
 0x50a   :  { %v1561_v5 = vpop.f32.mrf.mxu1  ;;  %1672 = vmax.xlane.f32.xlu1 %v1671_v4 }
 0x50c   :  { %v5701_v6 = vpop.f32.mrf.mxu1 }
 0x50e   :  { %v1604_v20 = vpop.f32.mrf.mxu1 }
 0x50f   :  { %v6618_v23 = vadd.f32 %v1604_v20, %v6598_v19 }
 0x510   :  { %v5706_v25 = vpop.f32.mrf.mxu1 }
 0x511   :  { %v1674_v16 = vsel %vm1287_vm3, %v6618_v23, -inf }
 0x512   :  { %v1607_v21 = vpop.f32.mrf.mxu1  ;;  %1675 = vmax.xlane.f32.xlu0 %v1674_v16 }
 0x514   :  { %v5707_v22 = vpop.f32.mrf.mxu1 }
 0x51b   :  { %979 = vrot.lane.b32.xlu1 %v6400_v38, %s6167_s21 }
 0x51f   :  { %983 = vrot.lane.b32.xlu1 %v6398_v37, %s6167_s21 }
 0x523   :  { %987 = vrot.lane.b32.xlu1 %v6406_v39, %s6167_s21 }
 0x528   :  { %975 = vrot.lane.b32.xlu0 %v6380_v32, %s6167_s21 }
 0x56b   :  { %v1658_v17 = vpop.xlane.xlu0 %1657 }
 0x56c   :  { %v1680_v18 = vsub.f32 %v1329_v27, %v1658_v17 }
 0x56e   :  { %v1688_v26 = vmul.f32 1.442695, %v1680_v18 }
 0x570   :  { %6041 = vpow2.f32 %v1688_v26 }
 0x574   :  { %v6630_v34 = vpop.xlane.xlu1 %1678 }
 0x578   :  { %v1661_v31 = vpop.xlane.xlu1 %1660 }
 0x579   :  { %v1681_v33 = vsub.f32 %v1375_v48, %v1661_v31 }
 0x57b   :  { %v1690_v36 = vmul.f32 1.442695, %v1681_v33  ;;  %v1664_v43 = vpop.xlane.xlu0 %1663 }
 0x57c   :  { %v1682_v38 = vsub.f32 %v1421_v28, %v1664_v43 }
 0x57d   :  { %v6632_v44 = vpop.eup %6041  ;;  %6043 = vpow2.f32 %v1690_v36 }
 0x57e   :  { %v1692_v37 = vmul.f32 1.442695, %v1682_v38  ;;  %v1704_v39 = vsel %vm1287_vm3, %v6632_v44, 0.0 }
 0x57f   :  { %1705 = vadd.xlane.f32.xlu0 %v1704_v39 }
 0x580   :  { %6045 = vpow2.f32 %v1692_v37 }
 0x583   :  { %v1667_v32 = vpop.xlane.xlu0 %1666 }
 0x584   :  { %v1683_v27 = vsub.f32 %v1467_v2, %v1667_v32 }
 0x586   :  { %v1694_v47 = vmul.f32 1.442695, %v1683_v27 }
 0x588   :  { %6047 = vpow2.f32 %v1694_v47 }
 0x58a   :  { %v6636_v45 = vpop.eup %6043 }
 0x58b   :  { %v1707_v48 = vsel %vm1287_vm3, %v6636_v45, 0.0  ;;  %v1670_v49 = vpop.xlane.xlu0 %1669 }
 0x58c   :  { %1708 = vadd.xlane.f32.xlu1 %v1707_v48  ;;  %v1684_v50 = vsub.f32 %v1513_v9, %v1670_v49 }
 0x58d   :  { %v6640_v51 = vpop.eup %6045 }
 0x58e   :  { %v1696_v52 = vmul.f32 1.442695, %v1684_v50  ;;  %v1710_v56 = vsel %vm1287_vm3, %v6640_v51, 0.0 }
 0x58f   :  { %1711 = vadd.xlane.f32.xlu0 %v1710_v56 }
 0x590   :  { %6049 = vpow2.f32 %v1696_v52 }
 0x593   :  { %v1673_v57 = vpop.xlane.xlu1 %1672 }
 0x594   :  { %v1685_v24 = vsub.f32 %v1559_v15, %v1673_v57 }
 0x595   :  { %v6644_v28 = vpop.eup %6047 }
 0x596   :  { %v1698_v61 = vmul.f32 1.442695, %v1685_v24  ;;  %v1713_v29 = vsel %vm1287_vm3, %v6644_v28, 0.0 }
 0x597   :  { %v980_v30 = vpop.permute.xlu1 %979  ;;  %1714 = vadd.xlane.f32.xlu1 %v1713_v29 }
 0x598   :  { %6051 = vpow2.f32 %v1698_v61 }
 0x59b   :  { %v984_v62 = vpop.permute.xlu1 %983  ;;  %v1676_v63 = vpop.xlane.xlu0 %1675 }
 0x59d   :  { %v6648_v2 = vpop.eup %6049 }
 0x59e   :  { %v1716_v3 = vsel %vm1287_vm3, %v6648_v2, 0.0 }
 0x59f   :  { %v988_v7 = vpop.permute.xlu1 %987  ;;  %1717 = vadd.xlane.f32.xlu0 %v1716_v3  ;;  %v976_v8 = vpop.permute.xlu0 %975 }
 0x5a0   :  { %v1015_v58 = vcombine.low %v980_v30, %v988_v7  ;;  %v1016_v60 = vcombine.high %v980_v30, %v988_v7  ;;  %v999_v9 = vcombine.low %v976_v8, %v984_v62  ;;  %v1000_v10 = vcombine.high %v976_v8, %v984_v62 }
 0x5a1   :  { %v1686_v62 = vsub.f32 %v6618_v23, %v1676_v63 }
 0x5a2   :  { %v1023_v11 = vrot.slane %v1015_v58, %v6431_v53  ;;  %v1030_v12 = vrot.slane %v1016_v60, %v6431_v53  ;;  %v1007_v13 = vrot.slane %v999_v9, %v6431_v53  ;;  %v1014_v14 = vrot.slane %v1000_v10, %v6431_v53 }
 0x5a3   :  { %v1700_v3 = vmul.f32 1.442695, %v1686_v62 }
 0x5a4   :  { %v1031_v15 = vcombine.low %v1007_v13, %v1023_v11  ;;  %v1032_v55 = vcombine.high %v1007_v13, %v1023_v11  ;;  %v1047_v5 = vcombine.low %v1014_v14, %v1030_v12  ;;  %v1048_v6 = vcombine.high %v1014_v14, %v1030_v12 }
 0x5a5   :  { %v6656_v4 = vpop.eup %6051 }
 0x5a6   :  { %v1039_v20 = vrot.slane %v1031_v15, %v6439_v0  ;;  %v1046_v25 = vrot.slane %v1032_v55, %v6439_v0  ;;  %v1719_v16 = vsel %vm1287_vm3, %v6656_v4, 0.0  ;;  %v1055_v21 = vrot.slane %v1047_v5, %v6439_v0 }
 0x5a7   :  { %v1062_v22 = vrot.slane %v1048_v6, %v6439_v0  ;;  %1720 = vadd.xlane.f32.xlu0 %v1719_v16 }
 0x5a8   :  { %v1135_v17 = vcombine.low %v1039_v20, %v1046_v25  ;;  %v5410_v18 = vcombine.high %v1039_v20, %v1046_v25  ;;  %981 = vrot.lane.b32.xlu1 %v6414_v41, %s6167_s21 }
 0x5a9   :  { %v1151_v26 = vcombine.low %v1055_v21, %v1062_v22  ;;  %v5411_v31 = vcombine.high %v1055_v21, %v1062_v22 }
 0x5aa   :  { %v1142_v33 = vrot.slane %v1135_v17, %v6431_v53  ;;  %v1150_v36 = vrot.slane %v5410_v18, %v6431_v53 }
 0x5ab   :  { %v1158_v43 = vrot.slane %v1151_v26, %v6431_v53  ;;  %v1166_v38 = vrot.slane %v5411_v31, %v6431_v53 }
 0x5ac   :  { %985 = vrot.lane.b32.xlu1 %v6412_v40, %s6167_s21  ;;  %v1167_v37 = vcombine.low %v1142_v33, %v1150_v36  ;;  %v1168_v39 = vcombine.high %v1142_v33, %v1150_v36 }
 0x5ad   :  { %v1183_v32 = vcombine.low %v1158_v43, %v1166_v38  ;;  %v1184_v27 = vcombine.high %v1158_v43, %v1166_v38 }
 0x5ae   :  { %v1175_v47 = vrot.slane %v1167_v37, %v6439_v0  ;;  %v1182_v41 = vrot.slane %v1168_v39, %v6439_v0 }
 0x5af   :  { %v1191_v48 = vrot.slane %v1183_v32, %v6439_v0  ;;  %v1198_v49 = vrot.slane %v1184_v27, %v6439_v0 }
 0x5b0   :  { %989 = vrot.lane.b32.xlu1 %v6420_v42, %s6167_s21  ;;  %v1687_v42 = vsub.f32 %v6603_v46, %v6630_v34 }
 0x5b1   :  { %v1199_v50 = vcombine.low %v1175_v47, %v1191_v48  ;;  %v1200_v52 = vcombine.high %v1175_v47, %v1191_v48  ;;  %v1201_v56 = vcombine.low %v1182_v41, %v1198_v49  ;;  %v1202_v57 = vcombine.high %v1182_v41, %v1198_v49 }
 0x5b2   :  { %v1702_v30 = vmul.f32 1.442695, %v1687_v42 }
 0x5b3   :  { %v1752_v40 = vpack.c.bf16 %v1199_v50, %v1199_v50  ;;  %v1753_v24 = vpack.c.bf16 %v1200_v52, %v1200_v52  ;;  %v1754_v63 = vpack.c.bf16 %v1201_v56, %v1201_v56  ;;  %v1755_v15 = vpack.c.bf16 %v1202_v57, %v1202_v57 }
 0x5b4   :  { %6053 = vpow2.f32 %v1702_v30 }
 0x5b5   :  { %v1765_v61 = vsel %vm1763_vm5, %v1752_v40, 0  ;;  %v1811_v29 = vsel %vm1763_vm5, %v1753_v24, 0  ;;  %6055 = vpow2.f32 %v1700_v3  ;;  %v1857_v11 = vsel %vm1763_vm5, %v1754_v63, 0 }
 0x5b6   :  { %5715 = vmatpush3.bf16.msra.mxu1 %v1765_v61  ;;  %5721 = vmatpush3.bf16.msra.mxu0 %v1811_v29  ;;  %v1903_v20 = vsel %vm1763_vm5, %v1755_v15, 0 }
 0x5b7   :  { %5726 = vmatprep.subr.bf16.mxu1 %v6158_v1  ;;  %5732 = vmatprep.subr.bf16.mxu0 %v6158_v1 }
 0x5bd   :  { %977 = vrot.lane.b32.xlu0 %v6386_v35, %s6167_s21 }
 0x5c1   :  { %v6687_v7 = vpop.eup %6053 }
 0x5c2   :  { %v1725_v8 = vsel %vm1287_vm3, %v6687_v7, 0.0  ;;  %v6691_v58 = vpop.eup %6055 }
 0x5c3   :  { %v1722_v46 = vsel %vm1287_vm3, %v6691_v58, 0.0 }
 0x5d4   :  { %1726 = vadd.xlane.f32.xlu1 %v1725_v8 }
 0x5dc   :  { %1723 = vadd.xlane.f32.xlu0 %v1722_v46 }
 0x608   :  { %v1706_v34 = vpop.xlane.xlu0 %1705 }
 0x609   :  { %6057 = vrcp.f32 %v1706_v34 }
 0x615   :  { %v1709_v35 = vpop.xlane.xlu1 %1708 }
 0x616   :  { %v6058_v60 = vpop.eup %6057  ;;  %6059 = vrcp.f32 %v1709_v35 }
 0x617   :  { %v1736_v23 = vmul.f32 %v6058_v60, %v6632_v44 }
 0x618   :  { %v1712_v9 = vpop.xlane.xlu0 %1711 }
 0x619   :  { %6061 = vrcp.f32 %v1712_v9  ;;  %v1744_v10 = vpack.c.bf16 %v1736_v23, %v1736_v23 }
 0x61b   :  { %5717 = vmatmul.mubr.msk.bf16.vlgmr.msra.gmra.mxu1 %vm1287_vm3, %v1744_v10 }
 0x61c   :  { %5727 = vmatpush3.bf16.msra.mxu1 %v1857_v11  ;;  %5728 = vmatprep.mubr.msk.bf16.mxu1 %vm6159_vm2, %v6158_v1 }
 0x61d   :  { %5738 = vmatprep.subr.bf16.mxu1 %v6158_v1 }
 0x620   :  { %v1715_v12 = vpop.xlane.xlu1 %1714 }
 0x621   :  { %6063 = vrcp.f32 %v1715_v12 }
 0x623   :  { %v6060_v13 = vpop.eup %6059 }
 0x624   :  { %v982_v14 = vpop.permute.xlu1 %981  ;;  %v1737_v44 = vmul.f32 %v6060_v13, %v6636_v45 }
 0x626   :  { %v6062_v55 = vpop.eup %6061  ;;  %v1745_v5 = vpack.c.bf16 %v1737_v44, %v1737_v44 }
 0x627   :  { %v1738_v6 = vmul.f32 %v6062_v55, %v6640_v51 }
 0x628   :  { %5723 = vmatmul.mubr.msk.bf16.vlgmr.msra.gmra.mxu0 %vm1287_vm3, %v1745_v5  ;;  %v986_v25 = vpop.permute.xlu1 %985  ;;  %v1718_v45 = vpop.xlane.xlu0 %1717 }
 0x629   :  { %5733 = vmatpush3.bf16.msra.mxu0 %v1903_v20  ;;  %v1746_v16 = vpack.c.bf16 %v1738_v6, %v1738_v6  ;;  %5734 = vmatprep.mubr.msk.bf16.mxu0 %vm6159_vm2, %v6158_v1  ;;  %6065 = vrcp.f32 %v1718_v45 }
 0x62a   :  { %5744 = vmatprep.subr.bf16.mxu0 %v6158_v1 }
 0x62b   :  { %5729 = vmatmul.mubr.msk.bf16.vlgmr.msra.gmra.mxu1 %vm1287_vm3, %v1746_v16 }
 0x62c   :  { %5740 = vmatprep.mubr.msk.bf16.mxu1 %vm6159_vm2, %v6158_v1  ;;  %v990_v51 = vpop.permute.xlu1 %989 }
 0x62d   :  { %v1083_v26 = vcombine.low %v982_v14, %v990_v51  ;;  %v1084_v31 = vcombine.high %v982_v14, %v990_v51 }
 0x62e   :  { %v6064_v21 = vpop.eup %6063 }
 0x62f   :  { %v1739_v22 = vmul.f32 %v6064_v21, %v6644_v28  ;;  %v1091_v38 = vrot.slane %v1083_v26, %v6431_v53  ;;  %v1098_v37 = vrot.slane %v1084_v31, %v6431_v53 }
 0x630   :  { %v1721_v17 = vpop.xlane.xlu0 %1720 }
 0x631   :  { %v1747_v18 = vpack.c.bf16 %v1739_v22, %v1739_v22  ;;  %6067 = vrcp.f32 %v1721_v17 }
 0x633   :  { %5735 = vmatmul.mubr.msk.bf16.vlgmr.msra.gmra.mxu0 %vm1287_vm3, %v1747_v18 }
 0x634   :  { %v978_v33 = vpop.permute.xlu0 %977  ;;  %5746 = vmatprep.mubr.msk.bf16.mxu0 %vm6159_vm2, %v6158_v1 }
 0x635   :  { %v1067_v36 = vcombine.low %v978_v33, %v986_v25  ;;  %v1068_v43 = vcombine.high %v978_v33, %v986_v25 }
 0x636   :  { %v6066_v34 = vpop.eup %6065 }
 0x637   :  { %v1075_v28 = vrot.slane %v1067_v36, %v6431_v53  ;;  %v1082_v39 = vrot.slane %v1068_v43, %v6431_v53  ;;  %v1740_v15 = vmul.f32 %v6066_v34, %v6648_v2 }
 0x639   :  { %v1099_v32 = vcombine.low %v1075_v28, %v1091_v38  ;;  %v1100_v27 = vcombine.high %v1075_v28, %v1091_v38  ;;  %v1115_v47 = vcombine.low %v1082_v39, %v1098_v37  ;;  %v1116_v41 = vcombine.high %v1082_v39, %v1098_v37 }
 0x63a   :  { %v1748_v16 = vpack.c.bf16 %v1740_v15, %v1740_v15 }
 0x63b   :  { %v1107_v48 = vrot.slane %v1099_v32, %v6439_v0  ;;  %v1114_v49 = vrot.slane %v1100_v27, %v6439_v0  ;;  %v1123_v50 = vrot.slane %v1115_v47, %v6439_v0  ;;  %v1130_v52 = vrot.slane %v1116_v41, %v6439_v0 }
 0x63d   :  { %v1203_v56 = vcombine.low %v1107_v48, %v1114_v49  ;;  %v5412_v57 = vcombine.high %v1107_v48, %v1114_v49  ;;  %v1219_v40 = vcombine.low %v1123_v50, %v1130_v52  ;;  %v5413_v24 = vcombine.high %v1123_v50, %v1130_v52 }
 0x63e   :  { %v6068_v9 = vpop.eup %6067 }
 0x63f   :  { %v1210_v61 = vrot.slane %v1203_v56, %v6431_v53  ;;  %v1218_v29 = vrot.slane %v5412_v57, %v6431_v53  ;;  %v1226_v42 = vrot.slane %v1219_v40, %v6431_v53  ;;  %v1234_v30 = vrot.slane %v5413_v24, %v6431_v53 }
 0x640   :  { %v1741_v55 = vmul.f32 %v6068_v9, %v6656_v4 }
 0x641   :  { %v1235_v62 = vcombine.low %v1210_v61, %v1218_v29  ;;  %v1251_v3 = vcombine.low %v1226_v42, %v1234_v30  ;;  %v1236_v8 = vcombine.high %v1210_v61, %v1218_v29  ;;  %v1252_v46 = vcombine.high %v1226_v42, %v1234_v30 }
 0x642   :  { %v1749_v45 = vpack.c.bf16 %v1741_v55, %v1741_v55 }
 0x643   :  { %v1243_v35 = vrot.slane %v1235_v62, %v6439_v0  ;;  %v1259_v60 = vrot.slane %v1251_v3, %v6439_v0  ;;  %v1250_v23 = vrot.slane %v1236_v8, %v6439_v0  ;;  %v1266_v63 = vrot.slane %v1252_v46, %v6439_v0 }
 0x645   :  { %v1267_v10 = vcombine.low %v1243_v35, %v1259_v60  ;;  %v1268_v11 = vcombine.high %v1243_v35, %v1259_v60  ;;  %v1269_v12 = vcombine.low %v1250_v23, %v1266_v63  ;;  %v1270_v13 = vcombine.high %v1250_v23, %v1266_v63 }
 0x647   :  { %v1756_v14 = vpack.c.bf16 %v1267_v10, %v1267_v10  ;;  %v1757_v44 = vpack.c.bf16 %v1268_v11, %v1268_v11  ;;  %v1758_v20 = vpack.c.bf16 %v1269_v12, %v1269_v12  ;;  %v1759_v25 = vpack.c.bf16 %v1270_v13, %v1270_v13 }
 0x649   :  { %v1949_v5 = vsel %vm1763_vm5, %v1756_v14, 0  ;;  %v1995_v6 = vsel %vm1763_vm5, %v1757_v44, 0  ;;  %v2041_v2 = vsel %vm1763_vm5, %v1758_v20, 0  ;;  %v2087_v4 = vsel %vm1763_vm5, %v1759_v25, 0 }
 0x64a   :  { %5739 = vmatpush3.bf16.msra.mxu1 %v1949_v5  ;;  %5745 = vmatpush3.bf16.msra.mxu0 %v1995_v6 }
 0x64b   :  { %5750 = vmatprep.subr.bf16.mxu1 %v6158_v1  ;;  %5756 = vmatprep.subr.bf16.mxu0 %v6158_v1 }
 0x64d   :  { %5741 = vmatmul.mubr.msk.bf16.vlgmr.msra.gmra.mxu1 %vm1287_vm3, %v1748_v16  ;;  %5747 = vmatmul.mubr.msk.bf16.vlgmr.msra.gmra.mxu0 %vm1287_vm3, %v1749_v45 }
 0x64e   :  { %5751 = vmatpush3.bf16.msra.mxu1 %v2041_v2  ;;  %5757 = vmatpush3.bf16.msra.mxu0 %v2087_v4 }
 0x64f   :  { %5758 = vmatprep.mubr.msk.bf16.mxu0 %vm6159_vm2, %v6158_v1  ;;  %5752 = vmatprep.mubr.msk.bf16.mxu1 %vm6159_vm2, %v6158_v1 }
 0x650   :  { %5762 = vmatprep.subr.bf16.mxu1 %v6158_v1  ;;  %5770 = vmatprep.subr.bf16.mxu0 %v6158_v1 }
 0x65d   :  { %v1727_v21 = vpop.xlane.xlu1 %1726 }
 0x65e   :  { %6069 = vrcp.f32 %v1727_v21 }
 0x665   :  { %v1724_v51 = vpop.xlane.xlu0 %1723 }
 0x666   :  { %6071 = vrcp.f32 %v1724_v51 }
 0x66b   :  { %v6070_v22 = vpop.eup %6069 }
 0x66c   :  { %v1743_v17 = vmul.f32 %v6070_v22, %v6687_v7 }
 0x66e   :  { %v1751_v18 = vpack.c.bf16 %v1743_v17, %v1743_v17 }
 0x670   :  { %5759 = vmatmul.mubr.msk.bf16.vlgmr.msra.gmra.mxu0 %vm1287_vm3, %v1751_v18 }
 0x671   :  { %5774 = vmatprep.mubr.msk.bf16.mxu0 %vm6159_vm2, %v6158_v1 }
 0x673   :  { %v6072_v26 = vpop.eup %6071 }
 0x674   :  { %v1742_v31 = vmul.f32 %v6072_v26, %v6691_v58 }
 0x676   :  { %v1750_v33 = vpack.c.bf16 %v1742_v31, %v1742_v31 }
 0x678   :  { %5753 = vmatmul.mubr.msk.bf16.vlgmr.msra.gmra.mxu1 %vm1287_vm3, %v1750_v33 }
 0x679   :  { %5766 = vmatprep.mubr.msk.bf16.mxu1 %vm6159_vm2, %v6158_v1 }
 0x6db   :  { %v1801_v36 = vpop.f32.mrf.mxu1 }
 0x6dd   :  { %v5718_v43 = vpop.f32.mrf.mxu1 }
 0x6df   :  { %v1804_v38 = vpop.f32.mrf.mxu1 }
 0x6e1   :  { %v5719_v37 = vpop.f32.mrf.mxu1 }
 0x6e8   :  { %v1847_v7 = vpop.f32.mrf.mxu0 }
 0x6ea   :  { %v5724_v28 = vpop.f32.mrf.mxu0 }
 0x6eb   :  { %v1893_v39 = vpop.f32.mrf.mxu1 }
 0x6ec   :  { %v1850_v32 = vpop.f32.mrf.mxu0  ;;  %v2129_v27 = vcombine.low %v1801_v36, %v1893_v39  ;;  %v2130_v47 = vcombine.high %v1801_v36, %v1893_v39 }
 0x6ed   :  { %v5730_v41 = vpop.f32.mrf.mxu1 }
 0x6ee   :  { %v5725_v48 = vpop.f32.mrf.mxu0  ;;  %v2137_v40 = vrot.slane %v2129_v27, %v6431_v53  ;;  %v2144_v24 = vrot.slane %v2130_v47, %v6431_v53 }
 0x6ef   :  { %v1896_v49 = vpop.f32.mrf.mxu1 }
 0x6f1   :  { %v5731_v58 = vpop.f32.mrf.mxu1 }
 0x6f3   :  { %v1939_v50 = vpop.f32.mrf.mxu0 }
 0x6f4   :  { %v2145_v52 = vcombine.low %v1847_v7, %v1939_v50  ;;  %v2146_v56 = vcombine.high %v1847_v7, %v1939_v50 }
 0x6f5   :  { %v5736_v57 = vpop.f32.mrf.mxu0 }
 0x6f6   :  { %v2153_v61 = vrot.slane %v2145_v52, %v6431_v53  ;;  %v2160_v29 = vrot.slane %v2146_v56, %v6431_v53 }
 0x6f7   :  { %v1942_v42 = vpop.f32.mrf.mxu0 }
 0x6f8   :  { %v2161_v30 = vcombine.low %v2137_v40, %v2153_v61  ;;  %v2162_v62 = vcombine.high %v2137_v40, %v2153_v61  ;;  %v2177_v3 = vcombine.low %v2144_v24, %v2160_v29  ;;  %v2178_v8 = vcombine.high %v2144_v24, %v2160_v29 }
 0x6f9   :  { %v5737_v46 = vpop.f32.mrf.mxu0 }
 0x6fa   :  { %v2169_v34 = vrot.slane %v2161_v30, %v6439_v0  ;;  %v2176_v35 = vrot.slane %v2162_v62, %v6439_v0  ;;  %v2185_v60 = vrot.slane %v2177_v3, %v6439_v0  ;;  %v2192_v23 = vrot.slane %v2178_v8, %v6439_v0 }
 0x6fc   :  { %v2265_v63 = vcombine.low %v2169_v34, %v2176_v35  ;;  %v5430_v9 = vcombine.high %v2169_v34, %v2176_v35  ;;  %v2281_v10 = vcombine.low %v2185_v60, %v2192_v23  ;;  %v5431_v11 = vcombine.high %v2185_v60, %v2192_v23  ;;  %v6005_v60 = vld [vmem:[%s7475_s9 + $0x8] sm:$0xff]  }
 0x6fd   :  { %5763 = vmatpush3.bf16.msra.mxu1 %v6005_v60 }
 0x6fe   :  { %v2272_v12 = vrot.slane %v2265_v63, %v6431_v53  ;;  %v2280_v13 = vrot.slane %v5430_v9, %v6431_v53  ;;  %v2288_v14 = vrot.slane %v2281_v10, %v6431_v53  ;;  %v2296_v44 = vrot.slane %v5431_v11, %v6431_v53  ;;  %5764 = vmatprep.subr.bf16.mxu1 %v6158_v1 }
 0x700   :  { %v2298_v15 = vcombine.high %v2272_v12, %v2280_v13  ;;  %v2314_v55 = vcombine.high %v2288_v14, %v2296_v44  ;;  %v2297_v5 = vcombine.low %v2272_v12, %v2280_v13  ;;  %v2313_v6 = vcombine.low %v2288_v14, %v2296_v44  ;;  %v6006_v44 = vld [vmem:[%s7475_s9] sm:$0xff]  }
 0x701   :  { %5765 = vmatpush3.bf16.msra.mxu1 %v6006_v44 }
 0x702   :  { %v6768_v20 = vrot.slane %v2298_v15, %v6439_v0  ;;  %v6771_v25 = vrot.slane %v2314_v55, %v6439_v0  ;;  %v6774_v16 = vrot.slane %v2297_v5, %v6439_v0  ;;  %v6777_v45 = vrot.slane %v2313_v6, %v6439_v0  ;;  %5778 = vmatprep.subr.bf16.mxu1 %v6158_v1 }
 0x704   :  { %v2331_v2 = vcombine.low %v6768_v20, %v6771_v25  ;;  %v2329_v4 = vcombine.low %v6774_v16, %v6777_v45  ;;  %v2330_v21 = vcombine.high %v6774_v16, %v6777_v45  ;;  %v2332_v51 = vcombine.high %v6768_v20, %v6771_v25  ;;  %v5434_v16 = vld [vmem:[%s7476_s10] ss:$0 sm:$0xff] }
 0x70d   :  { %v1985_v22 = vpop.f32.mrf.mxu1  ;;  %v2031_v17 = vpop.f32.mrf.mxu0 }
 0x70f   :  { %v5742_v18 = vpop.f32.mrf.mxu1  ;;  %v5748_v26 = vpop.f32.mrf.mxu0 }
 0x711   :  { %v1988_v31 = vpop.f32.mrf.mxu1  ;;  %v2034_v33 = vpop.f32.mrf.mxu0 }
 0x713   :  { %v5743_v36 = vpop.f32.mrf.mxu1  ;;  %v5749_v43 = vpop.f32.mrf.mxu0 }
 0x730   :  { %v2123_v38 = vpop.f32.mrf.mxu0 }
 0x731   :  { %v2213_v39 = vcombine.low %v2031_v17, %v2123_v38  ;;  %v2214_v32 = vcombine.high %v2031_v17, %v2123_v38 }
 0x732   :  { %v5760_v37 = vpop.f32.mrf.mxu0 }
 0x733   :  { %v2221_v49 = vrot.slane %v2213_v39, %v6431_v53  ;;  %v2228_v58 = vrot.slane %v2214_v32, %v6431_v53 }
 0x734   :  { %v2126_v7 = vpop.f32.mrf.mxu0 }
 0x736   :  { %v5761_v28 = vpop.f32.mrf.mxu0 }
 0x738   :  { %v2077_v27 = vpop.f32.mrf.mxu1 }
 0x739   :  { %v2197_v47 = vcombine.low %v1985_v22, %v2077_v27  ;;  %v2198_v41 = vcombine.high %v1985_v22, %v2077_v27 }
 0x73a   :  { %v5754_v48 = vpop.f32.mrf.mxu1 }
 0x73b   :  { %v2205_v50 = vrot.slane %v2197_v47, %v6431_v53  ;;  %v2212_v52 = vrot.slane %v2198_v41, %v6431_v53 }
 0x73c   :  { %v2080_v56 = vpop.f32.mrf.mxu1 }
 0x73d   :  { %v2229_v57 = vcombine.low %v2205_v50, %v2221_v49  ;;  %v2230_v40 = vcombine.high %v2205_v50, %v2221_v49  ;;  %v2245_v24 = vcombine.low %v2212_v52, %v2228_v58  ;;  %v2246_v61 = vcombine.high %v2212_v52, %v2228_v58 }
 0x73e   :  { %v5755_v29 = vpop.f32.mrf.mxu1 }
 0x73f   :  { %v2237_v42 = vrot.slane %v2229_v57, %v6439_v0  ;;  %v2244_v30 = vrot.slane %v2230_v40, %v6439_v0  ;;  %v2253_v62 = vrot.slane %v2245_v24, %v6439_v0  ;;  %v2260_v3 = vrot.slane %v2246_v61, %v6439_v0 }
 0x741   :  { %v2333_v8 = vcombine.low %v2237_v42, %v2244_v30  ;;  %v5432_v46 = vcombine.high %v2237_v42, %v2244_v30  ;;  %v2349_v34 = vcombine.low %v2253_v62, %v2260_v3  ;;  %v5433_v35 = vcombine.high %v2253_v62, %v2260_v3  ;;  %v6007_v30 = vld [vmem:[%s7479_s13 + $0x8] sm:$0xff]  }
 0x742   :  { %5771 = vmatpush3.bf16.msra.mxu0 %v6007_v30  ;;  %v5454_v30 = vld [vmem:[%s7482_s16] ss:$0 sm:$0xff] }
 0x743   :  { %v2340_v23 = vrot.slane %v2333_v8, %v6431_v53  ;;  %v2348_v63 = vrot.slane %v5432_v46, %v6431_v53  ;;  %v2356_v9 = vrot.slane %v2349_v34, %v6431_v53  ;;  %v2364_v10 = vrot.slane %v5433_v35, %v6431_v53  ;;  %5772 = vmatprep.subr.bf16.mxu0 %v6158_v1 }
 0x745   :  { %v2366_v11 = vcombine.high %v2340_v23, %v2348_v63  ;;  %v2382_v12 = vcombine.high %v2356_v9, %v2364_v10  ;;  %v2365_v13 = vcombine.low %v2340_v23, %v2348_v63  ;;  %v2381_v14 = vcombine.low %v2356_v9, %v2364_v10 }
 0x747   :  { %v2380_v15 = vrot.slane %v2366_v11, %v6439_v0  ;;  %v2396_v55 = vrot.slane %v2382_v12, %v6439_v0  ;;  %v2373_v5 = vrot.slane %v2365_v13, %v6439_v0  ;;  %v2389_v6 = vrot.slane %v2381_v14, %v6439_v0 }
 0x749   :  { %v2399_v22 = vcombine.low %v2380_v15, %v2396_v55  ;;  %v2398_v17 = vcombine.high %v2373_v5, %v2389_v6  ;;  %v2397_v18 = vcombine.low %v2373_v5, %v2389_v6  ;;  %v2400_v33 = vcombine.high %v2380_v15, %v2396_v55  ;;  %v5438_v55 = vld [vmem:[%s7477_s11] ss:$0 sm:$0xff] }
 0x74b   :  { %v5966_v26 = vpack.i.bf16 %v2399_v22, %v2331_v2  ;;  %v5961_v31 = vpack.i.bf16 %v2398_v17, %v2330_v21  ;;  %v5971_v36 = vpack.i.bf16 %v2400_v33, %v2332_v51 }
 0x74d   :  { %5967 = vrot.lane.b32.xlu1 %v5966_v26, %s6168_s25  ;;  %5962 = vrot.lane.b32.xlu0 %v5961_v31, %s6169_s3 }
 0x751   :  { %5972 = vrot.lane.b32.xlu0 %v5971_v36, %s6170_s26 }
 0x7bf   :  { %v5968_v43 = vpop.permute.xlu1 %5967  ;;  %v5963_v38 = vpop.permute.xlu0 %5962 }
 0x7c0   :  { %v5965_v37 = vunpack.i.h.bf16 %v5963_v38  ;;  %v5964_v7 = vunpack.i.l.bf16 %v5963_v38  ;;  %v5970_v2 = vunpack.i.h.bf16 %v5968_v43  ;;  %v5969_v21 = vunpack.i.l.bf16 %v5968_v43  ;;  %v6009_v43 = vld [vmem:[%s7481_s15 + $0x38] sm:$0xff]   ;;  %v6010_v38 = vld [vmem:[%s7481_s15 + $0x30] sm:$0xff]  }
 0x7c2   :  { %v2425_v28 = vsel %vm1287_vm3, %v2329_v4, %v5964_v7  ;;  %v2426_v39 = vsel %vm1287_vm3, %v2397_v18, %v5965_v37  ;;  %v5439_v18 = vld [vmem:[%s7478_s12] ss:$0 sm:$0xff]  ;;  %v6011_v37 = vld [vmem:[%s7481_s15 + $0x28] sm:$0xff]  }
 0x7c3   :  { %v5973_v20 = vpop.permute.xlu0 %5972  ;;  %v2428_v32 = vsel %vm2427_vm6, %v2425_v28, %v5969_v21  ;;  %v2429_v27 = vsel %vm2427_vm6, %v2426_v39, %v5970_v2  ;;  %v6012_v7 = vld [vmem:[%s7481_s15 + $0x20] sm:$0xff]   ;;  %v6013_v2 = vld [vmem:[%s7481_s15 + $0x18] sm:$0xff]   ;;  %v6014_v21 = vld [vmem:[%s7481_s15 + $0x10] sm:$0xff]  }
 0x7c4   :  { %v5975_v25 = vunpack.i.h.bf16 %v5973_v20  ;;  %v5974_v51 = vunpack.i.l.bf16 %v5973_v20  ;;  %v6015_v28 = vld [vmem:[%s7481_s15 + $0x8] sm:$0xff]   ;;  %v6016_v39 = vld [vmem:[%s7481_s15] sm:$0xff]  }
 0x7c5   :  { %v5440_v20 = vld [vmem:[%s7480_s14] ss:$0 sm:$0xff] }
 0x7c6   :  { %v2431_v47 = vsel %vm2430_vm7, %v2428_v32, %v5974_v51  ;;  %v2432_v41 = vsel %vm2430_vm7, %v2429_v27, %v5975_v25 }
 0x7c7   :  { %v2433_v48 = vpack.c.bf16 %v2432_v41, %v2431_v47 }
 0x7c9   :  { %5767 = vmatmul.mubr.msk.bf16.vlgmr.msra.gmra.mxu1 %vm223_vm1, %v2433_v48 }
 0x7ca   :  { %5794 = vmatprep.mubr.msk.bf16.mxu1 %vm6159_vm2, %v6158_v1  ;;  %5779 = vmatpush3.bf16.msra.mxu1 %v6009_v43 }
 0x7cb   :  { %5780 = vmatprep.subr.bf16.mxu1 %v6158_v1 }
 0x7ce   :  { %5781 = vmatpush3.bf16.msra.mxu1 %v6010_v38 }
 0x7cf   :  { %5782 = vmatprep.subr.bf16.mxu1 %v6158_v1 }
 0x7d2   :  { %5783 = vmatpush3.bf16.msra.mxu1 %v6011_v37  ;;  %v5457_v37 = vld [vmem:[%s7471_s5 + $0x1] ss:$0 sm:$0xff] }
 0x7d3   :  { %5784 = vmatprep.subr.bf16.mxu1 %v6158_v1 }
 0x7d6   :  { %5785 = vmatpush3.bf16.msra.mxu1 %v6012_v7 }
 0x7d7   :  { %5786 = vmatprep.subr.bf16.mxu1 %v6158_v1 }
 0x7da   :  { %5787 = vmatpush3.bf16.msra.mxu1 %v6013_v2 }
 0x7db   :  { %5788 = vmatprep.subr.bf16.mxu1 %v6158_v1 }
 0x7de   :  { %5789 = vmatpush3.bf16.msra.mxu1 %v6014_v21 }
 0x7df   :  { %5790 = vmatprep.subr.bf16.mxu1 %v6158_v1 }
 0x7e2   :  { %5791 = vmatpush3.bf16.msra.mxu1 %v6015_v28 }
 0x7e3   :  { %5792 = vmatprep.subr.bf16.mxu1 %v6158_v1 }
 0x7e6   :  { %5793 = vmatpush3.bf16.msra.mxu1 %v6016_v39  ;;  %v5458_v39 = vld [vmem:[%s7472_s6 + $0x1] ss:$0 sm:$0xff] }
 0x7e7   :  { %5824 = vmatprep.subr.bf16.mxu1 %v6158_v1 }
 0x889   :  { %v2494_v45 = vpop.f32.mrf.mxu1 }
 0x88a   :  { %v2495_v4 = vadd.f32 %v5434_v16, %v2494_v45 }
 0x88b   :  { %v5768_v49 = vpop.f32.mrf.mxu1 }
 0x88c   :  { %v6833_v58 = vadd.f32 %v2495_v4, %v6338_v54 }
 0x88d   :  { %v2497_v50 = vpop.f32.mrf.mxu1 }
 0x88e   :  { %v2498_v52 = vadd.f32 %v5434_v16, %v2497_v50  ;;  %v2505_v56 = vsel %vm223_vm1, %v6833_v58, 0.0  ;;  %v2513_v57 = vmul.f32 %v6833_v58, %v6833_v58 }
 0x88f   :  { %2506 = vadd.xlane.f32.xlu1 %v2505_v56  ;;  %v5769_v40 = vpop.f32.mrf.mxu1 }
 0x890   :  { %v6840_v24 = vadd.f32 %v2498_v52, %v6344_v59  ;;  %v2515_v61 = vsel %vm223_vm1, %v2513_v57, 0.0  ;;  %v6008_v59 = vld [vmem:[%s7479_s13] sm:$0xff]  }
 0x891   :  { %2516 = vadd.xlane.f32.xlu0 %v2515_v61  ;;  %5773 = vmatpush3.bf16.msra.mxu0 %v6008_v59 }
 0x892   :  { %v2508_v54 = vsel %vm223_vm1, %v6840_v24, 0.0  ;;  %v2514_v29 = vmul.f32 %v6840_v24, %v6840_v24  ;;  %5798 = vmatprep.subr.bf16.mxu0 %v6158_v1 }
 0x894   :  { %v2518_v42 = vsel %vm223_vm1, %v2514_v29, 0.0 }
 0x895   :  { %2509 = vadd.xlane.f32.xlu0 %v2508_v54 }
 0x899   :  { %2519 = vadd.xlane.f32.xlu0 %v2518_v42 }
 0x918   :  { %v2507_v62 = vpop.xlane.xlu1 %2506 }
 0x919   :  { %v2511_v3 = vmul.f32 0.03125, %v2507_v62 }
 0x91a   :  { %v2517_v8 = vpop.xlane.xlu0 %2516 }
 0x91b   :  { %v2523_v46 = vmul.f32 %v2511_v3, %v2511_v3  ;;  %v2521_v34 = vmul.f32 0.03125, %v2517_v8  ;;  %v2527_v44 = vsub.f32 %v6833_v58, %v2511_v3 }
 0x91d   :  { %v2525_v35 = vsub.f32 %v2521_v34, %v2523_v46 }
 0x91e   :  { %v2510_v60 = vpop.xlane.xlu0 %2509 }
 0x91f   :  { %v2529_v23 = vadd.f32 1e-05, %v2525_v35  ;;  %v2512_v63 = vmul.f32 0.03125, %v2510_v60 }
 0x921   :  { %6073 = vrsqrt.f32 %v2529_v23  ;;  %v2524_v10 = vmul.f32 %v2512_v63, %v2512_v63  ;;  %v2528_v5 = vsub.f32 %v6840_v24, %v2512_v63 }
 0x922   :  { %v2520_v9 = vpop.xlane.xlu0 %2519 }
 0x923   :  { %v2522_v11 = vmul.f32 0.03125, %v2520_v9 }
 0x925   :  { %v2526_v12 = vsub.f32 %v2522_v11, %v2524_v10  ;;  %v6017_v10 = vld [vmem:[%s7473_s7 + $0x18] sm:$0xff]   ;;  %v6018_v11 = vld [vmem:[%s7473_s7 + $0x10] sm:$0xff]  }
 0x927   :  { %v2530_v13 = vadd.f32 1e-05, %v2526_v12 }
 0x929   :  { %6075 = vrsqrt.f32 %v2530_v13 }
 0x92e   :  { %v6074_v14 = vpop.eup %6073 }
 0x92f   :  { %v2533_v15 = vmul.f32 %v6074_v14, %v2527_v44 }
 0x931   :  { %v2541_v17 = vmul.f32 %v5438_v55, %v2533_v15 }
 0x933   :  { %v2549_v31 = vadd.f32 %v5439_v18, %v2541_v17 }
 0x936   :  { %v6076_v6 = vpop.eup %6075 }
 0x937   :  { %v2534_v22 = vmul.f32 %v6076_v6, %v2528_v5 }
 0x939   :  { %v2542_v26 = vmul.f32 %v5438_v55, %v2534_v22 }
 0x93b   :  { %v2550_v33 = vadd.f32 %v5439_v18, %v2542_v26 }
 0x93d   :  { %v2551_v36 = vpack.c.bf16 %v2550_v33, %v2549_v31 }
 0x93f   :  { %5775 = vmatmul.mubr.msk.bf16.vlgmr.msra.gmra.mxu0 %vm223_vm1, %v2551_v36 }
 0x940   :  { %5802 = vmatprep.mubr.msk.bf16.mxu0 %vm6159_vm2, %v6158_v1  ;;  %5799 = vmatpush3.bf16.msra.mxu0 %v6017_v10 }
 0x941   :  { %5800 = vmatprep.subr.bf16.mxu0 %v6158_v1 }
 0x944   :  { %5801 = vmatpush3.bf16.msra.mxu0 %v6018_v11 }
 0x945   :  { %5806 = vmatprep.subr.bf16.mxu0 %v6158_v1 }
 0x9ff   :  { %v2612_v25 = vpop.f32.mrf.mxu0 }
 0xa00   :  { %v2613_v51 = vadd.f32 %v5440_v20, %v2612_v25 }
 0xa01   :  { %v5776_v32 = vpop.f32.mrf.mxu0 }
 0xa02   :  { %v5444_v27 = vmul.f32 -1.702, %v2613_v51 }
 0xa03   :  { %v2615_v47 = vpop.f32.mrf.mxu0 }
 0xa04   :  { %v2623_v41 = vmul.f32 1.442695, %v5444_v27  ;;  %v2616_v48 = vadd.f32 %v5440_v20, %v2615_v47  ;;  %v5464_v27 = vld [vmem:[%s7474_s8 + $0x1] ss:$0 sm:$0xff] }
 0xa05   :  { %v5777_v16 = vpop.f32.mrf.mxu0 }
 0xa06   :  { %6077 = vpow2.f32 %v2623_v41  ;;  %v5445_v45 = vmul.f32 -1.702, %v2616_v48 }
 0xa08   :  { %v2625_v4 = vmul.f32 1.442695, %v5445_v45 }
 0xa0a   :  { %6079 = vpow2.f32 %v2625_v4 }
 0xa13   :  { %v6078_v49 = vpop.eup %6077 }
 0xa14   :  { %v2627_v50 = vadd.f32 1.0, %v6078_v49 }
 0xa16   :  { %6081 = vrcp.f32 %v2627_v50 }
 0xa17   :  { %v6080_v52 = vpop.eup %6079 }
 0xa18   :  { %v2628_v56 = vadd.f32 1.0, %v6080_v52 }
 0xa1a   :  { %6083 = vrcp.f32 %v2628_v56 }
 0xa23   :  { %v6082_v57 = vpop.eup %6081 }
 0xa24   :  { %v2633_v61 = vmul.f32 %v6082_v57, %v2613_v51 }
 0xa27   :  { %v6084_v40 = vpop.eup %6083 }
 0xa28   :  { %v2634_v54 = vmul.f32 %v6084_v40, %v2616_v48 }
 0xa2a   :  { %v2635_v29 = vpack.c.bf16 %v2634_v54, %v2633_v61 }
 0xa2c   :  { %5795 = vmatmul.mubr.bf16.vlgmr.msra.gmra.mxu1 %v2635_v29 }
 0xa2d   :  { %5826 = vmatprep.mubr.msk.bf16.mxu1 %vm6159_vm2, %v6158_v1 }
 0xaec   :  { %v2734_v42 = vpop.f32.mrf.mxu1 }
 0xaed   :  { %v2741_v59 = vadd.f32 %v2734_v42, %v6833_v58 }
 0xaee   :  { %v5796_v62 = vpop.f32.mrf.mxu1 }
 0xaef   :  { %v6908_v3 = vadd.f32 %v5454_v30, %v2741_v59 }
 0xaf0   :  { %v2737_v8 = vpop.f32.mrf.mxu1 }
 0xaf1   :  { %v2742_v46 = vadd.f32 %v2737_v8, %v6840_v24  ;;  %v2756_v34 = vsel %vm223_vm1, %v6908_v3, 0.0  ;;  %v2764_v35 = vmul.f32 %v6908_v3, %v6908_v3 }
 0xaf2   :  { %2757 = vadd.xlane.f32.xlu1 %v2756_v34  ;;  %v5797_v60 = vpop.f32.mrf.mxu1 }
 0xaf3   :  { %v6915_v23 = vadd.f32 %v5454_v30, %v2742_v46  ;;  %v2766_v63 = vsel %vm223_vm1, %v2764_v35, 0.0 }
 0xaf5   :  { %v2759_v58 = vsel %vm223_vm1, %v6915_v23, 0.0  ;;  %v2765_v9 = vmul.f32 %v6915_v23, %v6915_v23 }
 0xaf6   :  { %2767 = vadd.xlane.f32.xlu1 %v2766_v63  ;;  %2760 = vadd.xlane.f32.xlu0 %v2759_v58 }
 0xaf7   :  { %v2769_v24 = vsel %vm223_vm1, %v2765_v9, 0.0 }
 0xafa   :  { %2770 = vadd.xlane.f32.xlu0 %v2769_v24 }
 0xb7b   :  { %v2758_v12 = vpop.xlane.xlu1 %2757 }
 0xb7c   :  { %v2762_v13 = vmul.f32 0.03125, %v2758_v12 }
 0xb7e   :  { %v2774_v15 = vmul.f32 %v2762_v13, %v2762_v13  ;;  %v2778_v36 = vsub.f32 %v6908_v3, %v2762_v13 }
 0xb7f   :  { %v2768_v14 = vpop.xlane.xlu1 %2767  ;;  %v2761_v44 = vpop.xlane.xlu0 %2760 }
 0xb80   :  { %v2772_v55 = vmul.f32 0.03125, %v2768_v14  ;;  %v2763_v5 = vmul.f32 0.03125, %v2761_v44 }
 0xb82   :  { %v2776_v6 = vsub.f32 %v2772_v55, %v2774_v15  ;;  %v2775_v18 = vmul.f32 %v2763_v5, %v2763_v5  ;;  %v2779_v7 = vsub.f32 %v6915_v23, %v2763_v5 }
 0xb83   :  { %v2771_v22 = vpop.xlane.xlu0 %2770 }
 0xb84   :  { %v2780_v17 = vadd.f32 1e-05, %v2776_v6  ;;  %v2773_v26 = vmul.f32 0.03125, %v2771_v22 }
 0xb86   :  { %6085 = vrsqrt.f32 %v2780_v17  ;;  %v2777_v31 = vsub.f32 %v2773_v26, %v2775_v18 }
 0xb88   :  { %v2781_v33 = vadd.f32 1e-05, %v2777_v31 }
 0xb8a   :  { %6087 = vrsqrt.f32 %v2781_v33 }
 0xb93   :  { %v6086_v43 = vpop.eup %6085 }
 0xb94   :  { %v2784_v38 = vmul.f32 %v6086_v43, %v2778_v36 }
 0xb96   :  { %v2792_v28 = vmul.f32 %v5457_v37, %v2784_v38 }
 0xb97   :  { %v6088_v2 = vpop.eup %6087 }
 0xb98   :  { %v2785_v21 = vmul.f32 %v6088_v2, %v2779_v7  ;;  %v2800_v25 = vadd.f32 %v5458_v39, %v2792_v28 }
 0xb9a   :  { %v2793_v20 = vmul.f32 %v5457_v37, %v2785_v21 }
 0xb9c   :  { %v2801_v51 = vadd.f32 %v5458_v39, %v2793_v20 }
 0xb9e   :  { %v2802_v32 = vpack.c.bf16 %v2801_v51, %v2800_v25 }
 0xba0   :  { %5803 = vmatmul.mubr.msk.bf16.vlgmr.msra.gmra.mxu0 %vm223_vm1, %v2802_v32 }
 0xba1   :  { %5808 = vmatprep.mubr.msk.bf16.mxu0 %vm6159_vm2, %v6158_v1 }
 0xc60   :  { %v2865_v47 = vpop.f32.mrf.mxu0 }
 0xc61   :  { %v2866_v41 = vadd.f32 %v5464_v27, %v2865_v47 }
 0xc62   :  { %v5804_v48 = vpop.f32.mrf.mxu0 }
 0xc63   :  { %2880 = vrot.lane.b32.xlu0 %v2866_v41, %s6160_s29  ;;  %2874 = vrot.lane.b32.xlu1 %v2866_v41, %s6161_s4 }
 0xc64   :  { %v2868_v16 = vpop.f32.mrf.mxu0 }
 0xc65   :  { %v6947_v45 = vadd.f32 %v5464_v27, %v2868_v16 }
 0xc66   :  { %v5805_v4 = vpop.f32.mrf.mxu0 }
 0xc67   :  { %2886 = vrot.lane.b32.xlu1 %v2866_v41, %s6162_s30  ;;  %2888 = vrot.lane.b32.xlu0 %v6947_v45, %s6162_s30 }
 0xc6b   :  { %2876 = vrot.lane.b32.xlu1 %v6947_v45, %s6161_s4 }
 0xc6f   :  { %2882 = vrot.lane.b32.xlu1 %v6947_v45, %s6160_s29 }
 0xc73   :  { %3164 = vrot.lane.b32.xlu1 %v2866_v41, %s6163_s0 }
 0xcd5   :  { %v6957_v49 = vpop.permute.xlu0 %2880  ;;  %v6959_v50 = vpop.permute.xlu1 %2874 }
 0xcd6   :  { %3168 = vrot.lane.b32.xlu0 %v6959_v50, %s6163_s0  ;;  %3172 = vrot.lane.b32.xlu1 %v6957_v49, %s6163_s0  ;;  %v2892_v29 = vcombine.low %v2866_v41, %v6957_v49  ;;  %v2893_v42 = vcombine.high %v2866_v41, %v6957_v49 }
 0xcd8   :  { %v2900_v62 = vrot.slane %v2892_v29, %v6431_v53  ;;  %v2907_v8 = vrot.slane %v2893_v42, %v6431_v53 }
 0xcd9   :  { %v6965_v52 = vpop.permute.xlu1 %2886  ;;  %v6975_v57 = vpop.permute.xlu0 %2888 }
 0xcda   :  { %3176 = vrot.lane.b32.xlu0 %v6965_v52, %s6163_s0  ;;  %3166 = vrot.lane.b32.xlu1 %v6947_v45, %s6163_s0  ;;  %v2908_v61 = vcombine.low %v6959_v50, %v6965_v52  ;;  %v2909_v54 = vcombine.high %v6959_v50, %v6965_v52 }
 0xcdc   :  { %v2916_v30 = vrot.slane %v2908_v61, %v6431_v53  ;;  %v2923_v59 = vrot.slane %v2909_v54, %v6431_v53 }
 0xcdd   :  { %v6971_v56 = vpop.permute.xlu1 %2876 }
 0xcde   :  { %3170 = vrot.lane.b32.xlu0 %v6971_v56, %s6163_s0  ;;  %v2924_v46 = vcombine.low %v2900_v62, %v2916_v30  ;;  %v2925_v34 = vcombine.high %v2900_v62, %v2916_v30  ;;  %v2940_v35 = vcombine.low %v2907_v8, %v2923_v59  ;;  %v2941_v60 = vcombine.high %v2907_v8, %v2923_v59 }
 0xcdf   :  { %v2976_v13 = vcombine.low %v6971_v56, %v6975_v57  ;;  %v2977_v14 = vcombine.high %v6971_v56, %v6975_v57 }
 0xce0   :  { %v2932_v63 = vrot.slane %v2924_v46, %v6439_v0  ;;  %v2939_v58 = vrot.slane %v2925_v34, %v6439_v0  ;;  %v2948_v9 = vrot.slane %v2940_v35, %v6439_v0  ;;  %v2955_v24 = vrot.slane %v2941_v60, %v6439_v0 }
 0xce1   :  { %v6977_v40 = vpop.permute.xlu1 %2882  ;;  %v2984_v26 = vrot.slane %v2976_v13, %v6431_v53  ;;  %v2991_v31 = vrot.slane %v2977_v14, %v6431_v53 }
 0xce2   :  { %3178 = vrot.lane.b32.xlu0 %v6975_v57, %s6163_s0  ;;  %3174 = vrot.lane.b32.xlu1 %v6977_v40, %s6163_s0  ;;  %v2960_v10 = vcombine.low %v6947_v45, %v6977_v40  ;;  %v2961_v11 = vcombine.high %v6947_v45, %v6977_v40  ;;  %v3028_v44 = vcombine.low %v2932_v63, %v2939_v58 }
 0xce3   :  { %v5468_v15 = vcombine.high %v2932_v63, %v2939_v58  ;;  %v3044_v55 = vcombine.low %v2948_v9, %v2955_v24  ;;  %v5469_v5 = vcombine.high %v2948_v9, %v2955_v24 }
 0xce4   :  { %v2968_v6 = vrot.slane %v2960_v10, %v6431_v53  ;;  %v2975_v22 = vrot.slane %v2961_v11, %v6431_v53  ;;  %v3035_v33 = vrot.slane %v3028_v44, %v6431_v53 }
 0xce5   :  { %v3165_v12 = vpop.permute.xlu1 %3164  ;;  %v3043_v36 = vrot.slane %v5468_v15, %v6431_v53  ;;  %v3051_v43 = vrot.slane %v3044_v55, %v6431_v53  ;;  %v3059_v38 = vrot.slane %v5469_v5, %v6431_v53 }
 0xce6   :  { %3460 = vrot.lane.b32.xlu1 %v2866_v41, %s6167_s21  ;;  %v2992_v2 = vcombine.low %v2968_v6, %v2984_v26  ;;  %v2993_v21 = vcombine.high %v2968_v6, %v2984_v26  ;;  %v3008_v28 = vcombine.low %v2975_v22, %v2991_v31  ;;  %v3009_v39 = vcombine.high %v2975_v22, %v2991_v31 }
 0xce7   :  { %v3060_v32 = vcombine.low %v3035_v33, %v3043_v36  ;;  %v3076_v27 = vcombine.low %v3051_v43, %v3059_v38  ;;  %v3061_v47 = vcombine.high %v3035_v33, %v3043_v36  ;;  %v3077_v41 = vcombine.high %v3051_v43, %v3059_v38 }
 0xce8   :  { %v3000_v54 = vrot.slane %v2992_v2, %v6439_v0  ;;  %v3007_v29 = vrot.slane %v2993_v21, %v6439_v0  ;;  %v7021_v42 = vrot.slane %v3008_v28, %v6439_v0  ;;  %v7024_v30 = vrot.slane %v3009_v39, %v6439_v0 }
 0xce9   :  { %v7027_v60 = vrot.slane %v3060_v32, %v6439_v0  ;;  %v7030_v63 = vrot.slane %v3076_v27, %v6439_v0  ;;  %v7033_v58 = vrot.slane %v3061_v47, %v6439_v0  ;;  %v7036_v9 = vrot.slane %v3077_v41, %v6439_v0 }
 0xcea   :  { %v3096_v13 = vcombine.low %v3000_v54, %v3007_v29  ;;  %v5470_v14 = vcombine.high %v3000_v54, %v3007_v29  ;;  %v3112_v44 = vcombine.low %v7021_v42, %v7024_v30  ;;  %v5471_v15 = vcombine.high %v7021_v42, %v7024_v30 }
 0xd48   :  { %v3169_v17 = vpop.permute.xlu0 %3168  ;;  %v3173_v18 = vpop.permute.xlu1 %3172 }
 0xd49   :  { %v3188_v37 = vcombine.low %v3165_v12, %v3173_v18  ;;  %v3189_v7 = vcombine.high %v3165_v12, %v3173_v18 }
 0xd4b   :  { %v3196_v48 = vrot.slane %v3188_v37, %v6431_v53  ;;  %v3203_v16 = vrot.slane %v3189_v7, %v6431_v53 }
 0xd4c   :  { %v3177_v20 = vpop.permute.xlu0 %3176  ;;  %v3167_v35 = vpop.permute.xlu1 %3166 }
 0xd4d   :  { %v3204_v25 = vcombine.low %v3169_v17, %v3177_v20  ;;  %v3205_v51 = vcombine.high %v3169_v17, %v3177_v20 }
 0xd4f   :  { %v3212_v4 = vrot.slane %v3204_v25, %v6431_v53  ;;  %v3219_v61 = vrot.slane %v3205_v51, %v6431_v53 }
 0xd50   :  { %v3171_v59 = vpop.permute.xlu0 %3170 }
 0xd51   :  { %v3220_v62 = vcombine.low %v3196_v48, %v3212_v4  ;;  %v3221_v8 = vcombine.high %v3196_v48, %v3212_v4  ;;  %v3236_v46 = vcombine.low %v3203_v16, %v3219_v61  ;;  %v3237_v34 = vcombine.high %v3203_v16, %v3219_v61 }
 0xd53   :  { %v3228_v24 = vrot.slane %v3220_v62, %v6439_v0  ;;  %v3235_v10 = vrot.slane %v3221_v8, %v6439_v0  ;;  %v3244_v11 = vrot.slane %v3236_v46, %v6439_v0  ;;  %v3251_v12 = vrot.slane %v3237_v34, %v6439_v0 }
 0xd54   :  { %v3179_v55 = vpop.permute.xlu0 %3178  ;;  %v3175_v18 = vpop.permute.xlu1 %3174  ;;  %v7063_v62 = vrot.slane %v3096_v13, %v6431_v53  ;;  %v3111_v8 = vrot.slane %v5470_v14, %v6431_v53 }
 0xd55   :  { %v3324_v5 = vcombine.low %v3228_v24, %v3235_v10  ;;  %v5472_v6 = vcombine.high %v3228_v24, %v3235_v10  ;;  %v3340_v22 = vcombine.low %v3244_v11, %v3251_v12  ;;  %v5473_v17 = vcombine.high %v3244_v11, %v3251_v12 }
 0xd56   :  { %v3272_v26 = vcombine.low %v3171_v59, %v3179_v55  ;;  %v3273_v31 = vcombine.high %v3171_v59, %v3179_v55  ;;  %v3256_v33 = vcombine.low %v3167_v35, %v3175_v18  ;;  %v3257_v36 = vcombine.high %v3167_v35, %v3175_v18 }
 0xd57   :  { %v3331_v43 = vrot.slane %v3324_v5, %v6431_v53  ;;  %v3339_v38 = vrot.slane %v5472_v6, %v6431_v53  ;;  %v3347_v37 = vrot.slane %v3340_v22, %v6431_v53  ;;  %v3355_v7 = vrot.slane %v5473_v17, %v6431_v53 }
 0xd58   :  { %v3280_v2 = vrot.slane %v3272_v26, %v6431_v53  ;;  %v3287_v21 = vrot.slane %v3273_v31, %v6431_v53  ;;  %v3264_v28 = vrot.slane %v3256_v33, %v6431_v53  ;;  %v3271_v39 = vrot.slane %v3257_v36, %v6431_v53 }
 0xd59   :  { %v3356_v20 = vcombine.low %v3331_v43, %v3339_v38  ;;  %v3372_v25 = vcombine.low %v3347_v37, %v3355_v7  ;;  %v3357_v51 = vcombine.high %v3331_v43, %v3339_v38  ;;  %v3373_v32 = vcombine.high %v3347_v37, %v3355_v7 }
 0xd5a   :  { %v3288_v27 = vcombine.low %v3264_v28, %v3280_v2  ;;  %v3289_v47 = vcombine.high %v3264_v28, %v3280_v2  ;;  %v3304_v41 = vcombine.low %v3271_v39, %v3287_v21  ;;  %v3305_v48 = vcombine.high %v3271_v39, %v3287_v21 }
 0xd5b   :  { %v3364_v16 = vrot.slane %v3356_v20, %v6439_v0  ;;  %v3380_v4 = vrot.slane %v3372_v25, %v6439_v0  ;;  %v3371_v61 = vrot.slane %v3357_v51, %v6439_v0  ;;  %v3387_v54 = vrot.slane %v3373_v32, %v6439_v0 }
 0xd5c   :  { %v3296_v29 = vrot.slane %v3288_v27, %v6439_v0  ;;  %v3303_v42 = vrot.slane %v3289_v47, %v6439_v0  ;;  %v3312_v30 = vrot.slane %v3304_v41, %v6439_v0  ;;  %v3319_v59 = vrot.slane %v3305_v48, %v6439_v0 }
 0xd5d   :  { %v3388_v46 = vcombine.low %v3364_v16, %v3380_v4  ;;  %v3391_v34 = vcombine.high %v3371_v61, %v3387_v54  ;;  %v3119_v12 = vrot.slane %v3112_v44, %v6431_v53  ;;  %v3127_v55 = vrot.slane %v5471_v15, %v6431_v53 }
 0xd5e   :  { %v3392_v35 = vcombine.low %v3296_v29, %v3303_v42  ;;  %v5474_v24 = vcombine.high %v3296_v29, %v3303_v42  ;;  %v3408_v10 = vcombine.low %v3312_v30, %v3319_v59  ;;  %v5475_v11 = vcombine.high %v3312_v30, %v3319_v59 }
 0xd5f   :  { %v3764_v5 = vpack.c.bf16 %v3388_v46, %v3388_v46  ;;  %v3767_v6 = vpack.c.bf16 %v3391_v34, %v3391_v34  ;;  %v3389_v31 = vcombine.high %v3364_v16, %v3380_v4  ;;  %v3092_v36 = vcombine.low %v7027_v60, %v7030_v63 }
 0xd60   :  { %v3399_v22 = vrot.slane %v3392_v35, %v6431_v53  ;;  %v3407_v17 = vrot.slane %v5474_v24, %v6431_v53  ;;  %v3415_v13 = vrot.slane %v3408_v10, %v6431_v53  ;;  %v3423_v14 = vrot.slane %v5475_v11, %v6431_v53 }
 0xd61   :  { %v3776_v18 = vsel %vm1287_vm3, %v3764_v5, 0  ;;  %v3914_v26 = vsel %vm1287_vm3, %v3767_v6, 0  ;;  %v3095_v43 = vcombine.high %v7033_v58, %v7036_v9  ;;  %v3128_v2 = vcombine.low %v7063_v62, %v3111_v8 }
 0xd62   :  { %5807 = vmatpush3.bf16.xpose.msra.mxu0 %v3776_v18  ;;  %5825 = vmatpush3.bf16.xpose.msra.mxu1 %v3914_v26  ;;  %v3424_v44 = vcombine.low %v3399_v22, %v3407_v17  ;;  %v3440_v33 = vcombine.low %v3415_v13, %v3423_v14  ;;  %v3425_v15 = vcombine.high %v3399_v22, %v3407_v17 }
 0xd63   :  { %5812 = vmatprep.subr.bf16.mxu0 %v6158_v1  ;;  %5836 = vmatprep.subr.bf16.mxu1 %v6158_v1  ;;  %v3441_v38 = vcombine.high %v3415_v13, %v3423_v14  ;;  %v3144_v21 = vcombine.low %v3119_v12, %v3127_v55  ;;  %v3765_v28 = vpack.c.bf16 %v3389_v31, %v3389_v31 }
 0xd64   :  { %v3432_v37 = vrot.slane %v3424_v44, %v6439_v0  ;;  %v3448_v7 = vrot.slane %v3440_v33, %v6439_v0  ;;  %v3439_v20 = vrot.slane %v3425_v15, %v6439_v0  ;;  %v3756_v51 = vpack.c.bf16 %v3092_v36, %v3092_v36 }
 0xd65   :  { %v3455_v25 = vrot.slane %v3441_v38, %v6439_v0  ;;  %v3759_v32 = vpack.c.bf16 %v3095_v43, %v3095_v43  ;;  %v3136_v47 = vrot.slane %v3128_v2, %v6439_v0  ;;  %v3152_v41 = vrot.slane %v3144_v21, %v6439_v0 }
 0xd66   :  { %v3457_v39 = vcombine.high %v3432_v37, %v3448_v7  ;;  %v3822_v48 = vsel %vm1287_vm3, %v3765_v28, 0  ;;  %v3390_v16 = vcombine.low %v3371_v61, %v3387_v54  ;;  %v3093_v42 = vcombine.high %v7027_v60, %v7030_v63 }
 0xd67   :  { %v3459_v29 = vcombine.high %v3439_v20, %v3455_v25  ;;  %v3161_v30 = vcombine.high %v3136_v47, %v3152_v41  ;;  %v3129_v61 = vcombine.high %v7063_v62, %v3111_v8  ;;  %v3145_v54 = vcombine.high %v3119_v12, %v3127_v55 }
 0xd68   :  { %v3769_v27 = vpack.c.bf16 %v3457_v39, %v3457_v39  ;;  %v3766_v59 = vpack.c.bf16 %v3390_v16, %v3390_v16  ;;  %v3757_v34 = vpack.c.bf16 %v3093_v42, %v3093_v42  ;;  %v3456_v63 = vcombine.low %v3432_v37, %v3448_v7 }
 0xd69   :  { %5809 = vmatmul.mubr.msk.bf16.vlgmr.msra.gmra.mxu0 %vm1287_vm3, %v3756_v51  ;;  %5827 = vmatmul.mubr.msk.bf16.vlgmr.msra.gmra.mxu1 %vm1287_vm3, %v3759_v32  ;;  %v3771_v46 = vpack.c.bf16 %v3459_v29, %v3459_v29  ;;  %v3761_v35 = vpack.c.bf16 %v3161_v30, %v3161_v30  ;;  %v3143_v24 = vrot.slane %v3129_v61, %v6439_v0 }
 0xd6a   :  { %5813 = vmatpush3.bf16.xpose.msra.mxu0 %v3822_v48  ;;  %v4006_v4 = vsel %vm1287_vm3, %v3769_v27, 0  ;;  %5814 = vmatprep.mubr.msk.bf16.mxu0 %vm6159_vm2, %v6158_v1  ;;  %v3159_v10 = vrot.slane %v3145_v54, %v6439_v0  ;;  %v3868_v60 = vsel %vm1287_vm3, %v3766_v59, 0  ;;  %v3094_v62 = vcombine.low %v7033_v58, %v7036_v9 }
 0xd6b   :  { %5837 = vmatpush3.bf16.xpose.msra.mxu1 %v4006_v4  ;;  %5838 = vmatprep.mubr.msk.bf16.mxu1 %vm6159_vm2, %v6158_v1  ;;  %v4098_v11 = vsel %vm1287_vm3, %v3771_v46, 0  ;;  %v3768_v12 = vpack.c.bf16 %v3456_v63, %v3456_v63  ;;  %v3458_v22 = vcombine.low %v3439_v20, %v3455_v25  ;;  %v3160_v58 = vcombine.low %v3136_v47, %v3152_v41 }
 0xd6c   :  { %5818 = vmatprep.subr.bf16.mxu0 %v6158_v1  ;;  %5848 = vmatprep.subr.bf16.mxu1 %v6158_v1  ;;  %v3163_v8 = vcombine.high %v3143_v24, %v3159_v10  ;;  %v3758_v55 = vpack.c.bf16 %v3094_v62, %v3094_v62  ;;  %v3162_v14 = vcombine.low %v3143_v24, %v3159_v10 }
 0xd6d   :  { %v3960_v6 = vsel %vm1287_vm3, %v3768_v12, 0  ;;  %v3770_v9 = vpack.c.bf16 %v3458_v22, %v3458_v22  ;;  %v3760_v17 = vpack.c.bf16 %v3160_v58, %v3160_v58 }
 0xd6e   :  { %v3763_v5 = vpack.c.bf16 %v3163_v8, %v3163_v8  ;;  %v3762_v18 = vpack.c.bf16 %v3162_v14, %v3162_v14 }
 0xd6f   :  { %v4052_v13 = vsel %vm1287_vm3, %v3770_v9, 0  ;;  %v3461_v9 = vpop.permute.xlu1 %3460 }
 0xd71   :  { %5815 = vmatmul.mubr.msk.bf16.vlgmr.msra.gmra.mxu0 %vm1287_vm3, %v3757_v34 }
 0xd72   :  { %5839 = vmatmul.mubr.msk.bf16.vlgmr.msra.gmra.mxu1 %vm1287_vm3, %v3761_v35  ;;  %5819 = vmatpush3.bf16.xpose.msra.mxu0 %v3868_v60 }
 0xd73   :  { %5849 = vmatpush3.bf16.xpose.msra.mxu1 %v4098_v11  ;;  %5820 = vmatprep.mubr.msk.bf16.mxu0 %vm6159_vm2, %v6158_v1 }
 0xd74   :  { %5850 = vmatprep.mubr.msk.bf16.mxu1 %vm6159_vm2, %v6158_v1  ;;  %5830 = vmatprep.subr.bf16.mxu0 %v6158_v1 }
 0xd75   :  { %5860 = vmatprep.subr.bf16.mxu1 %v6158_v1 }
 0xd79   :  { %5821 = vmatmul.mubr.msk.bf16.vlgmr.msra.gmra.mxu0 %vm1287_vm3, %v3758_v55 }
 0xd7a   :  { %5851 = vmatmul.mubr.msk.bf16.vlgmr.msra.gmra.mxu1 %vm1287_vm3, %v3763_v5  ;;  %5831 = vmatpush3.bf16.xpose.msra.mxu0 %v3960_v6 }
 0xd7b   :  { %5832 = vmatprep.mubr.msk.bf16.mxu0 %vm6159_vm2, %v6158_v1  ;;  %5842 = vmatprep.subr.bf16.mxu0 %v6158_v1 }
 0xd7c   :  { %5862 = vmatprep.mubr.msk.bf16.mxu1 %vm6159_vm2, %v6158_v1 }
 0xd81   :  { %5833 = vmatmul.mubr.msk.bf16.vlgmr.msra.gmra.mxu0 %vm1287_vm3, %v3760_v17 }
 0xd82   :  { %5843 = vmatpush3.bf16.xpose.msra.mxu0 %v4052_v13  ;;  %5844 = vmatprep.mubr.msk.bf16.mxu0 %vm6159_vm2, %v6158_v1 }
 0xd83   :  { %5854 = vmatprep.subr.bf16.mxu0 %v6158_v1 }
 0xd89   :  { %5845 = vmatmul.mubr.msk.bf16.vlgmr.msra.gmra.mxu0 %vm1287_vm3, %v3762_v18 }
 0xd8a   :  { %5856 = vmatprep.mubr.msk.bf16.mxu0 %vm6159_vm2, %v6158_v1 }
 0xe29   :  { %v3812_v26 = vpop.f32.mrf.mxu0  ;;  %v3950_v31 = vpop.f32.mrf.mxu1 }
 0xe2a   :  { %v7131_v44 = vadd.f32 %v3812_v26, %v6598_v19  ;;  %v7134_v33 = vadd.f32 %v3950_v31, %v6598_v19 }
 0xe2b   :  { %v5810_v15 = vpop.f32.mrf.mxu0  ;;  %v5828_v36 = vpop.f32.mrf.mxu1 }
 0xe2c   :  { %v4140_v43 = vsel %vm1287_vm3, %v7131_v44, -inf  ;;  %v4149_v38 = vsel %vm1287_vm3, %v7134_v33, -inf }
 0xe2d   :  { %4141 = vmax.xlane.f32.xlu1 %v4140_v43  ;;  %v3815_v37 = vpop.f32.mrf.mxu0  ;;  %4150 = vmax.xlane.f32.xlu0 %v4149_v38  ;;  %v3953_v7 = vpop.f32.mrf.mxu1 }
 0xe2f   :  { %v5811_v2 = vpop.f32.mrf.mxu0  ;;  %v5829_v21 = vpop.f32.mrf.mxu1 }
 0xe31   :  { %v3858_v28 = vpop.f32.mrf.mxu0 }
 0xe32   :  { %v3859_v39 = vadd.f32 %v3858_v28, %v6598_v19  ;;  %v4042_v20 = vpop.f32.mrf.mxu1 }
 0xe33   :  { %v5816_v25 = vpop.f32.mrf.mxu0  ;;  %v4043_v51 = vadd.f32 %v4042_v20, %v6598_v19 }
 0xe34   :  { %v5840_v32 = vpop.f32.mrf.mxu1  ;;  %v4143_v27 = vsel %vm1287_vm3, %v3859_v39, -inf }
 0xe35   :  { %v3861_v47 = vpop.f32.mrf.mxu0  ;;  %4144 = vmax.xlane.f32.xlu0 %v4143_v27  ;;  %v4155_v4 = vsel %vm1287_vm3, %v4043_v51, -inf }
 0xe36   :  { %v4045_v41 = vpop.f32.mrf.mxu1 }
 0xe37   :  { %v5817_v48 = vpop.f32.mrf.mxu0 }
 0xe38   :  { %v5841_v16 = vpop.f32.mrf.mxu1 }
 0xe39   :  { %v3904_v29 = vpop.f32.mrf.mxu0  ;;  %4156 = vmax.xlane.f32.xlu0 %v4155_v4 }
 0xe3a   :  { %v3905_v42 = vadd.f32 %v3904_v29, %v6598_v19  ;;  %v4134_v30 = vpop.f32.mrf.mxu1 }
 0xe3b   :  { %v5822_v61 = vpop.f32.mrf.mxu0  ;;  %v7146_v54 = vadd.f32 %v4134_v30, %v6598_v19 }
 0xe3c   :  { %v5852_v59 = vpop.f32.mrf.mxu1  ;;  %v4146_v46 = vsel %vm1287_vm3, %v3905_v42, -inf }
 0xe3d   :  { %v3907_v34 = vpop.f32.mrf.mxu0  ;;  %4147 = vmax.xlane.f32.xlu0 %v4146_v46  ;;  %v4161_v60 = vsel %vm1287_vm3, %v7146_v54, -inf }
 0xe3e   :  { %v4137_v35 = vpop.f32.mrf.mxu1  ;;  %3468 = vrot.lane.b32.xlu1 %v6957_v49, %s6167_s21 }
 0xe3f   :  { %v5823_v24 = vpop.f32.mrf.mxu0 }
 0xe40   :  { %v5853_v10 = vpop.f32.mrf.mxu1 }
 0xe41   :  { %v3996_v63 = vpop.f32.mrf.mxu0  ;;  %4162 = vmax.xlane.f32.xlu0 %v4161_v60 }
 0xe42   :  { %3472 = vrot.lane.b32.xlu1 %v6965_v52, %s6167_s21  ;;  %v7158_v49 = vadd.f32 %v3996_v63, %v6598_v19 }
 0xe43   :  { %v5834_v11 = vpop.f32.mrf.mxu0 }
 0xe44   :  { %v4152_v58 = vsel %vm1287_vm3, %v7158_v49, -inf }
 0xe45   :  { %v3999_v62 = vpop.f32.mrf.mxu0 }
 0xe47   :  { %v5835_v8 = vpop.f32.mrf.mxu0 }
 0xe49   :  { %v4088_v12 = vpop.f32.mrf.mxu0 }
 0xe4a   :  { %v7161_v22 = vadd.f32 %v4088_v12, %v6598_v19 }
 0xe4b   :  { %v5846_v55 = vpop.f32.mrf.mxu0 }
 0xe4c   :  { %v4158_v52 = vsel %vm1287_vm3, %v7161_v22, -inf }
 0xe4d   :  { %v4091_v5 = vpop.f32.mrf.mxu0 }
 0xe4f   :  { %v5847_v6 = vpop.f32.mrf.mxu0 }
 0xe57   :  { %3464 = vrot.lane.b32.xlu0 %v6959_v50, %s6167_s21 }
 0xe66   :  { %4153 = vmax.xlane.f32.xlu1 %v4152_v58 }
 0xe6a   :  { %4159 = vmax.xlane.f32.xlu1 %v4158_v52 }
 0xe7b   :  { %3462 = vrot.lane.b32.xlu1 %v6947_v45, %s6167_s21 }
 0xeb6   :  { %v4142_v17 = vpop.xlane.xlu1 %4141  ;;  %v4151_v50 = vpop.xlane.xlu0 %4150 }
 0xeb7   :  { %v4164_v13 = vsub.f32 %v7131_v44, %v4142_v17  ;;  %v4167_v14 = vsub.f32 %v7134_v33, %v4151_v50 }
 0xeb9   :  { %v4172_v19 = vmul.f32 1.442695, %v4164_v13  ;;  %v4178_v18 = vmul.f32 1.442695, %v4167_v14 }
 0xeba   :  { %v3469_v2 = vpop.permute.xlu1 %3468 }
 0xebb   :  { %6089 = vpow2.f32 %v4172_v19  ;;  %v3484_v20 = vcombine.low %v3461_v9, %v3469_v2  ;;  %v3485_v25 = vcombine.high %v3461_v9, %v3469_v2 }
 0xebc   :  { %6091 = vpow2.f32 %v4178_v18 }
 0xebd   :  { %v3492_v48 = vrot.slane %v3484_v20, %v6431_v53  ;;  %v3499_v16 = vrot.slane %v3485_v25, %v6431_v53 }
 0xebe   :  { %v4145_v26 = vpop.xlane.xlu0 %4144 }
 0xebf   :  { %v4165_v31 = vsub.f32 %v3859_v39, %v4145_v26 }
 0xec1   :  { %v4174_v15 = vmul.f32 1.442695, %v4165_v31 }
 0xec2   :  { %v4157_v36 = vpop.xlane.xlu0 %4156 }
 0xec3   :  { %6093 = vpow2.f32 %v4174_v15  ;;  %v4169_v43 = vsub.f32 %v4043_v51, %v4157_v36  ;;  %v3473_v51 = vpop.permute.xlu1 %3472 }
 0xec5   :  { %v4182_v38 = vmul.f32 1.442695, %v4169_v43 }
 0xec6   :  { %v4148_v37 = vpop.xlane.xlu0 %4147 }
 0xec7   :  { %6095 = vpow2.f32 %v4182_v38  ;;  %v4166_v45 = vsub.f32 %v3905_v42, %v4148_v37 }
 0xec8   :  { %v7171_v7 = vpop.eup %6089 }
 0xec9   :  { %v7173_v44 = vpop.eup %6091  ;;  %v4176_v33 = vmul.f32 1.442695, %v4166_v45  ;;  %v4188_v21 = vsel %vm1287_vm3, %v7171_v7, 0.0 }
 0xeca   :  { %4189 = vadd.xlane.f32.xlu1 %v4188_v21  ;;  %v4197_v28 = vsel %vm1287_vm3, %v7173_v44, 0.0  ;;  %v7179_v39 = vpop.xlane.xlu0 %4162 }
 0xecb   :  { %6097 = vpow2.f32 %v4176_v33  ;;  %4198 = vadd.xlane.f32.xlu0 %v4197_v28 }
 0xece   :  { %v3465_v32 = vpop.permute.xlu0 %3464 }
 0xecf   :  { %v3500_v27 = vcombine.low %v3465_v32, %v3473_v51  ;;  %v3501_v47 = vcombine.high %v3465_v32, %v3473_v51 }
 0xed0   :  { %v7181_v41 = vpop.eup %6093 }
 0xed1   :  { %v3508_v4 = vrot.slane %v3500_v27, %v6431_v53  ;;  %v3515_v29 = vrot.slane %v3501_v47, %v6431_v53  ;;  %v4191_v42 = vsel %vm1287_vm3, %v7181_v41, 0.0 }
 0xed2   :  { %4192 = vadd.xlane.f32.xlu0 %v4191_v42 }
 0xed3   :  { %v3516_v30 = vcombine.low %v3492_v48, %v3508_v4  ;;  %v3517_v61 = vcombine.high %v3492_v48, %v3508_v4  ;;  %v3532_v59 = vcombine.low %v3499_v16, %v3515_v29  ;;  %v3533_v46 = vcombine.high %v3499_v16, %v3515_v29 }
 0xed4   :  { %v7189_v34 = vpop.eup %6095 }
 0xed5   :  { %v3524_v35 = vrot.slane %v3516_v30, %v6439_v0  ;;  %v3531_v24 = vrot.slane %v3517_v61, %v6439_v0  ;;  %v3540_v10 = vrot.slane %v3532_v59, %v6439_v0  ;;  %v3547_v60 = vrot.slane %v3533_v46, %v6439_v0 }
 0xed6   :  { %v4203_v63 = vsel %vm1287_vm3, %v7189_v34, 0.0 }
 0xed7   :  { %v3620_v11 = vcombine.low %v3524_v35, %v3531_v24  ;;  %v5476_v62 = vcombine.high %v3524_v35, %v3531_v24  ;;  %v3636_v8 = vcombine.low %v3540_v10, %v3547_v60  ;;  %v5477_v12 = vcombine.high %v3540_v10, %v3547_v60  ;;  %4204 = vadd.xlane.f32.xlu0 %v4203_v63 }
 0xed8   :  { %v7197_v55 = vpop.eup %6097 }
 0xed9   :  { %v3627_v5 = vrot.slane %v3620_v11, %v6431_v53  ;;  %v3635_v6 = vrot.slane %v5476_v62, %v6431_v53  ;;  %v3643_v58 = vrot.slane %v3636_v8, %v6431_v53  ;;  %v3651_v52 = vrot.slane %v5477_v12, %v6431_v53 }
 0xeda   :  { %v4194_v9 = vsel %vm1287_vm3, %v7197_v55, 0.0 }
 0xedb   :  { %4195 = vadd.xlane.f32.xlu1 %v4194_v9  ;;  %v3652_v17 = vcombine.low %v3627_v5, %v3635_v6  ;;  %v3668_v50 = vcombine.low %v3643_v58, %v3651_v52  ;;  %v3653_v13 = vcombine.high %v3627_v5, %v3635_v6  ;;  %v3669_v14 = vcombine.high %v3643_v58, %v3651_v52 }
 0xedd   :  { %v3660_v19 = vrot.slane %v3652_v17, %v6439_v0  ;;  %v3676_v18 = vrot.slane %v3668_v50, %v6439_v0  ;;  %v3667_v26 = vrot.slane %v3653_v13, %v6439_v0  ;;  %v3683_v31 = vrot.slane %v3669_v14, %v6439_v0 }
 0xedf   :  { %v3684_v15 = vcombine.low %v3660_v19, %v3676_v18  ;;  %v3685_v36 = vcombine.high %v3660_v19, %v3676_v18  ;;  %v3686_v43 = vcombine.low %v3667_v26, %v3683_v31  ;;  %v3687_v38 = vcombine.high %v3667_v26, %v3683_v31 }
 0xee1   :  { %v4236_v37 = vpack.c.bf16 %v3684_v15, %v3684_v15  ;;  %v4237_v45 = vpack.c.bf16 %v3685_v36, %v3685_v36  ;;  %v4238_v59 = vpack.c.bf16 %v3686_v43, %v3686_v43  ;;  %v4239_v10 = vpack.c.bf16 %v3687_v38, %v3687_v38 }
 0xee3   :  { %v4248_v2 = vsel %vm1763_vm5, %v4236_v37, 0  ;;  %v4294_v33 = vsel %vm1763_vm5, %v4237_v45, 0  ;;  %v4340_v46 = vsel %vm1763_vm5, %v4238_v59, 0  ;;  %v4386_v63 = vsel %vm1763_vm5, %v4239_v10, 0 }
 0xee4   :  { %5855 = vmatpush3.bf16.msra.mxu0 %v4248_v2  ;;  %5861 = vmatpush3.bf16.msra.mxu1 %v4294_v33 }
 0xee5   :  { %5866 = vmatprep.subr.bf16.mxu0 %v6158_v1  ;;  %5872 = vmatprep.subr.bf16.mxu1 %v6158_v1 }
 0xeec   :  { %3470 = vrot.lane.b32.xlu1 %v6977_v40, %s6167_s21 }
 0xeef   :  { %v4154_v21 = vpop.xlane.xlu1 %4153 }
 0xef0   :  { %v4168_v28 = vsub.f32 %v7158_v49, %v4154_v21  ;;  %3474 = vrot.lane.b32.xlu1 %v6975_v57, %s6167_s21  ;;  %v4171_v57 = vsub.f32 %v7146_v54, %v7179_v39 }
 0xef2   :  { %v4180_v20 = vmul.f32 1.442695, %v4168_v28 }
 0xef3   :  { %v4160_v25 = vpop.xlane.xlu1 %4159 }
 0xef4   :  { %6099 = vpow2.f32 %v4180_v20  ;;  %v4170_v51 = vsub.f32 %v7161_v22, %v4160_v25  ;;  %v4186_v22 = vmul.f32 1.442695, %v4171_v57 }
 0xef6   :  { %v4184_v32 = vmul.f32 1.442695, %v4170_v51 }
 0xef7   :  { %v3463_v4 = vpop.permute.xlu1 %3462 }
 0xef8   :  { %6101 = vpow2.f32 %v4184_v32 }
 0xef9   :  { %6103 = vpow2.f32 %v4186_v22 }
 0xf01   :  { %v7219_v27 = vpop.eup %6099 }
 0xf02   :  { %v4200_v47 = vsel %vm1287_vm3, %v7219_v27, 0.0 }
 0xf03   :  { %4201 = vadd.xlane.f32.xlu0 %v4200_v47 }
 0xf05   :  { %v7223_v40 = vpop.eup %6101 }
 0xf06   :  { %v4206_v49 = vsel %vm1287_vm3, %v7223_v40, 0.0  ;;  %v7231_v48 = vpop.eup %6103 }
 0xf07   :  { %v4209_v16 = vsel %vm1287_vm3, %v7231_v48, 0.0 }
 0xf14   :  { %4207 = vadd.xlane.f32.xlu1 %v4206_v49 }
 0xf19   :  { %3466 = vrot.lane.b32.xlu0 %v6971_v56, %s6167_s21 }
 0xf38   :  { %4210 = vadd.xlane.f32.xlu0 %v4209_v16 }
 0xf53   :  { %v4190_v29 = vpop.xlane.xlu1 %4189 }
 0xf54   :  { %6105 = vrcp.f32 %v4190_v29  ;;  %v4199_v42 = vpop.xlane.xlu0 %4198 }
 0xf5b   :  { %v4193_v30 = vpop.xlane.xlu0 %4192 }
 0xf5c   :  { %6107 = vrcp.f32 %v4193_v30 }
 0xf5d   :  { %6109 = vrcp.f32 %v4199_v42 }
 0xf60   :  { %v4205_v5 = vpop.xlane.xlu0 %4204 }
 0xf61   :  { %v6106_v61 = vpop.eup %6105 }
 0xf62   :  { %v4220_v56 = vmul.f32 %v6106_v61, %v7171_v7 }
 0xf64   :  { %v4196_v54 = vpop.xlane.xlu1 %4195  ;;  %v4228_v39 = vpack.c.bf16 %v4220_v56, %v4220_v56 }
 0xf65   :  { %6111 = vrcp.f32 %v4196_v54 }
 0xf66   :  { %5857 = vmatmul.mubr.msk.bf16.vlgmr.msra.gmra.mxu0 %vm1287_vm3, %v4228_v39  ;;  %6113 = vrcp.f32 %v4205_v5 }
 0xf67   :  { %5867 = vmatpush3.bf16.msra.mxu0 %v4340_v46  ;;  %5868 = vmatprep.mubr.msk.bf16.mxu0 %vm6159_vm2, %v6158_v1 }
 0xf68   :  { %5878 = vmatprep.subr.bf16.mxu0 %v6158_v1  ;;  %v3471_v6 = vpop.permute.xlu1 %3470 }
 0xf69   :  { %v6108_v35 = vpop.eup %6107  ;;  %v3552_v58 = vcombine.low %v3463_v4, %v3471_v6  ;;  %v3553_v52 = vcombine.high %v3463_v4, %v3471_v6 }
 0xf6a   :  { %v4221_v24 = vmul.f32 %v6108_v35, %v7181_v41  ;;  %v6110_v7 = vpop.eup %6109 }
 0xf6b   :  { %v4223_v11 = vmul.f32 %v6110_v7, %v7173_v44  ;;  %v3560_v13 = vrot.slane %v3552_v58, %v6431_v53  ;;  %v3567_v14 = vrot.slane %v3553_v52, %v6431_v53 }
 0xf6c   :  { %v4229_v60 = vpack.c.bf16 %v4221_v24, %v4221_v24  ;;  %v3475_v9 = vpop.permute.xlu1 %3474 }
 0xf6d   :  { %v4231_v12 = vpack.c.bf16 %v4223_v11, %v4223_v11 }
 0xf6e   :  { %5863 = vmatmul.mubr.msk.bf16.vlgmr.msra.gmra.mxu1 %vm1287_vm3, %v4229_v60 }
 0xf6f   :  { %5873 = vmatpush3.bf16.msra.mxu1 %v4386_v63  ;;  %5874 = vmatprep.mubr.msk.bf16.mxu1 %vm6159_vm2, %v6158_v1 }
 0xf70   :  { %5884 = vmatprep.subr.bf16.mxu1 %v6158_v1 }
 0xf72   :  { %v6112_v62 = vpop.eup %6111 }
 0xf73   :  { %v4222_v8 = vmul.f32 %v6112_v62, %v7197_v55  ;;  %v6114_v4 = vpop.eup %6113 }
 0xf74   :  { %v4225_v60 = vmul.f32 %v6114_v4, %v7189_v34 }
 0xf75   :  { %v4230_v41 = vpack.c.bf16 %v4222_v8, %v4222_v8 }
 0xf76   :  { %5875 = vmatmul.mubr.msk.bf16.vlgmr.msra.gmra.mxu1 %vm1287_vm3, %v4231_v12  ;;  %v4233_v12 = vpack.c.bf16 %v4225_v60, %v4225_v60 }
 0xf77   :  { %5869 = vmatmul.mubr.msk.bf16.vlgmr.msra.gmra.mxu0 %vm1287_vm3, %v4230_v41  ;;  %5886 = vmatprep.mubr.msk.bf16.mxu1 %vm6159_vm2, %v6158_v1 }
 0xf78   :  { %5880 = vmatprep.mubr.msk.bf16.mxu0 %vm6159_vm2, %v6158_v1 }
 0xf8c   :  { %v4202_v44 = vpop.xlane.xlu0 %4201 }
 0xf8d   :  { %6115 = vrcp.f32 %v4202_v44 }
 0xf90   :  { %v3467_v17 = vpop.permute.xlu0 %3466 }
 0xf91   :  { %v3568_v55 = vcombine.low %v3467_v17, %v3475_v9  ;;  %v3569_v50 = vcombine.high %v3467_v17, %v3475_v9 }
 0xf93   :  { %v3576_v19 = vrot.slane %v3568_v55, %v6431_v53  ;;  %v3583_v18 = vrot.slane %v3569_v50, %v6431_v53 }
 0xf95   :  { %v3584_v26 = vcombine.low %v3560_v13, %v3576_v19  ;;  %v3585_v31 = vcombine.high %v3560_v13, %v3576_v19  ;;  %v3600_v15 = vcombine.low %v3567_v14, %v3583_v18  ;;  %v3601_v36 = vcombine.high %v3567_v14, %v3583_v18 }
 0xf97   :  { %v3592_v43 = vrot.slane %v3584_v26, %v6439_v0  ;;  %v3599_v38 = vrot.slane %v3585_v31, %v6439_v0  ;;  %v3608_v37 = vrot.slane %v3600_v15, %v6439_v0  ;;  %v3615_v45 = vrot.slane %v3601_v36, %v6439_v0 }
 0xf99   :  { %v3688_v2 = vcombine.low %v3592_v43, %v3599_v38  ;;  %v5478_v33 = vcombine.high %v3592_v43, %v3599_v38  ;;  %v3704_v21 = vcombine.low %v3608_v37, %v3615_v45  ;;  %v5479_v28 = vcombine.high %v3608_v37, %v3615_v45 }
 0xf9a   :  { %v6116_v56 = vpop.eup %6115 }
 0xf9b   :  { %v3695_v20 = vrot.slane %v3688_v2, %v6431_v53  ;;  %v3703_v25 = vrot.slane %v5478_v33, %v6431_v53  ;;  %v3711_v51 = vrot.slane %v3704_v21, %v6431_v53  ;;  %v3719_v32 = vrot.slane %v5479_v28, %v6431_v53 }
 0xf9c   :  { %v4224_v10 = vmul.f32 %v6116_v56, %v7219_v27 }
 0xf9d   :  { %v4208_v47 = vpop.xlane.xlu1 %4207  ;;  %v3720_v49 = vcombine.low %v3695_v20, %v3703_v25  ;;  %v3736_v57 = vcombine.low %v3711_v51, %v3719_v32  ;;  %v3721_v22 = vcombine.high %v3695_v20, %v3703_v25  ;;  %v3737_v16 = vcombine.high %v3711_v51, %v3719_v32 }
 0xf9e   :  { %6117 = vrcp.f32 %v4208_v47  ;;  %v4232_v8 = vpack.c.bf16 %v4224_v10, %v4224_v10 }
 0xf9f   :  { %v3728_v29 = vrot.slane %v3720_v49, %v6439_v0  ;;  %v3744_v42 = vrot.slane %v3736_v57, %v6439_v0  ;;  %v3735_v30 = vrot.slane %v3721_v22, %v6439_v0  ;;  %v3751_v61 = vrot.slane %v3737_v16, %v6439_v0 }
 0xfa1   :  { %v3752_v59 = vcombine.low %v3728_v29, %v3744_v42  ;;  %v3753_v54 = vcombine.high %v3728_v29, %v3744_v42  ;;  %v3754_v39 = vcombine.low %v3735_v30, %v3751_v61  ;;  %v3755_v46 = vcombine.high %v3735_v30, %v3751_v61 }
 0xfa3   :  { %v4240_v35 = vpack.c.bf16 %v3752_v59, %v3752_v59  ;;  %v4241_v24 = vpack.c.bf16 %v3753_v54, %v3753_v54  ;;  %v4242_v11 = vpack.c.bf16 %v3754_v39, %v3754_v39  ;;  %v4243_v62 = vpack.c.bf16 %v3755_v46, %v3755_v46 }
 0xfa5   :  { %v4432_v7 = vsel %vm1763_vm5, %v4240_v35, 0  ;;  %v4478_v63 = vsel %vm1763_vm5, %v4241_v24, 0  ;;  %v4524_v34 = vsel %vm1763_vm5, %v4242_v11, 0  ;;  %v4570_v27 = vsel %vm1763_vm5, %v4243_v62, 0 }
 0xfa6   :  { %5879 = vmatpush3.bf16.msra.mxu0 %v4432_v7  ;;  %5885 = vmatpush3.bf16.msra.mxu1 %v4478_v63 }
 0xfa7   :  { %5890 = vmatprep.subr.bf16.mxu0 %v6158_v1  ;;  %5896 = vmatprep.subr.bf16.mxu1 %v6158_v1 }
 0xfa9   :  { %5881 = vmatmul.mubr.msk.bf16.vlgmr.msra.gmra.mxu0 %vm1287_vm3, %v4232_v8  ;;  %5887 = vmatmul.mubr.msk.bf16.vlgmr.msra.gmra.mxu1 %vm1287_vm3, %v4233_v12 }
 0xfaa   :  { %5891 = vmatpush3.bf16.msra.mxu0 %v4524_v34  ;;  %5897 = vmatpush3.bf16.msra.mxu1 %v4570_v27 }
 0xfab   :  { %v6118_v41 = vpop.eup %6117  ;;  %5892 = vmatprep.mubr.msk.bf16.mxu0 %vm6159_vm2, %v6158_v1  ;;  %5898 = vmatprep.mubr.msk.bf16.mxu1 %vm6159_vm2, %v6158_v1 }
 0xfac   :  { %v4226_v5 = vmul.f32 %v6118_v41, %v7223_v40  ;;  %5902 = vmatprep.subr.bf16.mxu0 %v6158_v1  ;;  %5910 = vmatprep.subr.bf16.mxu1 %v6158_v1 }
 0xfae   :  { %v4234_v6 = vpack.c.bf16 %v4226_v5, %v4226_v5 }
 0xfb1   :  { %5893 = vmatmul.mubr.msk.bf16.vlgmr.msra.gmra.mxu0 %vm1287_vm3, %v4234_v6 }
 0xfb2   :  { %5906 = vmatprep.mubr.msk.bf16.mxu0 %vm6159_vm2, %v6158_v1 }
 0xfc1   :  { %v4211_v44 = vpop.xlane.xlu0 %4210 }
 0xfc2   :  { %6119 = vrcp.f32 %v4211_v44 }
 0xfcf   :  { %v6120_v58 = vpop.eup %6119 }
 0xfd0   :  { %v4227_v52 = vmul.f32 %v6120_v58, %v7231_v48 }
 0xfd2   :  { %v4235_v9 = vpack.c.bf16 %v4227_v52, %v4227_v52 }
 0xfd4   :  { %5899 = vmatmul.mubr.msk.bf16.vlgmr.msra.gmra.mxu1 %vm1287_vm3, %v4235_v9 }
 0xfd5   :  { %5914 = vmatprep.mubr.msk.bf16.mxu1 %vm6159_vm2, %v6158_v1 }
0x1026   :  { %v4284_v40 = vpop.f32.mrf.mxu0 }
0x1028   :  { %v5858_v17 = vpop.f32.mrf.mxu0 }
0x102a   :  { %v4287_v55 = vpop.f32.mrf.mxu0 }
0x102c   :  { %v5859_v50 = vpop.f32.mrf.mxu0 }
0x102e   :  { %v4330_v13 = vpop.f32.mrf.mxu1 }
0x1030   :  { %v5864_v14 = vpop.f32.mrf.mxu1 }
0x1032   :  { %v4333_v19 = vpop.f32.mrf.mxu1 }
0x1034   :  { %v5865_v18 = vpop.f32.mrf.mxu1 }
0x1036   :  { %v4422_v26 = vpop.f32.mrf.mxu1 }
0x1037   :  { %v4376_v31 = vpop.f32.mrf.mxu0  ;;  %v4628_v15 = vcombine.low %v4330_v13, %v4422_v26  ;;  %v4629_v36 = vcombine.high %v4330_v13, %v4422_v26 }
0x1038   :  { %v4612_v43 = vcombine.low %v4284_v40, %v4376_v31  ;;  %v4613_v48 = vcombine.high %v4284_v40, %v4376_v31  ;;  %v5876_v38 = vpop.f32.mrf.mxu1 }
0x1039   :  { %v4636_v37 = vrot.slane %v4628_v15, %v6431_v53  ;;  %v4643_v45 = vrot.slane %v4629_v36, %v6431_v53  ;;  %v5870_v2 = vpop.f32.mrf.mxu0 }
0x103a   :  { %v4620_v33 = vrot.slane %v4612_v43, %v6431_v53  ;;  %v4627_v21 = vrot.slane %v4613_v48, %v6431_v53  ;;  %v4425_v28 = vpop.f32.mrf.mxu1 }
0x103b   :  { %v4379_v20 = vpop.f32.mrf.mxu0 }
0x103c   :  { %v4644_v25 = vcombine.low %v4620_v33, %v4636_v37  ;;  %v4645_v51 = vcombine.high %v4620_v33, %v4636_v37  ;;  %v4660_v32 = vcombine.low %v4627_v21, %v4643_v45  ;;  %v4661_v47 = vcombine.high %v4627_v21, %v4643_v45  ;;  %v5877_v49 = vpop.f32.mrf.mxu1 }
0x103d   :  { %v5871_v57 = vpop.f32.mrf.mxu0 }
0x103e   :  { %v4652_v22 = vrot.slane %v4644_v25, %v6439_v0  ;;  %v4659_v16 = vrot.slane %v4645_v51, %v6439_v0  ;;  %v4668_v4 = vrot.slane %v4660_v32, %v6439_v0  ;;  %v4675_v29 = vrot.slane %v4661_v47, %v6439_v0 }
0x1040   :  { %v4748_v42 = vcombine.low %v4652_v22, %v4659_v16  ;;  %v5496_v30 = vcombine.high %v4652_v22, %v4659_v16  ;;  %v4764_v61 = vcombine.low %v4668_v4, %v4675_v29  ;;  %v5497_v56 = vcombine.high %v4668_v4, %v4675_v29  ;;  %v6019_v16 = vld [vmem:[%s7475_s9 + $0x18] sm:$0xff]  }
0x1041   :  { %5903 = vmatpush3.bf16.msra.mxu0 %v6019_v16 }
0x1042   :  { %v4755_v59 = vrot.slane %v4748_v42, %v6431_v53  ;;  %v4763_v54 = vrot.slane %v5496_v30, %v6431_v53  ;;  %v4771_v39 = vrot.slane %v4764_v61, %v6431_v53  ;;  %v4779_v46 = vrot.slane %v5497_v56, %v6431_v53  ;;  %5904 = vmatprep.subr.bf16.mxu0 %v6158_v1 }
0x1044   :  { %v4781_v35 = vcombine.high %v4755_v59, %v4763_v54  ;;  %v4797_v24 = vcombine.high %v4771_v39, %v4779_v46  ;;  %v4780_v10 = vcombine.low %v4755_v59, %v4763_v54  ;;  %v4796_v60 = vcombine.low %v4771_v39, %v4779_v46  ;;  %v6020_v39 = vld [vmem:[%s7475_s9 + $0x10] sm:$0xff]  }
0x1045   :  { %5905 = vmatpush3.bf16.msra.mxu0 %v6020_v39 }
0x1046   :  { %v7308_v7 = vrot.slane %v4781_v35, %v6439_v0  ;;  %v7311_v63 = vrot.slane %v4797_v24, %v6439_v0  ;;  %v7314_v11 = vrot.slane %v4780_v10, %v6439_v0  ;;  %v7317_v62 = vrot.slane %v4796_v60, %v6439_v0  ;;  %5918 = vmatprep.subr.bf16.mxu0 %v6158_v1 }
0x1048   :  { %v4814_v8 = vcombine.low %v7308_v7, %v7311_v63  ;;  %v4812_v12 = vcombine.low %v7314_v11, %v7317_v62  ;;  %v4813_v34 = vcombine.high %v7314_v11, %v7317_v62  ;;  %v4815_v27 = vcombine.high %v7308_v7, %v7311_v63  ;;  %v5505_v11 = vld [vmem:[%s7476_s10 + $0x1] ss:$0 sm:$0xff] }
0x1069   :  { %v4468_v41 = vpop.f32.mrf.mxu0  ;;  %v4514_v5 = vpop.f32.mrf.mxu1 }
0x106b   :  { %v5882_v6 = vpop.f32.mrf.mxu0  ;;  %v5888_v44 = vpop.f32.mrf.mxu1 }
0x106d   :  { %v4471_v58 = vpop.f32.mrf.mxu0  ;;  %v4517_v52 = vpop.f32.mrf.mxu1 }
0x106f   :  { %v5883_v9 = vpop.f32.mrf.mxu0  ;;  %v5889_v40 = vpop.f32.mrf.mxu1 }
0x1071   :  { %v4560_v17 = vpop.f32.mrf.mxu0 }
0x1072   :  { %v4680_v14 = vcombine.low %v4468_v41, %v4560_v17  ;;  %v4681_v19 = vcombine.high %v4468_v41, %v4560_v17 }
0x1073   :  { %v5894_v55 = vpop.f32.mrf.mxu0 }
0x1074   :  { %v4688_v36 = vrot.slane %v4680_v14, %v6431_v53  ;;  %v4695_v43 = vrot.slane %v4681_v19, %v6431_v53 }
0x1075   :  { %v4563_v50 = vpop.f32.mrf.mxu0 }
0x1077   :  { %v5895_v13 = vpop.f32.mrf.mxu0 }
0x1094   :  { %v4606_v18 = vpop.f32.mrf.mxu1 }
0x1095   :  { %v4696_v26 = vcombine.low %v4514_v5, %v4606_v18  ;;  %v4697_v31 = vcombine.high %v4514_v5, %v4606_v18 }
0x1096   :  { %v5900_v15 = vpop.f32.mrf.mxu1 }
0x1097   :  { %v4704_v48 = vrot.slane %v4696_v26, %v6431_v53  ;;  %v4711_v38 = vrot.slane %v4697_v31, %v6431_v53 }
0x1098   :  { %v4609_v37 = vpop.f32.mrf.mxu1 }
0x1099   :  { %v4712_v45 = vcombine.low %v4688_v36, %v4704_v48  ;;  %v4713_v2 = vcombine.high %v4688_v36, %v4704_v48  ;;  %v4728_v33 = vcombine.low %v4695_v43, %v4711_v38  ;;  %v4729_v21 = vcombine.high %v4695_v43, %v4711_v38 }
0x109a   :  { %v5901_v28 = vpop.f32.mrf.mxu1 }
0x109b   :  { %v4720_v20 = vrot.slane %v4712_v45, %v6439_v0  ;;  %v4727_v25 = vrot.slane %v4713_v2, %v6439_v0  ;;  %v4736_v51 = vrot.slane %v4728_v33, %v6439_v0  ;;  %v4743_v32 = vrot.slane %v4729_v21, %v6439_v0  ;;  %v6021_v21 = vld [vmem:[%s7479_s13 + $0x18] sm:$0xff]  }
0x109c   :  { %5911 = vmatpush3.bf16.msra.mxu1 %v6021_v21 }
0x109d   :  { %v4816_v47 = vcombine.low %v4720_v20, %v4727_v25  ;;  %v5498_v49 = vcombine.high %v4720_v20, %v4727_v25  ;;  %v4832_v57 = vcombine.low %v4736_v51, %v4743_v32  ;;  %v5499_v22 = vcombine.high %v4736_v51, %v4743_v32  ;;  %5912 = vmatprep.subr.bf16.mxu1 %v6158_v1 }
0x109f   :  { %v4823_v4 = vrot.slane %v4816_v47, %v6431_v53  ;;  %v4831_v29 = vrot.slane %v5498_v49, %v6431_v53  ;;  %v4839_v42 = vrot.slane %v4832_v57, %v6431_v53  ;;  %v4847_v30 = vrot.slane %v5499_v22, %v6431_v53 }
0x10a1   :  { %v4849_v61 = vcombine.high %v4823_v4, %v4831_v29  ;;  %v4865_v56 = vcombine.high %v4839_v42, %v4847_v30  ;;  %v4848_v59 = vcombine.low %v4823_v4, %v4831_v29  ;;  %v4864_v54 = vcombine.low %v4839_v42, %v4847_v30 }
0x10a3   :  { %v4863_v46 = vrot.slane %v4849_v61, %v6439_v0  ;;  %v4879_v35 = vrot.slane %v4865_v56, %v6439_v0  ;;  %v4856_v24 = vrot.slane %v4848_v59, %v6439_v0  ;;  %v4872_v10 = vrot.slane %v4864_v54, %v6439_v0  ;;  %v5511_v54 = vld [vmem:[%s7477_s11 + $0x1] ss:$0 sm:$0xff] }
0x10a5   :  { %v4882_v53 = vcombine.low %v4863_v46, %v4879_v35  ;;  %v4881_v60 = vcombine.high %v4856_v24, %v4872_v10  ;;  %v4880_v41 = vcombine.low %v4856_v24, %v4872_v10  ;;  %v4883_v44 = vcombine.high %v4863_v46, %v4879_v35  ;;  %v5512_v10 = vld [vmem:[%s7478_s12 + $0x1] ss:$0 sm:$0xff] }
0x10a7   :  { %v5981_v5 = vpack.i.bf16 %v4882_v53, %v4814_v8  ;;  %v5976_v6 = vpack.i.bf16 %v4881_v60, %v4813_v34  ;;  %v5986_v58 = vpack.i.bf16 %v4883_v44, %v4815_v27  ;;  %v6024_v44 = vld [vmem:[%s7481_s15 + $0x70] sm:$0xff]  }
0x10a9   :  { %5982 = vrot.lane.b32.xlu1 %v5981_v5, %s6168_s25  ;;  %5977 = vrot.lane.b32.xlu0 %v5976_v6, %s6169_s3  ;;  %v6023_v6 = vld [vmem:[%s7481_s15 + $0x78] sm:$0xff]  }
0x10ad   :  { %5987 = vrot.lane.b32.xlu1 %v5986_v58, %s6170_s26  ;;  %v6025_v58 = vld [vmem:[%s7481_s15 + $0x68] sm:$0xff]  }
0x111b   :  { %v5983_v0 = vpop.permute.xlu1 %5982  ;;  %v5978_v52 = vpop.permute.xlu0 %5977 }
0x111c   :  { %v5980_v9 = vunpack.i.h.bf16 %v5978_v52  ;;  %v5979_v40 = vunpack.i.l.bf16 %v5978_v52  ;;  %v5985_v17 = vunpack.i.h.bf16 %v5983_v0  ;;  %v5984_v55 = vunpack.i.l.bf16 %v5983_v0  ;;  %v6026_v0 = vld [vmem:[%s7481_s15 + $0x60] sm:$0xff]   ;;  %v6027_v52 = vld [vmem:[%s7481_s15 + $0x58] sm:$0xff]  }
0x111e   :  { %v4908_v8 = vsel %vm1287_vm3, %v4812_v12, %v5979_v40  ;;  %v4909_v34 = vsel %vm1287_vm3, %v4880_v41, %v5980_v9  ;;  %v6028_v9 = vld [vmem:[%s7481_s15 + $0x50] sm:$0xff]   ;;  %v6029_v40 = vld [vmem:[%s7481_s15 + $0x48] sm:$0xff]  }
0x111f   :  { %v5988_v50 = vpop.permute.xlu1 %5987  ;;  %v4910_v7 = vsel %vm2427_vm6, %v4908_v8, %v5984_v55  ;;  %v4911_v63 = vsel %vm2427_vm6, %v4909_v34, %v5985_v17  ;;  %v6030_v17 = vld [vmem:[%s7481_s15 + $0x40] sm:$0xff]  }
0x1120   :  { %v5990_v13 = vunpack.i.h.bf16 %v5988_v50  ;;  %v5989_v14 = vunpack.i.l.bf16 %v5988_v50  ;;  %v5518_v55 = vld [vmem:[%s7480_s14 + $0x1] ss:$0 sm:$0xff] }
0x1122   :  { %v4912_v27 = vsel %vm2430_vm7, %v4910_v7, %v5989_v14  ;;  %v4913_v19 = vsel %vm2430_vm7, %v4911_v63, %v5990_v13 }
0x1123   :  { %v4914_v18 = vpack.c.bf16 %v4913_v19, %v4912_v27 }
0x1125   :  { %5907 = vmatmul.mubr.msk.bf16.vlgmr.msra.gmra.mxu0 %vm223_vm1, %v4914_v18 }
0x1126   :  { %5934 = vmatprep.mubr.msk.bf16.mxu0 %vm6159_vm2, %v6158_v1  ;;  %5919 = vmatpush3.bf16.msra.mxu0 %v6023_v6 }
0x1127   :  { %5920 = vmatprep.subr.bf16.mxu0 %v6158_v1 }
0x112a   :  { %5921 = vmatpush3.bf16.msra.mxu0 %v6024_v44 }
0x112b   :  { %5922 = vmatprep.subr.bf16.mxu0 %v6158_v1 }
0x112e   :  { %5923 = vmatpush3.bf16.msra.mxu0 %v6025_v58 }
0x112f   :  { %5924 = vmatprep.subr.bf16.mxu0 %v6158_v1 }
0x1132   :  { %5925 = vmatpush3.bf16.msra.mxu0 %v6026_v0 }
0x1133   :  { %5926 = vmatprep.subr.bf16.mxu0 %v6158_v1 }
0x1136   :  { %5927 = vmatpush3.bf16.msra.mxu0 %v6027_v52 }
0x1137   :  { %5928 = vmatprep.subr.bf16.mxu0 %v6158_v1 }
0x113a   :  { %5929 = vmatpush3.bf16.msra.mxu0 %v6028_v9 }
0x113b   :  { %5930 = vmatprep.subr.bf16.mxu0 %v6158_v1 }
0x113e   :  { %5931 = vmatpush3.bf16.msra.mxu0 %v6029_v40 }
0x113f   :  { %5932 = vmatprep.subr.bf16.mxu0 %v6158_v1 }
0x1142   :  { %5933 = vmatpush3.bf16.msra.mxu0 %v6030_v17 }
0x11e5   :  { %v4977_v62 = vpop.f32.mrf.mxu0 }
0x11e6   :  { %v4978_v12 = vadd.f32 %v5505_v11, %v4977_v62 }
0x11e7   :  { %v5908_v26 = vpop.f32.mrf.mxu0 }
0x11e8   :  { %v7373_v31 = vadd.f32 %v4978_v12, %v6908_v3 }
0x11e9   :  { %v4980_v15 = vpop.f32.mrf.mxu0 }
0x11ea   :  { %v4981_v36 = vadd.f32 %v5505_v11, %v4980_v15  ;;  %v4990_v43 = vsel %vm223_vm1, %v7373_v31, 0.0  ;;  %v4998_v48 = vmul.f32 %v7373_v31, %v7373_v31 }
0x11eb   :  { %4991 = vadd.xlane.f32.xlu0 %v4990_v43  ;;  %v5909_v38 = vpop.f32.mrf.mxu0 }
0x11ec   :  { %v7380_v37 = vadd.f32 %v4981_v36, %v6915_v23  ;;  %v5000_v45 = vsel %vm223_vm1, %v4998_v48, 0.0  ;;  %v6022_v23 = vld [vmem:[%s7479_s13 + $0x10] sm:$0xff]  }
0x11ed   :  { %5913 = vmatpush3.bf16.msra.mxu1 %v6022_v23 }
0x11ee   :  { %v4993_v2 = vsel %vm223_vm1, %v7380_v37, 0.0  ;;  %v4999_v3 = vmul.f32 %v7380_v37, %v7380_v37  ;;  %5938 = vmatprep.subr.bf16.mxu1 %v6158_v1 }
0x11ef   :  { %5001 = vadd.xlane.f32.xlu0 %v5000_v45  ;;  %4994 = vadd.xlane.f32.xlu1 %v4993_v2 }
0x11f0   :  { %v5003_v33 = vsel %vm223_vm1, %v4999_v3, 0.0 }
0x11f3   :  { %5004 = vadd.xlane.f32.xlu0 %v5003_v33  ;;  %v5549_v33 = vld [vmem:[%s7482_s16 + $0x1] ss:$0 sm:$0xff] }
0x1274   :  { %v4992_v28 = vpop.xlane.xlu0 %4991 }
0x1275   :  { %v4996_v20 = vmul.f32 0.03125, %v4992_v28 }
0x1277   :  { %v5008_v32 = vmul.f32 %v4996_v20, %v4996_v20  ;;  %v5012_v61 = vsub.f32 %v7373_v31, %v4996_v20 }
0x1278   :  { %v5002_v25 = vpop.xlane.xlu0 %5001  ;;  %v4995_v51 = vpop.xlane.xlu1 %4994 }
0x1279   :  { %v5006_v47 = vmul.f32 0.03125, %v5002_v25  ;;  %v4997_v49 = vmul.f32 0.03125, %v4995_v51 }
0x127b   :  { %v5010_v57 = vsub.f32 %v5006_v47, %v5008_v32  ;;  %v5009_v4 = vmul.f32 %v4997_v49, %v4997_v49  ;;  %v5013_v39 = vsub.f32 %v7380_v37, %v4997_v49 }
0x127c   :  { %v5005_v22 = vpop.xlane.xlu0 %5004 }
0x127d   :  { %v5014_v16 = vadd.f32 1e-05, %v5010_v57  ;;  %v5007_v29 = vmul.f32 0.03125, %v5005_v22 }
0x127f   :  { %6121 = vrsqrt.f32 %v5014_v16  ;;  %v5011_v42 = vsub.f32 %v5007_v29, %v5009_v4  ;;  %v6032_v4 = vld [vmem:[%s7485_s19] sm:$0xff]  }
0x1281   :  { %v5015_v30 = vadd.f32 1e-05, %v5011_v42 }
0x1283   :  { %6123 = vrsqrt.f32 %v5015_v30 }
0x128c   :  { %v6122_v56 = vpop.eup %6121 }
0x128d   :  { %v5018_v59 = vmul.f32 %v6122_v56, %v5012_v61 }
0x128f   :  { %v5026_v24 = vmul.f32 %v5511_v54, %v5018_v59 }
0x1290   :  { %v6124_v46 = vpop.eup %6123 }
0x1291   :  { %v5019_v35 = vmul.f32 %v6124_v46, %v5013_v39  ;;  %v5034_v60 = vadd.f32 %v5512_v10, %v5026_v24  ;;  %v5550_v24 = vld [vmem:[%s7483_s17] ss:$0 sm:$0xff]  ;;  %s6171_s17 = smov [#allocation2]  }
0x1292   :  { %s5373_s22 = sshll.u32 %s6171_s17, 4  ;;  %s5374_s22 = int_to_ptr.vmem [resolvable:$true] %s5373_s22 }
0x1293   :  { %v5027_v53 = vmul.f32 %v5511_v54, %v5019_v35  ;;  %p6140_p1 = scmp.lt.s32.totalorder %s5374_s22, %s5374_s22 }
0x1295   :  { %v5035_v41 = vadd.f32 %v5512_v10, %v5027_v53 }
0x1297   :  { %v5036_v5 = vpack.c.bf16 %v5035_v41, %v5034_v60 }
0x1299   :  { %5915 = vmatmul.mubr.msk.bf16.vlgmr.msra.gmra.mxu1 %vm223_vm1, %v5036_v5 }
0x129a   :  { %5942 = vmatprep.mubr.msk.bf16.mxu1 %vm6159_vm2, %v6158_v1 }
0x1359   :  { %v5099_v8 = vpop.f32.mrf.mxu1 }
0x135a   :  { %v5100_v34 = vadd.f32 %v5518_v55, %v5099_v8 }
0x135b   :  { %v5916_v50 = vpop.f32.mrf.mxu1 }
0x135c   :  { %v5522_v13 = vmul.f32 -1.702, %v5100_v34 }
0x135d   :  { %v5102_v14 = vpop.f32.mrf.mxu1 }
0x135e   :  { %v5110_v7 = vmul.f32 1.442695, %v5522_v13  ;;  %v5103_v63 = vadd.f32 %v5518_v55, %v5102_v14 }
0x135f   :  { %v5917_v27 = vpop.f32.mrf.mxu1 }
0x1360   :  { %6125 = vpow2.f32 %v5110_v7  ;;  %v5523_v19 = vmul.f32 -1.702, %v5103_v63 }
0x1362   :  { %v5112_v18 = vmul.f32 1.442695, %v5523_v19 }
0x1364   :  { %6127 = vpow2.f32 %v5112_v18 }
0x136d   :  { %v6126_v11 = vpop.eup %6125 }
0x136e   :  { %v5114_v62 = vadd.f32 1.0, %v6126_v11 }
0x1370   :  { %6129 = vrcp.f32 %v5114_v62 }
0x1371   :  { %v6128_v12 = vpop.eup %6127 }
0x1372   :  { %v5115_v26 = vadd.f32 1.0, %v6128_v12 }
0x1374   :  { %6131 = vrcp.f32 %v5115_v26 }
0x137d   :  { %v6130_v15 = vpop.eup %6129 }
0x137e   :  { %v5120_v43 = vmul.f32 %v6130_v15, %v5100_v34 }
0x1381   :  { %v6132_v36 = vpop.eup %6131 }
0x1382   :  { %v5121_v48 = vmul.f32 %v6132_v36, %v5103_v63 }
0x1384   :  { %v5122_v38 = vpack.c.bf16 %v5121_v48, %v5120_v43 }
0x1386   :  { %5935 = vmatmul.mubr.bf16.vlgmr.msra.gmra.mxu0 %v5122_v38 }
0x1446   :  { %v5222_v45 = vpop.f32.mrf.mxu0 }
0x1447   :  { %v5229_v3 = vadd.f32 %v5222_v45, %v7373_v31 }
0x1448   :  { %v5936_v2 = vpop.f32.mrf.mxu0 }
0x1449   :  { %v5239_v20 = vadd.f32 %v5549_v33, %v5229_v3 }
0x144a   :  { %v5225_v21 = vpop.f32.mrf.mxu0 }
0x144b   :  { %v5230_v23 = vadd.f32 %v5225_v21, %v7380_v37  ;;  %v5254_v47 = vmul.f32 %v5239_v20, %v5239_v20  ;;  %v6031_v37 = vld [vmem:[%s7485_s19 + $0x8] sm:$0xff]  }
0x144c   :  { %v5937_v28 = vpop.f32.mrf.mxu0  ;;  %5939 = vmatpush3.bf16.msra.mxu1 %v6031_v37 }
0x144d   :  { %v5240_v25 = vadd.f32 %v5549_v33, %v5230_v23  ;;  %5940 = vmatprep.subr.bf16.mxu1 %v6158_v1  ;;  %v5551_v1 = vld [vmem:[%s7484_s18] ss:$0 sm:$0xff]  ;;  %s6135_s18 = scalar_lea.vmem %s5374_s22, 32 }
0x144e   :  { %p6136_p0 = scmp.ne.s32.totalorder %s5374_s22, %s6135_s18  ;;  %p6141_p2 = scmp.lt.s32.totalorder %s6135_s18, %s6135_s18 }
0x144f   :  { %v5245_v51 = vrot.slane %v5240_v25, 7  ;;  %v5255_v32 = vmul.f32 %v5240_v25, %v5240_v25 }
0x1450   :  { %5941 = vmatpush3.bf16.msra.mxu1 %v6032_v4  ;;  %p6142_p3 = por %p6141_p2, %p6140_p1 }
0x1451   :  { %v5247_v49 = vsel %vm5246_vm8, %v5245_v51, %v5239_v20  ;;  %v5258_v57 = vrot.slane %v5255_v32, 7 }
0x1452   :  { %v5250_v22 = vsel %vm5249_vm9, %v5247_v49, 0.0  ;;  %p6143_p4 = pnand %p6142_p3, %p6136_p0 }
0x1453   :  { %5251 = vadd.xlane.f32.xlu0 %v5250_v22  ;;  %v5259_v31 = vsel %vm5246_vm8, %v5258_v57, %v5254_v47 }
0x1454   :  { %v5261_v16 = vsel %vm5249_vm9, %v5259_v31, 0.0 }
0x1455   :  { %5262 = vadd.xlane.f32.xlu1 %v5261_v16 }
0x14dc   :  { %v5252_v29 = vpop.xlane.xlu0 %5251 }
0x14dd   :  { %v5253_v42 = vmul.f32 0.03125, %v5252_v29 }
0x14de   :  { %v5263_v30 = vpop.xlane.xlu1 %5262 }
0x14df   :  { %v5264_v61 = vmul.f32 0.03125, %v5263_v30  ;;  %v5265_v56 = vmul.f32 %v5253_v42, %v5253_v42  ;;  %v5268_v39 = vrot.slane %v5253_v42, 1  ;;  %v5271_v46 = vsub.f32 %v5239_v20, %v5253_v42 }
0x14e1   :  { %v5266_v59 = vsub.f32 %v5264_v61, %v5265_v56  ;;  %v5272_v10 = vsub.f32 %v5240_v25, %v5268_v39 }
0x14e3   :  { %v5273_v54 = vadd.f32 1e-05, %v5266_v59 }
0x14e5   :  { %6133 = vrsqrt.f32 %v5273_v54 }
0x14f2   :  { %v6134_v35 = vpop.eup %6133 }
0x14f3   :  { %v5276_v53 = vrot.slane %v6134_v35, 1  ;;  %v5279_v60 = vmul.f32 %v6134_v35, %v5271_v46 }
0x14f5   :  { %v5280_v41 = vmul.f32 %v5276_v53, %v5272_v10  ;;  %v5287_v5 = vmul.f32 %v5550_v24, %v5279_v60 }
0x14f7   :  { %v5288_v6 = vmul.f32 %v5550_v24, %v5280_v41  ;;  %v5295_v44 = vadd.f32 %v5551_v1, %v5287_v5 }
0x14f9   :  { %v5296_v58 = vadd.f32 %v5551_v1, %v5288_v6  ;;  %v5297_v0 = vpack.c.bf16 %v5295_v44, %v5295_v44 }
0x14fb   :  { %v5298_v52 = vpack.c.bf16 %v5296_v58, %v5296_v58  ;;  %v5305_v40 = vunpack.c.l.b16 %v5297_v0 }
0x14fd   :  { %v5306_v9 = vunpack.c.l.b16 %v5298_v52 }
0x14ff   :  { %v5307_v17 = vrot.slane %v5306_v9, 7 }
0x1501   :  { %v5308_v55 = vsel %vm5246_vm8, %v5307_v17, %v5305_v40 }
0x1502   :  { %v5309_v8 = vpack.c.b16 %v5308_v55, %v5308_v55 }
0x1504   :  { %5943 = vmatmul.mubr.msk.bf16.vlgmr.msra.gmra.mxu1 %vm223_vm1, %v5309_v8 }
0x15c4   :  { %v5359_v34 = vpop.f32.mrf.mxu1 }
0x15c5   :  { %5366 = vst.msk [vmem:[#allocation2] sm:$0x3] %vm5365_vm10, %v5359_v34 }
0x15c6   :  { %v5944_v50 = vpop.f32.mrf.mxu1 }
0x15c7   :  { %6146 = shalt.err (!%p6143_p4)
}
0x15c8   :  { %5376 = dma.vmem_to_hbm [thread:$0]  %s5374_s22, 32, %s7486_s20, [#allocation3]   ;;  %v5362_v13 = vpop.f32.mrf.mxu1 }
0x15ca   :  { %v5945_v14 = vpop.f32.mrf.mxu1 }
0x15cb   :  { %6155 = dma.done.wait [#allocation3], 32  }
0x15cc   :  { %6156 = vsyncadd [#allocation3], 4294967264 }
0x15cd   :  { %5380 = vsyncpa [#allocation3], 1 }

</bundles_post_ra>
